<compile_context>
chip_gen: v7x
topology: tpu7x:2x2x1
jax: 0.10.0
libtpu: 0.0.40
codegen_flags: <defaults>
</compile_context>

<pallas_src>
import functools

import jax
import jax.numpy as jnp
from jax.experimental import pallas as pl
from jax.experimental.pallas import tpu as pltpu


# ----------------------------------------------------------------------------
# Pallas kernel: whole PWConv forward for the full (small) batch in one step.
# ----------------------------------------------------------------------------
def _pwconv_kernel(B, Cin, Cout, Cmid, H, W, x_ref, p_ref, o_ref):
    S = H * W

    # Single loads: params slab (Cmax, 128) and the whole input (B*Cin, S).
    P = p_ref[...]
    X = x_ref[...]
    if X.dtype != jnp.float32:
        X = X.astype(jnp.float32)

    # Column offsets inside the packed parameter slab.
    c_wcsp = 0                       # (Cout rows) x Cin cols : csp weight (BN folded)
    c_w1 = c_wcsp + Cin              # (Cmid rows) x Cout cols: cv1 weight (BN folded)
    c_w2 = c_w1 + Cout               # (Cout rows) x Cmid cols: cv2 weight
    c_w3 = c_w2 + Cmid               # (Cout rows) x Cmid cols: cv3 weight
    c_b = c_w3 + Cmid                # 4 bias columns: b0(csp), b1(cv1), b2(cv2), b3(cv3)

    b0 = P[:Cout, c_b + 0:c_b + 1]   # (Cout, 1)
    b1 = P[:Cmid, c_b + 1:c_b + 2]   # (Cmid, 1)
    b2 = P[:Cout, c_b + 2:c_b + 3]   # (Cout, 1)
    b3 = P[:Cout, c_b + 3:c_b + 4]   # (Cout, 1)

    for b in range(B):  # B=2: static unroll, no grid step per batch element.
        # --- csp: 1x1 conv (BN scale pre-folded) + bias + SiLU ---------------
        # Tiny contraction (Cin=4): VPU broadcast-MAC, bias folded into init.
        acc = b0 + P[:Cout, c_wcsp:c_wcsp + 1] * X[b * Cin:b * Cin + 1, :]
        for c in range(1, Cin):
            acc = acc + P[:Cout, c_wcsp + c:c_wcsp + c + 1] * X[b * Cin + c:b * Cin + c + 1, :]
        y = acc * jax.nn.sigmoid(acc)                    # SiLU, (Cout, S) lane-dense

        # --- PoolBlock: adaptive avg + max pooling ----------------------------
        # One (Cout, H, W) view feeds the four small reductions only; y itself
        # stays flat for the gating multiply and the store.
        y3 = y.reshape(Cout, H, W)
        x_h = jnp.mean(y3, axis=1) + jnp.max(y3, axis=1)     # pool over H -> (Cout, W)
        x_w = jnp.mean(y3, axis=2) + jnp.max(y3, axis=2)     # pool over W -> (Cout, H)
        # Same concat/split ordering as the PyTorch module (exact for H == W).
        x_tmp = jnp.concatenate([x_h, x_w], axis=1)          # (Cout, W + H)

        # --- brk: BrokenBlock is identity in eval mode ------------------------
        # TODO(synk): training-mode BrokenBlock (torch.randperm channel gather) not implemented.

        # --- cv1 + folded BatchNorm + Hardswish (VPU MAC, K = Cout) -----------
        t = b1 + P[:Cmid, c_w1:c_w1 + 1] * x_tmp[0:1, :]
        for c in range(1, Cout):
            t = t + P[:Cmid, c_w1 + c:c_w1 + c + 1] * x_tmp[c:c + 1, :]
        t = t * jnp.clip(t + 3.0, 0.0, 6.0) * (1.0 / 6.0)    # Hardswish, (Cmid, W+H)

        # --- split([h, w]) along the concatenated axis ------------------------
        out_h = t[:, :H]                                     # (Cmid, H)
        out_w = t[:, H:]                                     # (Cmid, W)

        # --- cv2 / cv3: 1x1 convs with bias (VPU MAC, K = Cmid) ---------------
        oh = b2 + P[:Cout, c_w2:c_w2 + 1] * out_h[0:1, :]
        ow = b3 + P[:Cout, c_w3:c_w3 + 1] * out_w[0:1, :]
        for c in range(1, Cmid):
            oh = oh + P[:Cout, c_w2 + c:c_w2 + c + 1] * out_h[c:c + 1, :]
            ow = ow + P[:Cout, c_w3 + c:c_w3 + c + 1] * out_w[c:c + 1, :]

        # --- gate[c, h*W + w] = sigmoid(oh[c, h] * ow[c, w]) -------------------
        # Small outer product + one reshape; sigmoid/multiply/store stay flat
        # and lane-dense (256-wide, unmasked stores).
        raw = (oh[:, :, None] * ow[:, None, :]).reshape(Cout, S)
        o_ref[b * Cout:(b + 1) * Cout, :] = (y * jax.nn.sigmoid(raw)).astype(o_ref.dtype)


# ----------------------------------------------------------------------------
# Wrapper: BN folding, single-slab parameter packing, pallas_call plumbing.
# ----------------------------------------------------------------------------
def pwconv_forward(x_nchw, p):
    B, Cin, H, W = x_nchw.shape
    S = H * W
    Cout = p["w_csp"].shape[0]
    Cmid = p["w_cv1"].shape[0]
    Cmax = max(Cout, Cmid)
    eps = 1e-5  # PyTorch BatchNorm2d default

    # Fold csp BatchNorm (eval mode) into the conv weight; keep only a bias.
    s0 = p["bn_csp_gamma"] / jnp.sqrt(p["bn_csp_var"] + eps)
    b0 = p["bn_csp_beta"] - p["bn_csp_mean"] * s0
    wcsp = p["w_csp"] * s0[:, None]                                # (Cout, Cin)

    # Fold cv1 bias + its BatchNorm into the weight + a bias.
    s1 = p["bn1_gamma"] / jnp.sqrt(p["bn1_var"] + eps)
    b1 = p["bn1_beta"] + (p["b_cv1"] - p["bn1_mean"]) * s1
    w1 = p["w_cv1"] * s1[:, None]                                  # (Cmid, Cout)

    w2 = p["w_cv2"]                                                # (Cout, Cmid)
    w3 = p["w_cv3"]                                                # (Cout, Cmid)

    # Pack everything into one zero-padded lane-dense (Cmax, 128) f32 slab.
    NCOL = 128
    ncols_used = Cin + Cout + 2 * Cmid + 4
    assert ncols_used <= NCOL, "parameter slab layout overflow"

    def _pad_rows(m):
        m = jnp.asarray(m, jnp.float32)
        return jnp.pad(m, ((0, Cmax - m.shape[0]), (0, 0)))

    slab = jnp.concatenate(
        [
            _pad_rows(wcsp), _pad_rows(w1), _pad_rows(w2), _pad_rows(w3),
            _pad_rows(b0[:, None]), _pad_rows(b1[:, None]),
            _pad_rows(p["b_cv2"][:, None]), _pad_rows(p["b_cv3"][:, None]),
        ],
        axis=1,
    )
    slab = jnp.pad(slab, ((0, 0), (0, NCOL - slab.shape[1])))      # (Cmax, 128)

    # NCHW with batch*channel collapsed and spatial flattened: reshapes only.
    x_flat = x_nchw.reshape(B * Cin, S).astype(jnp.float32)

    # Advisory cost estimate (kernel is fixed-overhead bound; helps scheduling).
    flops = B * (
        S * Cout * (2 * Cin + 4)                 # csp MAC + SiLU arithmetic
        + S * Cout * 4                           # pooling + gating arithmetic
        + (W + H) * Cmid * (2 * Cout + 4)        # cv1 MAC + Hardswish
        + H * Cout * 2 * Cmid + W * Cout * 2 * Cmid  # cv2 / cv3 MACs
    )
    transcendentals = 2 * B * Cout * S           # SiLU sigmoid + gate sigmoid
    bytes_accessed = (x_flat.size + slab.size + B * Cout * S) * 4

    out_flat = pl.pallas_call(
        functools.partial(_pwconv_kernel, B, Cin, Cout, Cmid, H, W),
        out_shape=jax.ShapeDtypeStruct((B * Cout, S), jnp.float32),
        grid=(1,),  # collapsed: one step covers the whole (tiny) batch
        in_specs=[
            pl.BlockSpec((B * Cin, S), lambda i: (0, 0)),          # x (flat, lane-dense)
            pl.BlockSpec((Cmax, NCOL), lambda i: (0, 0)),          # packed params slab
        ],
        out_specs=pl.BlockSpec((B * Cout, S), lambda i: (0, 0)),
        compiler_params=pltpu.CompilerParams(dimension_semantics=("arbitrary",)),
        cost_estimate=pl.CostEstimate(
            flops=int(flops),
            transcendentals=int(transcendentals),
            bytes_accessed=int(bytes_accessed),
        ),
    )(x_flat, slab)

    return out_flat.reshape(B, Cout, H, W)                         # NCHW, free reshape


# ----------------------------------------------------------------------------
# Pure-JAX reference (NCHW, mirrors the PyTorch forward in eval mode).
# ----------------------------------------------------------------------------
def pwconv_ref(x, p):
    eps = 1e-5
    hp = jax.lax.Precision.HIGHEST
    y = jnp.einsum("oc,bchw->bohw", p["w_csp"], x, precision=hp)
    s0 = p["bn_csp_gamma"] / jnp.sqrt(p["bn_csp_var"] + eps)
    b0 = p["bn_csp_beta"] - p["bn_csp_mean"] * s0
    y = y * s0[None, :, None, None] + b0[None, :, None, None]
    y = y * jax.nn.sigmoid(y)                                   # SiLU
    B, C, H, W = y.shape
    x_h = jnp.mean(y, axis=2, keepdims=True) + jnp.max(y, axis=2, keepdims=True)  # (B,C,1,W)
    x_w = jnp.mean(y, axis=3, keepdims=True) + jnp.max(y, axis=3, keepdims=True)  # (B,C,H,1)
    x_w = jnp.transpose(x_w, (0, 1, 3, 2))                      # (B,C,1,H)
    x_tmp = jnp.concatenate([x_h, x_w], axis=-1)                # (B,C,1,W+H)
    t = jnp.einsum("mc,bcuv->bmuv", p["w_cv1"], x_tmp, precision=hp) \
        + p["b_cv1"][None, :, None, None]
    s1 = p["bn1_gamma"] / jnp.sqrt(p["bn1_var"] + eps)
    b1 = p["bn1_beta"] - p["bn1_mean"] * s1
    t = t * s1[None, :, None, None] + b1[None, :, None, None]
    t = t * jnp.clip(t + 3.0, 0.0, 6.0) / 6.0                   # Hardswish
    out_h, out_w = t[..., :H], t[..., H:]
    oh = jnp.einsum("om,bmuv->bouv", p["w_cv2"], out_h, precision=hp) \
        + p["b_cv2"][None, :, None, None]
    ow = jnp.einsum("om,bmuv->bouv", p["w_cv3"], out_w, precision=hp) \
        + p["b_cv3"][None, :, None, None]
    out = ow * jnp.transpose(oh, (0, 1, 3, 2))
    return y * jax.nn.sigmoid(out)


if __name__ == "__main__":
    B, Cin, H, W = 2, 4, 16, 16
    Cout, ratio = 8, 32
    Cmid = max(8, Cin // ratio)

    key = jax.random.PRNGKey(0)
    ks = jax.random.split(key, 17)
    params = {
        "w_csp":        jax.random.normal(ks[0], (Cout, Cin)) * 0.5,
        "bn_csp_gamma": 1.0 + 0.1 * jax.random.normal(ks[1], (Cout,)),
        "bn_csp_beta":  0.1 * jax.random.normal(ks[2], (Cout,)),
        "bn_csp_mean":  0.1 * jax.random.normal(ks[3], (Cout,)),
        "bn_csp_var":   jax.random.uniform(ks[4], (Cout,), minval=0.5, maxval=1.5),
        "w_cv1":        jax.random.normal(ks[5], (Cmid, Cout)) * 0.5,
        "b_cv1":        0.1 * jax.random.normal(ks[6], (Cmid,)),
        "bn1_gamma":    1.0 + 0.1 * jax.random.normal(ks[7], (Cmid,)),
        "bn1_beta":     0.1 * jax.random.normal(ks[8], (Cmid,)),
        "bn1_mean":     0.1 * jax.random.normal(ks[9], (Cmid,)),
        "bn1_var":      jax.random.uniform(ks[10], (Cmid,), minval=0.5, maxval=1.5),
        "w_cv2":        jax.random.normal(ks[11], (Cout, Cmid)) * 0.5,
        "b_cv2":        0.1 * jax.random.normal(ks[12], (Cout,)),
        "w_cv3":        jax.random.normal(ks[13], (Cout, Cmid)) * 0.5,
        "b_cv3":        0.1 * jax.random.normal(ks[14], (Cout,)),
    }
    params = {k: v.astype(jnp.float32) for k, v in params.items()}

    x = jax.random.normal(ks[15], (B, Cin, H, W), dtype=jnp.float32)

    out = jax.block_until_ready(pwconv_forward(x, params))
    ref = jax.block_until_ready(pwconv_ref(x, params))

    assert out.shape == (B, Cout, H, W), out.shape
    if not jnp.allclose(out, ref, atol=2e-3, rtol=2e-3):
        max_err = float(jnp.max(jnp.abs(out - ref)))
        raise AssertionError(f"Pallas kernel mismatch vs reference, max_err={max_err}")

    print("KERNEL_OK")
</pallas_src>

<mosaic_0001>
module attributes {stable_mosaic.version = 11 : i64} {
  func.func @_pwconv_kernel(%arg0: i32, %arg1: memref<8x256xf32, #tpu.memory_space<vmem>>, %arg2: memref<8x128xf32, #tpu.memory_space<vmem>>, %arg3: memref<16x256xf32, #tpu.memory_space<vmem>>) attributes {dimension_semantics = [#tpu.dimension_semantics<arbitrary>], iteration_bounds = array<i64: 1>, scalar_prefetch = 0 : i64, scratch_operands = 0 : i64, tpu.core_type = #tpu.core_type<tc>, window_params = [{pipeline_mode = #tpu.pipeline_mode<synchronous>, transform_indices = @transform_0, window_bounds = array<i64: 8, 256>}, {pipeline_mode = #tpu.pipeline_mode<synchronous>, transform_indices = @transform_1, window_bounds = array<i64: 8, 128>}, {pipeline_mode = #tpu.pipeline_mode<synchronous>, transform_indices = @transform_2, window_bounds = array<i64: 16, 256>}]} {
    %c0 = arith.constant 0 : index
    %c0_0 = arith.constant 0 : index
    %0 = vector.load %arg2[%c0, %c0_0] : memref<8x128xf32, #tpu.memory_space<vmem>>, vector<8x128xf32>
    %c0_1 = arith.constant 0 : index
    %c0_2 = arith.constant 0 : index
    %1 = vector.load %arg1[%c0_1, %c0_2] : memref<8x256xf32, #tpu.memory_space<vmem>>, vector<8x256xf32>
    %2 = vector.extract_strided_slice %0 {offsets = [0, 28], sizes = [8, 1], strides = [1, 1]} : vector<8x128xf32> to vector<8x1xf32>
    %3 = vector.extract_strided_slice %0 {offsets = [0, 29], sizes = [8, 1], strides = [1, 1]} : vector<8x128xf32> to vector<8x1xf32>
    %4 = vector.extract_strided_slice %0 {offsets = [0, 30], sizes = [8, 1], strides = [1, 1]} : vector<8x128xf32> to vector<8x1xf32>
    %5 = vector.extract_strided_slice %0 {offsets = [0, 31], sizes = [8, 1], strides = [1, 1]} : vector<8x128xf32> to vector<8x1xf32>
    %6 = vector.extract_strided_slice %0 {offsets = [0, 0], sizes = [8, 1], strides = [1, 1]} : vector<8x128xf32> to vector<8x1xf32>
    %7 = vector.extract_strided_slice %1 {offsets = [0, 0], sizes = [1, 256], strides = [1, 1]} : vector<8x256xf32> to vector<1x256xf32>
    %8 = vector.broadcast %6 : vector<8x1xf32> to vector<8x256xf32>
    %9 = vector.broadcast %7 : vector<1x256xf32> to vector<8x256xf32>
    %10 = arith.mulf %8, %9 : vector<8x256xf32>
    %11 = vector.broadcast %2 : vector<8x1xf32> to vector<8x256xf32>
    %12 = arith.addf %11, %10 : vector<8x256xf32>
    %13 = vector.extract_strided_slice %0 {offsets = [0, 1], sizes = [8, 1], strides = [1, 1]} : vector<8x128xf32> to vector<8x1xf32>
    %14 = vector.extract_strided_slice %1 {offsets = [1, 0], sizes = [1, 256], strides = [1, 1]} : vector<8x256xf32> to vector<1x256xf32>
    %15 = vector.broadcast %13 : vector<8x1xf32> to vector<8x256xf32>
    %16 = vector.broadcast %14 : vector<1x256xf32> to vector<8x256xf32>
    %17 = arith.mulf %15, %16 : vector<8x256xf32>
    %18 = arith.addf %12, %17 : vector<8x256xf32>
    %19 = vector.extract_strided_slice %0 {offsets = [0, 2], sizes = [8, 1], strides = [1, 1]} : vector<8x128xf32> to vector<8x1xf32>
    %20 = vector.extract_strided_slice %1 {offsets = [2, 0], sizes = [1, 256], strides = [1, 1]} : vector<8x256xf32> to vector<1x256xf32>
    %21 = vector.broadcast %19 : vector<8x1xf32> to vector<8x256xf32>
    %22 = vector.broadcast %20 : vector<1x256xf32> to vector<8x256xf32>
    %23 = arith.mulf %21, %22 : vector<8x256xf32>
    %24 = arith.addf %18, %23 : vector<8x256xf32>
    %25 = vector.extract_strided_slice %0 {offsets = [0, 3], sizes = [8, 1], strides = [1, 1]} : vector<8x128xf32> to vector<8x1xf32>
    %26 = vector.extract_strided_slice %1 {offsets = [3, 0], sizes = [1, 256], strides = [1, 1]} : vector<8x256xf32> to vector<1x256xf32>
    %27 = vector.broadcast %25 : vector<8x1xf32> to vector<8x256xf32>
    %28 = vector.broadcast %26 : vector<1x256xf32> to vector<8x256xf32>
    %29 = arith.mulf %27, %28 : vector<8x256xf32>
    %30 = arith.addf %24, %29 : vector<8x256xf32>
    %31 = arith.negf %30 : vector<8x256xf32>
    %32 = math.exp %31 : vector<8x256xf32>
    %cst = arith.constant 1.000000e+00 : f32
    %33 = vector.broadcast %cst : f32 to vector<8x256xf32>
    %34 = arith.addf %33, %32 : vector<8x256xf32>
    %35 = arith.divf %33, %34 : vector<8x256xf32>
    %36 = arith.mulf %30, %35 : vector<8x256xf32>
    %37 = vector.shape_cast %36 : vector<8x256xf32> to vector<8x16x16xf32>
    %cst_3 = arith.constant dense<0.000000e+00> : vector<8x16xf32>
    %38 = vector.multi_reduction <add>, %37, %cst_3 [1] : vector<8x16x16xf32> to vector<8x16xf32>
    %cst_4 = arith.constant 1.600000e+01 : f32
    %39 = vector.broadcast %cst_4 : f32 to vector<8x16xf32>
    %40 = arith.divf %38, %39 : vector<8x16xf32>
    %cst_5 = arith.constant dense<0xFF800000> : vector<8x16xf32>
    %41 = vector.multi_reduction <maximumf>, %37, %cst_5 [1] : vector<8x16x16xf32> to vector<8x16xf32>
    %42 = arith.addf %40, %41 : vector<8x16xf32>
    %cst_6 = arith.constant dense<0.000000e+00> : vector<8x16xf32>
    %43 = vector.multi_reduction <add>, %37, %cst_6 [2] : vector<8x16x16xf32> to vector<8x16xf32>
    %cst_7 = arith.constant 1.600000e+01 : f32
    %44 = vector.broadcast %cst_7 : f32 to vector<8x16xf32>
    %45 = arith.divf %43, %44 : vector<8x16xf32>
    %cst_8 = arith.constant dense<0xFF800000> : vector<8x16xf32>
    %46 = vector.multi_reduction <maximumf>, %37, %cst_8 [2] : vector<8x16x16xf32> to vector<8x16xf32>
    %47 = arith.addf %45, %46 : vector<8x16xf32>
    %48 = tpu.concatenate %42, %47 in 1 : vector<8x16xf32>, vector<8x16xf32> -> vector<8x32xf32>
    %49 = vector.extract_strided_slice %0 {offsets = [0, 4], sizes = [8, 1], strides = [1, 1]} : vector<8x128xf32> to vector<8x1xf32>
    %50 = vector.extract_strided_slice %48 {offsets = [0, 0], sizes = [1, 32], strides = [1, 1]} : vector<8x32xf32> to vector<1x32xf32>
    %51 = vector.broadcast %49 : vector<8x1xf32> to vector<8x32xf32>
    %52 = vector.broadcast %50 : vector<1x32xf32> to vector<8x32xf32>
    %53 = arith.mulf %51, %52 : vector<8x32xf32>
    %54 = vector.broadcast %3 : vector<8x1xf32> to vector<8x32xf32>
    %55 = arith.addf %54, %53 : vector<8x32xf32>
    %56 = vector.extract_strided_slice %0 {offsets = [0, 5], sizes = [8, 1], strides = [1, 1]} : vector<8x128xf32> to vector<8x1xf32>
    %57 = vector.extract_strided_slice %48 {offsets = [1, 0], sizes = [1, 32], strides = [1, 1]} : vector<8x32xf32> to vector<1x32xf32>
    %58 = vector.broadcast %56 : vector<8x1xf32> to vector<8x32xf32>
    %59 = vector.broadcast %57 : vector<1x32xf32> to vector<8x32xf32>
    %60 = arith.mulf %58, %59 : vector<8x32xf32>
    %61 = arith.addf %55, %60 : vector<8x32xf32>
    %62 = vector.extract_strided_slice %0 {offsets = [0, 6], sizes = [8, 1], strides = [1, 1]} : vector<8x128xf32> to vector<8x1xf32>
    %63 = vector.extract_strided_slice %48 {offsets = [2, 0], sizes = [1, 32], strides = [1, 1]} : vector<8x32xf32> to vector<1x32xf32>
    %64 = vector.broadcast %62 : vector<8x1xf32> to vector<8x32xf32>
    %65 = vector.broadcast %63 : vector<1x32xf32> to vector<8x32xf32>
    %66 = arith.mulf %64, %65 : vector<8x32xf32>
    %67 = arith.addf %61, %66 : vector<8x32xf32>
    %68 = vector.extract_strided_slice %0 {offsets = [0, 7], sizes = [8, 1], strides = [1, 1]} : vector<8x128xf32> to vector<8x1xf32>
    %69 = vector.extract_strided_slice %48 {offsets = [3, 0], sizes = [1, 32], strides = [1, 1]} : vector<8x32xf32> to vector<1x32xf32>
    %70 = vector.broadcast %68 : vector<8x1xf32> to vector<8x32xf32>
    %71 = vector.broadcast %69 : vector<1x32xf32> to vector<8x32xf32>
    %72 = arith.mulf %70, %71 : vector<8x32xf32>
    %73 = arith.addf %67, %72 : vector<8x32xf32>
    %74 = vector.extract_strided_slice %0 {offsets = [0, 8], sizes = [8, 1], strides = [1, 1]} : vector<8x128xf32> to vector<8x1xf32>
    %75 = vector.extract_strided_slice %48 {offsets = [4, 0], sizes = [1, 32], strides = [1, 1]} : vector<8x32xf32> to vector<1x32xf32>
    %76 = vector.broadcast %74 : vector<8x1xf32> to vector<8x32xf32>
    %77 = vector.broadcast %75 : vector<1x32xf32> to vector<8x32xf32>
    %78 = arith.mulf %76, %77 : vector<8x32xf32>
    %79 = arith.addf %73, %78 : vector<8x32xf32>
    %80 = vector.extract_strided_slice %0 {offsets = [0, 9], sizes = [8, 1], strides = [1, 1]} : vector<8x128xf32> to vector<8x1xf32>
    %81 = vector.extract_strided_slice %48 {offsets = [5, 0], sizes = [1, 32], strides = [1, 1]} : vector<8x32xf32> to vector<1x32xf32>
    %82 = vector.broadcast %80 : vector<8x1xf32> to vector<8x32xf32>
    %83 = vector.broadcast %81 : vector<1x32xf32> to vector<8x32xf32>
    %84 = arith.mulf %82, %83 : vector<8x32xf32>
    %85 = arith.addf %79, %84 : vector<8x32xf32>
    %86 = vector.extract_strided_slice %0 {offsets = [0, 10], sizes = [8, 1], strides = [1, 1]} : vector<8x128xf32> to vector<8x1xf32>
    %87 = vector.extract_strided_slice %48 {offsets = [6, 0], sizes = [1, 32], strides = [1, 1]} : vector<8x32xf32> to vector<1x32xf32>
    %88 = vector.broadcast %86 : vector<8x1xf32> to vector<8x32xf32>
    %89 = vector.broadcast %87 : vector<1x32xf32> to vector<8x32xf32>
    %90 = arith.mulf %88, %89 : vector<8x32xf32>
    %91 = arith.addf %85, %90 : vector<8x32xf32>
    %92 = vector.extract_strided_slice %0 {offsets = [0, 11], sizes = [8, 1], strides = [1, 1]} : vector<8x128xf32> to vector<8x1xf32>
    %93 = vector.extract_strided_slice %48 {offsets = [7, 0], sizes = [1, 32], strides = [1, 1]} : vector<8x32xf32> to vector<1x32xf32>
    %94 = vector.broadcast %92 : vector<8x1xf32> to vector<8x32xf32>
    %95 = vector.broadcast %93 : vector<1x32xf32> to vector<8x32xf32>
    %96 = arith.mulf %94, %95 : vector<8x32xf32>
    %97 = arith.addf %91, %96 : vector<8x32xf32>
    %cst_9 = arith.constant 3.000000e+00 : f32
    %98 = vector.broadcast %cst_9 : f32 to vector<8x32xf32>
    %99 = arith.addf %97, %98 : vector<8x32xf32>
    %cst_10 = arith.constant 0.000000e+00 : f32
    %cst_11 = arith.constant 6.000000e+00 : f32
    %100 = vector.broadcast %cst_10 : f32 to vector<8x32xf32>
    %101 = arith.maximumf %100, %99 : vector<8x32xf32>
    %102 = vector.broadcast %cst_11 : f32 to vector<8x32xf32>
    %103 = arith.minimumf %102, %101 : vector<8x32xf32>
    %104 = arith.mulf %97, %103 : vector<8x32xf32>
    %cst_12 = arith.constant 0.166666672 : f32
    %105 = vector.broadcast %cst_12 : f32 to vector<8x32xf32>
    %106 = arith.mulf %104, %105 : vector<8x32xf32>
    %107 = vector.extract_strided_slice %106 {offsets = [0, 0], sizes = [8, 16], strides = [1, 1]} : vector<8x32xf32> to vector<8x16xf32>
    %108 = vector.extract_strided_slice %106 {offsets = [0, 16], sizes = [8, 16], strides = [1, 1]} : vector<8x32xf32> to vector<8x16xf32>
    %109 = vector.extract_strided_slice %0 {offsets = [0, 12], sizes = [8, 1], strides = [1, 1]} : vector<8x128xf32> to vector<8x1xf32>
    %110 = vector.extract_strided_slice %107 {offsets = [0, 0], sizes = [1, 16], strides = [1, 1]} : vector<8x16xf32> to vector<1x16xf32>
    %111 = vector.broadcast %109 : vector<8x1xf32> to vector<8x16xf32>
    %112 = vector.broadcast %110 : vector<1x16xf32> to vector<8x16xf32>
    %113 = arith.mulf %111, %112 : vector<8x16xf32>
    %114 = vector.broadcast %4 : vector<8x1xf32> to vector<8x16xf32>
    %115 = arith.addf %114, %113 : vector<8x16xf32>
    %116 = vector.extract_strided_slice %0 {offsets = [0, 20], sizes = [8, 1], strides = [1, 1]} : vector<8x128xf32> to vector<8x1xf32>
    %117 = vector.extract_strided_slice %108 {offsets = [0, 0], sizes = [1, 16], strides = [1, 1]} : vector<8x16xf32> to vector<1x16xf32>
    %118 = vector.broadcast %116 : vector<8x1xf32> to vector<8x16xf32>
    %119 = vector.broadcast %117 : vector<1x16xf32> to vector<8x16xf32>
    %120 = arith.mulf %118, %119 : vector<8x16xf32>
    %121 = vector.broadcast %5 : vector<8x1xf32> to vector<8x16xf32>
    %122 = arith.addf %121, %120 : vector<8x16xf32>
    %123 = vector.extract_strided_slice %0 {offsets = [0, 13], sizes = [8, 1], strides = [1, 1]} : vector<8x128xf32> to vector<8x1xf32>
    %124 = vector.extract_strided_slice %107 {offsets = [1, 0], sizes = [1, 16], strides = [1, 1]} : vector<8x16xf32> to vector<1x16xf32>
    %125 = vector.broadcast %123 : vector<8x1xf32> to vector<8x16xf32>
    %126 = vector.broadcast %124 : vector<1x16xf32> to vector<8x16xf32>
    %127 = arith.mulf %125, %126 : vector<8x16xf32>
    %128 = arith.addf %115, %127 : vector<8x16xf32>
    %129 = vector.extract_strided_slice %0 {offsets = [0, 21], sizes = [8, 1], strides = [1, 1]} : vector<8x128xf32> to vector<8x1xf32>
    %130 = vector.extract_strided_slice %108 {offsets = [1, 0], sizes = [1, 16], strides = [1, 1]} : vector<8x16xf32> to vector<1x16xf32>
    %131 = vector.broadcast %129 : vector<8x1xf32> to vector<8x16xf32>
    %132 = vector.broadcast %130 : vector<1x16xf32> to vector<8x16xf32>
    %133 = arith.mulf %131, %132 : vector<8x16xf32>
    %134 = arith.addf %122, %133 : vector<8x16xf32>
    %135 = vector.extract_strided_slice %0 {offsets = [0, 14], sizes = [8, 1], strides = [1, 1]} : vector<8x128xf32> to vector<8x1xf32>
    %136 = vector.extract_strided_slice %107 {offsets = [2, 0], sizes = [1, 16], strides = [1, 1]} : vector<8x16xf32> to vector<1x16xf32>
    %137 = vector.broadcast %135 : vector<8x1xf32> to vector<8x16xf32>
    %138 = vector.broadcast %136 : vector<1x16xf32> to vector<8x16xf32>
    %139 = arith.mulf %137, %138 : vector<8x16xf32>
    %140 = arith.addf %128, %139 : vector<8x16xf32>
    %141 = vector.extract_strided_slice %0 {offsets = [0, 22], sizes = [8, 1], strides = [1, 1]} : vector<8x128xf32> to vector<8x1xf32>
    %142 = vector.extract_strided_slice %108 {offsets = [2, 0], sizes = [1, 16], strides = [1, 1]} : vector<8x16xf32> to vector<1x16xf32>
    %143 = vector.broadcast %141 : vector<8x1xf32> to vector<8x16xf32>
    %144 = vector.broadcast %142 : vector<1x16xf32> to vector<8x16xf32>
    %145 = arith.mulf %143, %144 : vector<8x16xf32>
    %146 = arith.addf %134, %145 : vector<8x16xf32>
    %147 = vector.extract_strided_slice %0 {offsets = [0, 15], sizes = [8, 1], strides = [1, 1]} : vector<8x128xf32> to vector<8x1xf32>
    %148 = vector.extract_strided_slice %107 {offsets = [3, 0], sizes = [1, 16], strides = [1, 1]} : vector<8x16xf32> to vector<1x16xf32>
    %149 = vector.broadcast %147 : vector<8x1xf32> to vector<8x16xf32>
    %150 = vector.broadcast %148 : vector<1x16xf32> to vector<8x16xf32>
    %151 = arith.mulf %149, %150 : vector<8x16xf32>
    %152 = arith.addf %140, %151 : vector<8x16xf32>
    %153 = vector.extract_strided_slice %0 {offsets = [0, 23], sizes = [8, 1], strides = [1, 1]} : vector<8x128xf32> to vector<8x1xf32>
    %154 = vector.extract_strided_slice %108 {offsets = [3, 0], sizes = [1, 16], strides = [1, 1]} : vector<8x16xf32> to vector<1x16xf32>
    %155 = vector.broadcast %153 : vector<8x1xf32> to vector<8x16xf32>
    %156 = vector.broadcast %154 : vector<1x16xf32> to vector<8x16xf32>
    %157 = arith.mulf %155, %156 : vector<8x16xf32>
    %158 = arith.addf %146, %157 : vector<8x16xf32>
    %159 = vector.extract_strided_slice %0 {offsets = [0, 16], sizes = [8, 1], strides = [1, 1]} : vector<8x128xf32> to vector<8x1xf32>
    %160 = vector.extract_strided_slice %107 {offsets = [4, 0], sizes = [1, 16], strides = [1, 1]} : vector<8x16xf32> to vector<1x16xf32>
    %161 = vector.broadcast %159 : vector<8x1xf32> to vector<8x16xf32>
    %162 = vector.broadcast %160 : vector<1x16xf32> to vector<8x16xf32>
    %163 = arith.mulf %161, %162 : vector<8x16xf32>
    %164 = arith.addf %152, %163 : vector<8x16xf32>
    %165 = vector.extract_strided_slice %0 {offsets = [0, 24], sizes = [8, 1], strides = [1, 1]} : vector<8x128xf32> to vector<8x1xf32>
    %166 = vector.extract_strided_slice %108 {offsets = [4, 0], sizes = [1, 16], strides = [1, 1]} : vector<8x16xf32> to vector<1x16xf32>
    %167 = vector.broadcast %165 : vector<8x1xf32> to vector<8x16xf32>
    %168 = vector.broadcast %166 : vector<1x16xf32> to vector<8x16xf32>
    %169 = arith.mulf %167, %168 : vector<8x16xf32>
    %170 = arith.addf %158, %169 : vector<8x16xf32>
    %171 = vector.extract_strided_slice %0 {offsets = [0, 17], sizes = [8, 1], strides = [1, 1]} : vector<8x128xf32> to vector<8x1xf32>
    %172 = vector.extract_strided_slice %107 {offsets = [5, 0], sizes = [1, 16], strides = [1, 1]} : vector<8x16xf32> to vector<1x16xf32>
    %173 = vector.broadcast %171 : vector<8x1xf32> to vector<8x16xf32>
    %174 = vector.broadcast %172 : vector<1x16xf32> to vector<8x16xf32>
    %175 = arith.mulf %173, %174 : vector<8x16xf32>
    %176 = arith.addf %164, %175 : vector<8x16xf32>
    %177 = vector.extract_strided_slice %0 {offsets = [0, 25], sizes = [8, 1], strides = [1, 1]} : vector<8x128xf32> to vector<8x1xf32>
    %178 = vector.extract_strided_slice %108 {offsets = [5, 0], sizes = [1, 16], strides = [1, 1]} : vector<8x16xf32> to vector<1x16xf32>
    %179 = vector.broadcast %177 : vector<8x1xf32> to vector<8x16xf32>
    %180 = vector.broadcast %178 : vector<1x16xf32> to vector<8x16xf32>
    %181 = arith.mulf %179, %180 : vector<8x16xf32>
    %182 = arith.addf %170, %181 : vector<8x16xf32>
    %183 = vector.extract_strided_slice %0 {offsets = [0, 18], sizes = [8, 1], strides = [1, 1]} : vector<8x128xf32> to vector<8x1xf32>
    %184 = vector.extract_strided_slice %107 {offsets = [6, 0], sizes = [1, 16], strides = [1, 1]} : vector<8x16xf32> to vector<1x16xf32>
    %185 = vector.broadcast %183 : vector<8x1xf32> to vector<8x16xf32>
    %186 = vector.broadcast %184 : vector<1x16xf32> to vector<8x16xf32>
    %187 = arith.mulf %185, %186 : vector<8x16xf32>
    %188 = arith.addf %176, %187 : vector<8x16xf32>
    %189 = vector.extract_strided_slice %0 {offsets = [0, 26], sizes = [8, 1], strides = [1, 1]} : vector<8x128xf32> to vector<8x1xf32>
    %190 = vector.extract_strided_slice %108 {offsets = [6, 0], sizes = [1, 16], strides = [1, 1]} : vector<8x16xf32> to vector<1x16xf32>
    %191 = vector.broadcast %189 : vector<8x1xf32> to vector<8x16xf32>
    %192 = vector.broadcast %190 : vector<1x16xf32> to vector<8x16xf32>
    %193 = arith.mulf %191, %192 : vector<8x16xf32>
    %194 = arith.addf %182, %193 : vector<8x16xf32>
    %195 = vector.extract_strided_slice %0 {offsets = [0, 19], sizes = [8, 1], strides = [1, 1]} : vector<8x128xf32> to vector<8x1xf32>
    %196 = vector.extract_strided_slice %107 {offsets = [7, 0], sizes = [1, 16], strides = [1, 1]} : vector<8x16xf32> to vector<1x16xf32>
    %197 = vector.broadcast %195 : vector<8x1xf32> to vector<8x16xf32>
    %198 = vector.broadcast %196 : vector<1x16xf32> to vector<8x16xf32>
    %199 = arith.mulf %197, %198 : vector<8x16xf32>
    %200 = arith.addf %188, %199 : vector<8x16xf32>
    %201 = vector.extract_strided_slice %0 {offsets = [0, 27], sizes = [8, 1], strides = [1, 1]} : vector<8x128xf32> to vector<8x1xf32>
    %202 = vector.extract_strided_slice %108 {offsets = [7, 0], sizes = [1, 16], strides = [1, 1]} : vector<8x16xf32> to vector<1x16xf32>
    %203 = vector.broadcast %201 : vector<8x1xf32> to vector<8x16xf32>
    %204 = vector.broadcast %202 : vector<1x16xf32> to vector<8x16xf32>
    %205 = arith.mulf %203, %204 : vector<8x16xf32>
    %206 = arith.addf %194, %205 : vector<8x16xf32>
    %207 = vector.shape_cast %200 : vector<8x16xf32> to vector<8x16x1xf32>
    %208 = vector.shape_cast %206 : vector<8x16xf32> to vector<8x1x16xf32>
    %209 = vector.broadcast %207 : vector<8x16x1xf32> to vector<8x16x16xf32>
    %210 = vector.broadcast %208 : vector<8x1x16xf32> to vector<8x16x16xf32>
    %211 = arith.mulf %209, %210 : vector<8x16x16xf32>
    %212 = vector.shape_cast %211 : vector<8x16x16xf32> to vector<8x256xf32>
    %213 = arith.negf %212 : vector<8x256xf32>
    %214 = math.exp %213 : vector<8x256xf32>
    %cst_13 = arith.constant 1.000000e+00 : f32
    %215 = vector.broadcast %cst_13 : f32 to vector<8x256xf32>
    %216 = arith.addf %215, %214 : vector<8x256xf32>
    %217 = arith.divf %215, %216 : vector<8x256xf32>
    %218 = arith.mulf %36, %217 : vector<8x256xf32>
    %c0_14 = arith.constant 0 : index
    %c0_15 = arith.constant 0 : index
    %219 = vector.load %arg3[%c0_14, %c0_15] : memref<16x256xf32, #tpu.memory_space<vmem>>, vector<8x256xf32>
    tpu.vector_store %arg3[%c0_14, %c0_15], %218 {strides = array<i32>} : memref<16x256xf32, #tpu.memory_space<vmem>>, vector<8x256xf32>,
    %220 = vector.extract_strided_slice %0 {offsets = [0, 0], sizes = [8, 1], strides = [1, 1]} : vector<8x128xf32> to vector<8x1xf32>
    %221 = vector.extract_strided_slice %1 {offsets = [4, 0], sizes = [1, 256], strides = [1, 1]} : vector<8x256xf32> to vector<1x256xf32>
    %222 = vector.broadcast %220 : vector<8x1xf32> to vector<8x256xf32>
    %223 = vector.broadcast %221 : vector<1x256xf32> to vector<8x256xf32>
    %224 = arith.mulf %222, %223 : vector<8x256xf32>
    %225 = vector.broadcast %2 : vector<8x1xf32> to vector<8x256xf32>
    %226 = arith.addf %225, %224 : vector<8x256xf32>
    %227 = vector.extract_strided_slice %0 {offsets = [0, 1], sizes = [8, 1], strides = [1, 1]} : vector<8x128xf32> to vector<8x1xf32>
    %228 = vector.extract_strided_slice %1 {offsets = [5, 0], sizes = [1, 256], strides = [1, 1]} : vector<8x256xf32> to vector<1x256xf32>
    %229 = vector.broadcast %227 : vector<8x1xf32> to vector<8x256xf32>
    %230 = vector.broadcast %228 : vector<1x256xf32> to vector<8x256xf32>
    %231 = arith.mulf %229, %230 : vector<8x256xf32>
    %232 = arith.addf %226, %231 : vector<8x256xf32>
    %233 = vector.extract_strided_slice %0 {offsets = [0, 2], sizes = [8, 1], strides = [1, 1]} : vector<8x128xf32> to vector<8x1xf32>
    %234 = vector.extract_strided_slice %1 {offsets = [6, 0], sizes = [1, 256], strides = [1, 1]} : vector<8x256xf32> to vector<1x256xf32>
    %235 = vector.broadcast %233 : vector<8x1xf32> to vector<8x256xf32>
    %236 = vector.broadcast %234 : vector<1x256xf32> to vector<8x256xf32>
    %237 = arith.mulf %235, %236 : vector<8x256xf32>
    %238 = arith.addf %232, %237 : vector<8x256xf32>
    %239 = vector.extract_strided_slice %0 {offsets = [0, 3], sizes = [8, 1], strides = [1, 1]} : vector<8x128xf32> to vector<8x1xf32>
    %240 = vector.extract_strided_slice %1 {offsets = [7, 0], sizes = [1, 256], strides = [1, 1]} : vector<8x256xf32> to vector<1x256xf32>
    %241 = vector.broadcast %239 : vector<8x1xf32> to vector<8x256xf32>
    %242 = vector.broadcast %240 : vector<1x256xf32> to vector<8x256xf32>
    %243 = arith.mulf %241, %242 : vector<8x256xf32>
    %244 = arith.addf %238, %243 : vector<8x256xf32>
    %245 = arith.negf %244 : vector<8x256xf32>
    %246 = math.exp %245 : vector<8x256xf32>
    %cst_16 = arith.constant 1.000000e+00 : f32
    %247 = vector.broadcast %cst_16 : f32 to vector<8x256xf32>
    %248 = arith.addf %247, %246 : vector<8x256xf32>
    %249 = arith.divf %247, %248 : vector<8x256xf32>
    %250 = arith.mulf %244, %249 : vector<8x256xf32>
    %251 = vector.shape_cast %250 : vector<8x256xf32> to vector<8x16x16xf32>
    %cst_17 = arith.constant dense<0.000000e+00> : vector<8x16xf32>
    %252 = vector.multi_reduction <add>, %251, %cst_17 [1] : vector<8x16x16xf32> to vector<8x16xf32>
    %cst_18 = arith.constant 1.600000e+01 : f32
    %253 = vector.broadcast %cst_18 : f32 to vector<8x16xf32>
    %254 = arith.divf %252, %253 : vector<8x16xf32>
    %cst_19 = arith.constant dense<0xFF800000> : vector<8x16xf32>
    %255 = vector.multi_reduction <maximumf>, %251, %cst_19 [1] : vector<8x16x16xf32> to vector<8x16xf32>
    %256 = arith.addf %254, %255 : vector<8x16xf32>
    %cst_20 = arith.constant dense<0.000000e+00> : vector<8x16xf32>
    %257 = vector.multi_reduction <add>, %251, %cst_20 [2] : vector<8x16x16xf32> to vector<8x16xf32>
    %cst_21 = arith.constant 1.600000e+01 : f32
    %258 = vector.broadcast %cst_21 : f32 to vector<8x16xf32>
    %259 = arith.divf %257, %258 : vector<8x16xf32>
    %cst_22 = arith.constant dense<0xFF800000> : vector<8x16xf32>
    %260 = vector.multi_reduction <maximumf>, %251, %cst_22 [2] : vector<8x16x16xf32> to vector<8x16xf32>
    %261 = arith.addf %259, %260 : vector<8x16xf32>
    %262 = tpu.concatenate %256, %261 in 1 : vector<8x16xf32>, vector<8x16xf32> -> vector<8x32xf32>
    %263 = vector.extract_strided_slice %0 {offsets = [0, 4], sizes = [8, 1], strides = [1, 1]} : vector<8x128xf32> to vector<8x1xf32>
    %264 = vector.extract_strided_slice %262 {offsets = [0, 0], sizes = [1, 32], strides = [1, 1]} : vector<8x32xf32> to vector<1x32xf32>
    %265 = vector.broadcast %263 : vector<8x1xf32> to vector<8x32xf32>
    %266 = vector.broadcast %264 : vector<1x32xf32> to vector<8x32xf32>
    %267 = arith.mulf %265, %266 : vector<8x32xf32>
    %268 = vector.broadcast %3 : vector<8x1xf32> to vector<8x32xf32>
    %269 = arith.addf %268, %267 : vector<8x32xf32>
    %270 = vector.extract_strided_slice %0 {offsets = [0, 5], sizes = [8, 1], strides = [1, 1]} : vector<8x128xf32> to vector<8x1xf32>
    %271 = vector.extract_strided_slice %262 {offsets = [1, 0], sizes = [1, 32], strides = [1, 1]} : vector<8x32xf32> to vector<1x32xf32>
    %272 = vector.broadcast %270 : vector<8x1xf32> to vector<8x32xf32>
    %273 = vector.broadcast %271 : vector<1x32xf32> to vector<8x32xf32>
    %274 = arith.mulf %272, %273 : vector<8x32xf32>
    %275 = arith.addf %269, %274 : vector<8x32xf32>
    %276 = vector.extract_strided_slice %0 {offsets = [0, 6], sizes = [8, 1], strides = [1, 1]} : vector<8x128xf32> to vector<8x1xf32>
    %277 = vector.extract_strided_slice %262 {offsets = [2, 0], sizes = [1, 32], strides = [1, 1]} : vector<8x32xf32> to vector<1x32xf32>
    %278 = vector.broadcast %276 : vector<8x1xf32> to vector<8x32xf32>
    %279 = vector.broadcast %277 : vector<1x32xf32> to vector<8x32xf32>
    %280 = arith.mulf %278, %279 : vector<8x32xf32>
    %281 = arith.addf %275, %280 : vector<8x32xf32>
    %282 = vector.extract_strided_slice %0 {offsets = [0, 7], sizes = [8, 1], strides = [1, 1]} : vector<8x128xf32> to vector<8x1xf32>
    %283 = vector.extract_strided_slice %262 {offsets = [3, 0], sizes = [1, 32], strides = [1, 1]} : vector<8x32xf32> to vector<1x32xf32>
    %284 = vector.broadcast %282 : vector<8x1xf32> to vector<8x32xf32>
    %285 = vector.broadcast %283 : vector<1x32xf32> to vector<8x32xf32>
    %286 = arith.mulf %284, %285 : vector<8x32xf32>
    %287 = arith.addf %281, %286 : vector<8x32xf32>
    %288 = vector.extract_strided_slice %0 {offsets = [0, 8], sizes = [8, 1], strides = [1, 1]} : vector<8x128xf32> to vector<8x1xf32>
    %289 = vector.extract_strided_slice %262 {offsets = [4, 0], sizes = [1, 32], strides = [1, 1]} : vector<8x32xf32> to vector<1x32xf32>
    %290 = vector.broadcast %288 : vector<8x1xf32> to vector<8x32xf32>
    %291 = vector.broadcast %289 : vector<1x32xf32> to vector<8x32xf32>
    %292 = arith.mulf %290, %291 : vector<8x32xf32>
    %293 = arith.addf %287, %292 : vector<8x32xf32>
    %294 = vector.extract_strided_slice %0 {offsets = [0, 9], sizes = [8, 1], strides = [1, 1]} : vector<8x128xf32> to vector<8x1xf32>
    %295 = vector.extract_strided_slice %262 {offsets = [5, 0], sizes = [1, 32], strides = [1, 1]} : vector<8x32xf32> to vector<1x32xf32>
    %296 = vector.broadcast %294 : vector<8x1xf32> to vector<8x32xf32>
    %297 = vector.broadcast %295 : vector<1x32xf32> to vector<8x32xf32>
    %298 = arith.mulf %296, %297 : vector<8x32xf32>
    %299 = arith.addf %293, %298 : vector<8x32xf32>
    %300 = vector.extract_strided_slice %0 {offsets = [0, 10], sizes = [8, 1], strides = [1, 1]} : vector<8x128xf32> to vector<8x1xf32>
    %301 = vector.extract_strided_slice %262 {offsets = [6, 0], sizes = [1, 32], strides = [1, 1]} : vector<8x32xf32> to vector<1x32xf32>
    %302 = vector.broadcast %300 : vector<8x1xf32> to vector<8x32xf32>
    %303 = vector.broadcast %301 : vector<1x32xf32> to vector<8x32xf32>
    %304 = arith.mulf %302, %303 : vector<8x32xf32>
    %305 = arith.addf %299, %304 : vector<8x32xf32>
    %306 = vector.extract_strided_slice %0 {offsets = [0, 11], sizes = [8, 1], strides = [1, 1]} : vector<8x128xf32> to vector<8x1xf32>
    %307 = vector.extract_strided_slice %262 {offsets = [7, 0], sizes = [1, 32], strides = [1, 1]} : vector<8x32xf32> to vector<1x32xf32>
    %308 = vector.broadcast %306 : vector<8x1xf32> to vector<8x32xf32>
    %309 = vector.broadcast %307 : vector<1x32xf32> to vector<8x32xf32>
    %310 = arith.mulf %308, %309 : vector<8x32xf32>
    %311 = arith.addf %305, %310 : vector<8x32xf32>
    %cst_23 = arith.constant 3.000000e+00 : f32
    %312 = vector.broadcast %cst_23 : f32 to vector<8x32xf32>
    %313 = arith.addf %311, %312 : vector<8x32xf32>
    %cst_24 = arith.constant 0.000000e+00 : f32
    %cst_25 = arith.constant 6.000000e+00 : f32
    %314 = vector.broadcast %cst_24 : f32 to vector<8x32xf32>
    %315 = arith.maximumf %314, %313 : vector<8x32xf32>
    %316 = vector.broadcast %cst_25 : f32 to vector<8x32xf32>
    %317 = arith.minimumf %316, %315 : vector<8x32xf32>
    %318 = arith.mulf %311, %317 : vector<8x32xf32>
    %cst_26 = arith.constant 0.166666672 : f32
    %319 = vector.broadcast %cst_26 : f32 to vector<8x32xf32>
    %320 = arith.mulf %318, %319 : vector<8x32xf32>
    %321 = vector.extract_strided_slice %320 {offsets = [0, 0], sizes = [8, 16], strides = [1, 1]} : vector<8x32xf32> to vector<8x16xf32>
    %322 = vector.extract_strided_slice %320 {offsets = [0, 16], sizes = [8, 16], strides = [1, 1]} : vector<8x32xf32> to vector<8x16xf32>
    %323 = vector.extract_strided_slice %0 {offsets = [0, 12], sizes = [8, 1], strides = [1, 1]} : vector<8x128xf32> to vector<8x1xf32>
    %324 = vector.extract_strided_slice %321 {offsets = [0, 0], sizes = [1, 16], strides = [1, 1]} : vector<8x16xf32> to vector<1x16xf32>
    %325 = vector.broadcast %323 : vector<8x1xf32> to vector<8x16xf32>
    %326 = vector.broadcast %324 : vector<1x16xf32> to vector<8x16xf32>
    %327 = arith.mulf %325, %326 : vector<8x16xf32>
    %328 = vector.broadcast %4 : vector<8x1xf32> to vector<8x16xf32>
    %329 = arith.addf %328, %327 : vector<8x16xf32>
    %330 = vector.extract_strided_slice %0 {offsets = [0, 20], sizes = [8, 1], strides = [1, 1]} : vector<8x128xf32> to vector<8x1xf32>
    %331 = vector.extract_strided_slice %322 {offsets = [0, 0], sizes = [1, 16], strides = [1, 1]} : vector<8x16xf32> to vector<1x16xf32>
    %332 = vector.broadcast %330 : vector<8x1xf32> to vector<8x16xf32>
    %333 = vector.broadcast %331 : vector<1x16xf32> to vector<8x16xf32>
    %334 = arith.mulf %332, %333 : vector<8x16xf32>
    %335 = vector.broadcast %5 : vector<8x1xf32> to vector<8x16xf32>
    %336 = arith.addf %335, %334 : vector<8x16xf32>
    %337 = vector.extract_strided_slice %0 {offsets = [0, 13], sizes = [8, 1], strides = [1, 1]} : vector<8x128xf32> to vector<8x1xf32>
    %338 = vector.extract_strided_slice %321 {offsets = [1, 0], sizes = [1, 16], strides = [1, 1]} : vector<8x16xf32> to vector<1x16xf32>
    %339 = vector.broadcast %337 : vector<8x1xf32> to vector<8x16xf32>
    %340 = vector.broadcast %338 : vector<1x16xf32> to vector<8x16xf32>
    %341 = arith.mulf %339, %340 : vector<8x16xf32>
    %342 = arith.addf %329, %341 : vector<8x16xf32>
    %343 = vector.extract_strided_slice %0 {offsets = [0, 21], sizes = [8, 1], strides = [1, 1]} : vector<8x128xf32> to vector<8x1xf32>
    %344 = vector.extract_strided_slice %322 {offsets = [1, 0], sizes = [1, 16], strides = [1, 1]} : vector<8x16xf32> to vector<1x16xf32>
    %345 = vector.broadcast %343 : vector<8x1xf32> to vector<8x16xf32>
    %346 = vector.broadcast %344 : vector<1x16xf32> to vector<8x16xf32>
    %347 = arith.mulf %345, %346 : vector<8x16xf32>
    %348 = arith.addf %336, %347 : vector<8x16xf32>
    %349 = vector.extract_strided_slice %0 {offsets = [0, 14], sizes = [8, 1], strides = [1, 1]} : vector<8x128xf32> to vector<8x1xf32>
    %350 = vector.extract_strided_slice %321 {offsets = [2, 0], sizes = [1, 16], strides = [1, 1]} : vector<8x16xf32> to vector<1x16xf32>
    %351 = vector.broadcast %349 : vector<8x1xf32> to vector<8x16xf32>
    %352 = vector.broadcast %350 : vector<1x16xf32> to vector<8x16xf32>
    %353 = arith.mulf %351, %352 : vector<8x16xf32>
    %354 = arith.addf %342, %353 : vector<8x16xf32>
    %355 = vector.extract_strided_slice %0 {offsets = [0, 22], sizes = [8, 1], strides = [1, 1]} : vector<8x128xf32> to vector<8x1xf32>
    %356 = vector.extract_strided_slice %322 {offsets = [2, 0], sizes = [1, 16], strides = [1, 1]} : vector<8x16xf32> to vector<1x16xf32>
    %357 = vector.broadcast %355 : vector<8x1xf32> to vector<8x16xf32>
    %358 = vector.broadcast %356 : vector<1x16xf32> to vector<8x16xf32>
    %359 = arith.mulf %357, %358 : vector<8x16xf32>
    %360 = arith.addf %348, %359 : vector<8x16xf32>
    %361 = vector.extract_strided_slice %0 {offsets = [0, 15], sizes = [8, 1], strides = [1, 1]} : vector<8x128xf32> to vector<8x1xf32>
    %362 = vector.extract_strided_slice %321 {offsets = [3, 0], sizes = [1, 16], strides = [1, 1]} : vector<8x16xf32> to vector<1x16xf32>
    %363 = vector.broadcast %361 : vector<8x1xf32> to vector<8x16xf32>
    %364 = vector.broadcast %362 : vector<1x16xf32> to vector<8x16xf32>
    %365 = arith.mulf %363, %364 : vector<8x16xf32>
    %366 = arith.addf %354, %365 : vector<8x16xf32>
    %367 = vector.extract_strided_slice %0 {offsets = [0, 23], sizes = [8, 1], strides = [1, 1]} : vector<8x128xf32> to vector<8x1xf32>
    %368 = vector.extract_strided_slice %322 {offsets = [3, 0], sizes = [1, 16], strides = [1, 1]} : vector<8x16xf32> to vector<1x16xf32>
    %369 = vector.broadcast %367 : vector<8x1xf32> to vector<8x16xf32>
    %370 = vector.broadcast %368 : vector<1x16xf32> to vector<8x16xf32>
    %371 = arith.mulf %369, %370 : vector<8x16xf32>
    %372 = arith.addf %360, %371 : vector<8x16xf32>
    %373 = vector.extract_strided_slice %0 {offsets = [0, 16], sizes = [8, 1], strides = [1, 1]} : vector<8x128xf32> to vector<8x1xf32>
    %374 = vector.extract_strided_slice %321 {offsets = [4, 0], sizes = [1, 16], strides = [1, 1]} : vector<8x16xf32> to vector<1x16xf32>
    %375 = vector.broadcast %373 : vector<8x1xf32> to vector<8x16xf32>
    %376 = vector.broadcast %374 : vector<1x16xf32> to vector<8x16xf32>
    %377 = arith.mulf %375, %376 : vector<8x16xf32>
    %378 = arith.addf %366, %377 : vector<8x16xf32>
    %379 = vector.extract_strided_slice %0 {offsets = [0, 24], sizes = [8, 1], strides = [1, 1]} : vector<8x128xf32> to vector<8x1xf32>
    %380 = vector.extract_strided_slice %322 {offsets = [4, 0], sizes = [1, 16], strides = [1, 1]} : vector<8x16xf32> to vector<1x16xf32>
    %381 = vector.broadcast %379 : vector<8x1xf32> to vector<8x16xf32>
    %382 = vector.broadcast %380 : vector<1x16xf32> to vector<8x16xf32>
    %383 = arith.mulf %381, %382 : vector<8x16xf32>
    %384 = arith.addf %372, %383 : vector<8x16xf32>
    %385 = vector.extract_strided_slice %0 {offsets = [0, 17], sizes = [8, 1], strides = [1, 1]} : vector<8x128xf32> to vector<8x1xf32>
    %386 = vector.extract_strided_slice %321 {offsets = [5, 0], sizes = [1, 16], strides = [1, 1]} : vector<8x16xf32> to vector<1x16xf32>
    %387 = vector.broadcast %385 : vector<8x1xf32> to vector<8x16xf32>
    %388 = vector.broadcast %386 : vector<1x16xf32> to vector<8x16xf32>
    %389 = arith.mulf %387, %388 : vector<8x16xf32>
    %390 = arith.addf %378, %389 : vector<8x16xf32>
    %391 = vector.extract_strided_slice %0 {offsets = [0, 25], sizes = [8, 1], strides = [1, 1]} : vector<8x128xf32> to vector<8x1xf32>
    %392 = vector.extract_strided_slice %322 {offsets = [5, 0], sizes = [1, 16], strides = [1, 1]} : vector<8x16xf32> to vector<1x16xf32>
    %393 = vector.broadcast %391 : vector<8x1xf32> to vector<8x16xf32>
    %394 = vector.broadcast %392 : vector<1x16xf32> to vector<8x16xf32>
    %395 = arith.mulf %393, %394 : vector<8x16xf32>
    %396 = arith.addf %384, %395 : vector<8x16xf32>
    %397 = vector.extract_strided_slice %0 {offsets = [0, 18], sizes = [8, 1], strides = [1, 1]} : vector<8x128xf32> to vector<8x1xf32>
    %398 = vector.extract_strided_slice %321 {offsets = [6, 0], sizes = [1, 16], strides = [1, 1]} : vector<8x16xf32> to vector<1x16xf32>
    %399 = vector.broadcast %397 : vector<8x1xf32> to vector<8x16xf32>
    %400 = vector.broadcast %398 : vector<1x16xf32> to vector<8x16xf32>
    %401 = arith.mulf %399, %400 : vector<8x16xf32>
    %402 = arith.addf %390, %401 : vector<8x16xf32>
    %403 = vector.extract_strided_slice %0 {offsets = [0, 26], sizes = [8, 1], strides = [1, 1]} : vector<8x128xf32> to vector<8x1xf32>
    %404 = vector.extract_strided_slice %322 {offsets = [6, 0], sizes = [1, 16], strides = [1, 1]} : vector<8x16xf32> to vector<1x16xf32>
    %405 = vector.broadcast %403 : vector<8x1xf32> to vector<8x16xf32>
    %406 = vector.broadcast %404 : vector<1x16xf32> to vector<8x16xf32>
    %407 = arith.mulf %405, %406 : vector<8x16xf32>
    %408 = arith.addf %396, %407 : vector<8x16xf32>
    %409 = vector.extract_strided_slice %0 {offsets = [0, 19], sizes = [8, 1], strides = [1, 1]} : vector<8x128xf32> to vector<8x1xf32>
    %410 = vector.extract_strided_slice %321 {offsets = [7, 0], sizes = [1, 16], strides = [1, 1]} : vector<8x16xf32> to vector<1x16xf32>
    %411 = vector.broadcast %409 : vector<8x1xf32> to vector<8x16xf32>
    %412 = vector.broadcast %410 : vector<1x16xf32> to vector<8x16xf32>
    %413 = arith.mulf %411, %412 : vector<8x16xf32>
    %414 = arith.addf %402, %413 : vector<8x16xf32>
    %415 = vector.extract_strided_slice %0 {offsets = [0, 27], sizes = [8, 1], strides = [1, 1]} : vector<8x128xf32> to vector<8x1xf32>
    %416 = vector.extract_strided_slice %322 {offsets = [7, 0], sizes = [1, 16], strides = [1, 1]} : vector<8x16xf32> to vector<1x16xf32>
    %417 = vector.broadcast %415 : vector<8x1xf32> to vector<8x16xf32>
    %418 = vector.broadcast %416 : vector<1x16xf32> to vector<8x16xf32>
    %419 = arith.mulf %417, %418 : vector<8x16xf32>
    %420 = arith.addf %408, %419 : vector<8x16xf32>
    %421 = vector.shape_cast %414 : vector<8x16xf32> to vector<8x16x1xf32>
    %422 = vector.shape_cast %420 : vector<8x16xf32> to vector<8x1x16xf32>
    %423 = vector.broadcast %421 : vector<8x16x1xf32> to vector<8x16x16xf32>
    %424 = vector.broadcast %422 : vector<8x1x16xf32> to vector<8x16x16xf32>
    %425 = arith.mulf %423, %424 : vector<8x16x16xf32>
    %426 = vector.shape_cast %425 : vector<8x16x16xf32> to vector<8x256xf32>
    %427 = arith.negf %426 : vector<8x256xf32>
    %428 = math.exp %427 : vector<8x256xf32>
    %cst_27 = arith.constant 1.000000e+00 : f32
    %429 = vector.broadcast %cst_27 : f32 to vector<8x256xf32>
    %430 = arith.addf %429, %428 : vector<8x256xf32>
    %431 = arith.divf %429, %430 : vector<8x256xf32>
    %432 = arith.mulf %250, %431 : vector<8x256xf32>
    %c8 = arith.constant 8 : index
    %c0_28 = arith.constant 0 : index
    %433 = vector.load %arg3[%c8, %c0_28] : memref<16x256xf32, #tpu.memory_space<vmem>>, vector<8x256xf32>
    tpu.vector_store %arg3[%c8, %c0_28], %432 {strides = array<i32>} : memref<16x256xf32, #tpu.memory_space<vmem>>, vector<8x256xf32>,
    return
  }
  func.func @transform_0(%arg0: i32) -> (i32, i32) {
    %c0_i32 = arith.constant 0 : i32
    %c0_i32_0 = arith.constant 0 : i32
    %c0_i32_1 = arith.constant 0 : i32
    return %c0_i32, %c0_i32_0 : i32, i32
  }
  func.func @transform_1(%arg0: i32) -> (i32, i32) {
    %c0_i32 = arith.constant 0 : i32
    %c0_i32_0 = arith.constant 0 : i32
    %c0_i32_1 = arith.constant 0 : i32
    return %c0_i32, %c0_i32_0 : i32, i32
  }
  func.func @transform_2(%arg0: i32) -> (i32, i32) {
    %c0_i32 = arith.constant 0 : i32
    %c0_i32_0 = arith.constant 0 : i32
    %c0_i32_1 = arith.constant 0 : i32
    return %c0_i32, %c0_i32_0 : i32, i32
  }
}

</mosaic_0001>

<bundles_post_ra>
// kernel: tpu_custom_call.1
= control target key start
LH: loop header
LB: loop body
LE: loop exit
PB: predicated region body
PF: predicated region fallthrough
CT: control target
= control target key end

     0   :  { %7 = vsyncpa [#allocation3], 0  ;;  %s4736_s0 = inlined_call_operand.hbm [shape: f32[8,256], index: 0, kind: input, shape index: {}]   ;;  %s4737_s1 = inlined_call_operand.hbm [shape: f32[8,128], index: 1, kind: input, shape index: {}]   ;;  %s4738_s2 = inlined_call_operand.hbm [shape: f32[16,256], index: 2, kind: output, shape index: {}]  }
   0x1   :  { %8 = vsyncpa [#allocation6], 0 }
   0x2   :  { %9 = vsyncpa [#allocation4], 0  ;;  %s3357_s9 = smov [#allocation2]   ;;  %s3358_s11 = smov [#allocation5]  }
   0x3   :  { %s16_s10 = sshll.u32 %s3357_s9, 4  ;;  %s26_s12 = sshll.u32 %s3358_s11, 4  ;;  %s17_s10 = int_to_ptr.vmem [resolvable:$true] %s16_s10  ;;  %s27_s12 = int_to_ptr.vmem [resolvable:$true] %s26_s12 }
   0x4   :  { %s3285_s15 = scalar_lea.hbm %s4736_s0, 256 }
   0x5   :  { %p3286_p0 = scmp.ne.s32.totalorder %s4736_s0, %s3285_s15  ;;  %p3289_p1 = scmp.lt.u32.totalorder %s3285_s15, %s4736_s0 }
   0x7   :  { %p3291_p2 = pnand %p3289_p1, %p3286_p0 }
   0x9   :  { %3294 = shalt.err (!%p3291_p2)
}
   0xa   :  { %s3295_s20 = scalar_lea.vmem %s17_s10, 256  ;;  %p3300_p4 = scmp.lt.s32.totalorder %s17_s10, %s17_s10 }
   0xb   :  { %p3296_p3 = scmp.ne.s32.totalorder %s17_s10, %s3295_s20  ;;  %p3301_p5 = scmp.lt.s32.totalorder %s3295_s20, %s3295_s20 }
   0xd   :  { %p3302_p6 = por %p3301_p5, %p3300_p4 }
   0xf   :  { %p3303_p7 = pnand %p3302_p6, %p3296_p3 }
  0x11   :  { %3306 = shalt.err (!%p3303_p7)
}
  0x12   :  { %19 = dma.hbm_to_vmem [thread:$0]  %s4736_s0, 256, %s17_s10, [#allocation3]  }
  0x13   :  { %s3307_s25 = scalar_lea.hbm %s4737_s1, 128 }
  0x14   :  { %p3308_p8 = scmp.ne.s32.totalorder %s4737_s1, %s3307_s25  ;;  %p3311_p9 = scmp.lt.u32.totalorder %s3307_s25, %s4737_s1 }
  0x16   :  { %p3313_p10 = pnand %p3311_p9, %p3308_p8 }
  0x18   :  { %3316 = shalt.err (!%p3313_p10)
}
  0x19   :  { %s3317_s30 = scalar_lea.vmem %s27_s12, 128  ;;  %p3322_p12 = scmp.lt.s32.totalorder %s27_s12, %s27_s12 }
  0x1a   :  { %p3318_p11 = scmp.ne.s32.totalorder %s27_s12, %s3317_s30  ;;  %p3323_p13 = scmp.lt.s32.totalorder %s3317_s30, %s3317_s30 }
  0x1c   :  { %p3324_p0 = por %p3323_p13, %p3322_p12 }
  0x1e   :  { %p3325_p1 = pnand %p3324_p0, %p3318_p11 }
  0x20   :  { %3328 = shalt.err (!%p3325_p1)
}
  0x21   :  { %29 = dma.hbm_to_vmem [thread:$0]  %s4737_s1, 128, %s27_s12, [#allocation6]  }
  0x22   :  { %3351 = dma.done.wait [#allocation3], 256  }
  0x23   :  { %3352 = vsyncadd [#allocation3], 4294967040 }
  0x24   :  { %3353 = dma.done.wait [#allocation6], 128  }
  0x25   :  { %3354 = vsyncadd [#allocation6], 4294967168  ;;  %v3359_v0 = vmov 1   ;;  %v3360_v1 = vmov 0   ;;  %v36_v2 = vld [vmem:[#allocation5] sm:$0xff]  ;;  %v3361_v3 = vmov 2   ;;  %v4739_v7 = vlaneseq }
  0x26   :  { %3222 = vset.pattern.permute.xlu1 %v3359_v0  ;;  %3220 = vset.pattern.permute.xlu0 %v3360_v1  ;;  %v3362_v4 = vmov 28   ;;  %v3363_v5 = vmov 3   ;;  %v3364_v6 = vmov 4   ;;  %v37_v10 = vld [vmem:[#allocation2] sm:$0xff]  ;;  %v3448_v11 = vld [vmem:[#allocation2 + $0x8] sm:$0xff]  ;;  %s3365_s1 = smov 96  }
  0x27   :  { %61 = vperm.xlu1 %3222, %v36_v2   ;;  %41 = vperm.xlu0 %3220, %v36_v2   ;;  %v3443_v8 = vshrl.u32 %v4739_v7, 7  ;;  %s3366_s4 = smov 112   ;;  %s3367_s5 = smov 64   ;;  %vm438_vm0 = vcmask 130048   ;;  %vm704_vm1 = vcmask 1041409   ;;  %vm706_vm2 = vcmask 1042434  }
  0x28   :  { %s3368_s6 = smov 80   ;;  %s3369_s7 = smov 32   ;;  %vm708_vm3 = vcmask 1043459   ;;  %vm710_vm4 = vcmask 1044484   ;;  %vm712_vm5 = vcmask 1045509   ;;  %vm714_vm6 = vcmask 1046534  }
  0x29   :  { %v3446_v9 = vsub.s32 0, %v3443_v8  ;;  %v3451_v12 = vsub.s32 1, %v3443_v8  ;;  %v3457_v17 = vsub.s32 2, %v3443_v8  ;;  %v3460_v18 = vsub.s32 3, %v3443_v8  ;;  %s3370_s8 = smov 48   ;;  %s3371_s9 = smov 16  }
  0x2a   :  { %v3472_v33 = vsub.s32 4, %v3443_v8  ;;  %v3475_v43 = vsub.s32 5, %v3443_v8  ;;  %v3480_v50 = vsub.s32 6, %v3443_v8  ;;  %v3483_v52 = vsub.s32 7, %v3443_v8  ;;  %s3401_s10 = smov [#allocation7]  }
  0x2b   :  { %3223 = vset.pattern.permute.xlu1 %v3361_v3  ;;  %3221 = vset.pattern.permute.xlu0 %v3362_v4  ;;  %4759 = vst [vmem:[#allocation11_spill] sm:$0xff] %v3451_v12  ;;  %v47_v15 = vrot.slane %v37_v10, %v3446_v9  ;;  %v51_v16 = vrot.slane %v3448_v11, %v3446_v9  ;;  %4760 = vst [vmem:[#allocation12_spill] sm:$0xff] %v3457_v17  ;;  %vm716_vm7 = vcmask 1047559   ;;  %vm747_vm8 = vcmask 261312   ;;  %s3153_s11 = sshll.u32 %s3401_s10, 4  ;;  %s3154_s11 = int_to_ptr.vmem [resolvable:$true] %s3153_s11 }
  0x2c   :  { %77 = vperm.xlu1 %3223, %v36_v2   ;;  %55 = vperm.xlu0 %3221, %v36_v2   ;;  %4761 = vst [vmem:[#allocation13_spill] sm:$0xff] %v3460_v18  ;;  %v67_v19 = vrot.slane %v37_v10, %v3451_v12  ;;  %v71_v20 = vrot.slane %v3448_v11, %v3451_v12  ;;  %4762 = vst [vmem:[#allocation14_spill] sm:$0xff] %v3472_v33  ;;  %vm1633_vm9 = vcmask 261120   ;;  %vm1635_vm10 = vcmask 392192   ;;  %s3329_s12 = scalar_lea.vmem %s3154_s11, 512  ;;  %p3334_p3 = scmp.lt.s32.totalorder %s3154_s11, %s3154_s11 }
  0x2d   :  { %v83_v23 = vrot.slane %v37_v10, %v3457_v17  ;;  %v87_v24 = vrot.slane %v3448_v11, %v3457_v17  ;;  %v99_v27 = vrot.slane %v37_v10, %v3460_v18  ;;  %v103_v28 = vrot.slane %v3448_v11, %v3460_v18  ;;  %4763 = vst [vmem:[#allocation15_spill] sm:$0xff] %v3475_v43  ;;  %p3330_p2 = scmp.ne.s32.totalorder %s3154_s11, %s3329_s12  ;;  %p3335_p4 = scmp.lt.s32.totalorder %s3329_s12, %s3329_s12 }
  0x2e   :  { %v1671_v44 = vrot.slane %v37_v10, %v3472_v33  ;;  %v1683_v48 = vrot.slane %v37_v10, %v3475_v43  ;;  %4764 = vst [vmem:[#allocation16_spill] sm:$0xff] %v3480_v50  ;;  %4765 = vst [vmem:[#allocation17_spill] sm:$0xff] %v3483_v52  ;;  %v1695_v55 = vrot.slane %v37_v10, %v3480_v50  ;;  %vm1637_vm11 = vcmask 523264  }
  0x2f   :  { %v1707_v57 = vrot.slane %v37_v10, %v3483_v52  ;;  %v1675_v58 = vrot.slane %v3448_v11, %v3472_v33  ;;  %v1687_v0 = vrot.slane %v3448_v11, %v3475_v43  ;;  %vm1639_vm12 = vcmask 654336   ;;  %p3336_p5 = por %p3335_p4, %p3334_p3 }
  0x30   :  { %3224 = vset.pattern.permute.xlu1 %v3363_v5  ;;  %3225 = vset.pattern.permute.xlu0 %v3364_v6  ;;  %v1699_v6 = vrot.slane %v3448_v11, %v3480_v50  ;;  %vm1641_vm13 = vcmask 785408   ;;  %vm1643_vm14 = vcmask 916480  }
  0x31   :  { %93 = vperm.xlu1 %3224, %v36_v2   ;;  %822 = vperm.xlu0 %3225, %v36_v2   ;;  %p3337_p6 = pnand %p3336_p5, %p3330_p2 }
  0xa6   :  { %v62_v13 = vpop.permute.xlu1 %61  ;;  %v42_v14 = vpop.permute.xlu0 %41 }
  0xa7   :  { %v52_v21 = vmul.f32 %v47_v15, %v42_v14  ;;  %v53_v22 = vmul.f32 %v51_v16, %v42_v14  ;;  %v72_v29 = vmul.f32 %v67_v19, %v62_v13  ;;  %v73_v30 = vmul.f32 %v71_v20, %v62_v13 }
  0xa8   :  { %v1676_v49 = vmul.f32 %v1671_v44, %v42_v14  ;;  %v1688_v54 = vmul.f32 %v1683_v48, %v62_v13  ;;  %v1677_v1 = vmul.f32 %v1675_v58, %v42_v14  ;;  %v1689_v5 = vmul.f32 %v1687_v0, %v62_v13 }
  0xa9   :  { %v1711_v15 = vrot.slane %v3448_v11, %v3483_v52 }
  0xab   :  { %v78_v25 = vpop.permute.xlu1 %77  ;;  %v56_v26 = vpop.permute.xlu0 %55 }
  0xac   :  { %v58_v31 = vadd.f32 %v56_v26, %v52_v21  ;;  %v59_v32 = vadd.f32 %v56_v26, %v53_v22  ;;  %v88_v34 = vmul.f32 %v83_v23, %v78_v25  ;;  %v89_v35 = vmul.f32 %v87_v24, %v78_v25 }
  0xad   :  { %v1678_v51 = vadd.f32 %v1676_v49, %v56_v26  ;;  %v1700_v59 = vmul.f32 %v1695_v55, %v78_v25  ;;  %v1679_v2 = vadd.f32 %v1677_v1, %v56_v26  ;;  %v1701_v20 = vmul.f32 %v1699_v6, %v78_v25 }
  0xae   :  { %v74_v36 = vadd.f32 %v72_v29, %v58_v31  ;;  %v75_v37 = vadd.f32 %v73_v30, %v59_v32 }
  0xaf   :  { %v1690_v56 = vadd.f32 %v1688_v54, %v1678_v51  ;;  %v1691_v10 = vadd.f32 %v1689_v5, %v1679_v2 }
  0xb0   :  { %v94_v38 = vpop.permute.xlu1 %93  ;;  %v90_v39 = vadd.f32 %v88_v34, %v74_v36  ;;  %v91_v40 = vadd.f32 %v89_v35, %v75_v37  ;;  %v3559_v35 = vpop.permute.xlu0 %822  ;;  %v3372_v36 = vmov 1983009808  }
  0xb1   :  { %v104_v41 = vmul.f32 %v99_v27, %v94_v38  ;;  %v105_v42 = vmul.f32 %v103_v28, %v94_v38  ;;  %v1702_v61 = vadd.f32 %v1700_v59, %v1690_v56  ;;  %v1712_v62 = vmul.f32 %v1707_v57, %v94_v38  ;;  %4770 = vst [vmem:[#allocation22_spill] sm:$0xff] %v3559_v35 }
  0xb2   :  { %v1703_v21 = vadd.f32 %v1701_v20, %v1691_v10  ;;  %v1713_v22 = vmul.f32 %v1711_v15, %v94_v38  ;;  %v169_v37 = vunpack.c.l.s4 %v3372_v36 }
  0xb3   :  { %v106_v45 = vadd.f32 %v104_v41, %v90_v39  ;;  %v107_v46 = vadd.f32 %v105_v42, %v91_v40  ;;  %v1714_v3 = vadd.f32 %v1712_v62, %v1702_v61  ;;  %v3373_v41 = vmov 1934713408  }
  0xb4   :  { %v1715_v24 = vadd.f32 %v1713_v22, %v1703_v21  ;;  %v170_v40 = vunpack.c.0.s8 %v169_v37  ;;  %v233_v42 = vunpack.c.l.s4 %v3373_v41 }
  0xb5   :  { %v3166_v47 = vmul.f32 -1.442695, %v106_v45  ;;  %v3167_v53 = vmul.f32 -1.442695, %v107_v46  ;;  %v3170_v16 = vmul.f32 -1.442695, %v1714_v3 }
  0xb6   :  { %v3171_v11 = vmul.f32 -1.442695, %v1715_v24  ;;  %v234_v51 = vunpack.c.0.s8 %v233_v42 }
  0xb7   :  { %3252 = vpow2.f32 %v3166_v47  ;;  %v3562_v47 = vsub.s32 %v170_v40, %v3443_v8 }
  0xb8   :  { %3254 = vpow2.f32 %v3167_v53  ;;  %v3570_v59 = vsub.s32 %v234_v51, %v3443_v8 }
  0xc1   :  { %v3253_v60 = vpop.eup %3252 }
  0xc2   :  { %v114_v63 = vadd.f32 1.0, %v3253_v60  ;;  %v3255_v4 = vpop.eup %3254 }
  0xc3   :  { %v115_v19 = vadd.f32 1.0, %v3255_v4 }
  0xc4   :  { %3256 = vrcp.f32 %v114_v63 }
  0xc5   :  { %3258 = vpow2.f32 %v3170_v16 }
  0xc6   :  { %3260 = vrcp.f32 %v115_v19 }
  0xc7   :  { %3262 = vpow2.f32 %v3171_v11 }
  0xce   :  { %v3257_v23 = vpop.eup %3256 }
  0xcf   :  { %v3495_v14 = vmul.f32 %v3257_v23, %v106_v45  ;;  %v3259_v13 = vpop.eup %3258 }
  0xd0   :  { %v3261_v25 = vpop.eup %3260  ;;  %v1722_v26 = vadd.f32 1.0, %v3259_v13 }
  0xd1   :  { %4766 = vst [vmem:[#allocation18_spill] sm:$0xff] %v3495_v14  ;;  %126 = vrot.lane.b32.xlu1 %v3495_v14, %s3365_s1  ;;  %123 = vrot.lane.b32.xlu0 %v3495_v14, %s3366_s4  ;;  %v3509_v27 = vmul.f32 %v3261_v25, %v107_v46  ;;  %v3263_v28 = vpop.eup %3262 }
  0xd2   :  { %3264 = vrcp.f32 %v1722_v26  ;;  %v1723_v29 = vadd.f32 1.0, %v3263_v28  ;;  %v3374_v26 = vmov 5  }
  0xd3   :  { %4767 = vst [vmem:[#allocation19_spill] sm:$0xff] %v3509_v27  ;;  %3227 = vset.pattern.permute.xlu0 %v3374_v26 }
  0xd4   :  { %3266 = vrcp.f32 %v1723_v29 }
  0xd5   :  { %132 = vrot.lane.b32.xlu1 %v3495_v14, %s3367_s5  ;;  %129 = vrot.lane.b32.xlu0 %v3495_v14, %s3368_s6 }
  0xd9   :  { %138 = vrot.lane.b32.xlu1 %v3495_v14, %s3369_s7  ;;  %135 = vrot.lane.b32.xlu0 %v3495_v14, %s3370_s8 }
  0xdc   :  { %v3265_v30 = vpop.eup %3264 }
  0xdd   :  { %145 = vrot.lane.b32.xlu1 %v3509_v27, %s3366_s4  ;;  %141 = vrot.lane.b32.xlu0 %v3495_v14, %s3371_s9  ;;  %v3527_v31 = vmul.f32 %v3265_v30, %v1714_v3 }
  0xde   :  { %v3267_v32 = vpop.eup %3266 }
  0xdf   :  { %4768 = vst [vmem:[#allocation20_spill] sm:$0xff] %v3527_v31  ;;  %v3541_v34 = vmul.f32 %v3267_v32, %v1715_v24 }
  0xe1   :  { %151 = vrot.lane.b32.xlu1 %v3509_v27, %s3368_s6  ;;  %148 = vrot.lane.b32.xlu0 %v3509_v27, %s3365_s1  ;;  %4769 = vst [vmem:[#allocation21_spill] sm:$0xff] %v3541_v34 }
  0xe5   :  { %157 = vrot.lane.b32.xlu1 %v3509_v27, %s3370_s8  ;;  %154 = vrot.lane.b32.xlu0 %v3509_v27, %s3367_s5 }
  0xe9   :  { %163 = vrot.lane.b32.xlu1 %v3509_v27, %s3371_s9  ;;  %160 = vrot.lane.b32.xlu0 %v3509_v27, %s3369_s7 }
  0xed   :  { %1731 = vrot.lane.b32.xlu1 %v3527_v31, %s3366_s4  ;;  %1734 = vrot.lane.b32.xlu0 %v3527_v31, %s3365_s1 }
  0xf1   :  { %1737 = vrot.lane.b32.xlu1 %v3527_v31, %s3368_s6  ;;  %1743 = vrot.lane.b32.xlu0 %v3527_v31, %s3370_s8 }
  0xf5   :  { %1740 = vrot.lane.b32.xlu1 %v3527_v31, %s3367_s5  ;;  %1749 = vrot.lane.b32.xlu0 %v3527_v31, %s3371_s9 }
  0xf9   :  { %1746 = vrot.lane.b32.xlu1 %v3527_v31, %s3369_s7  ;;  %1756 = vrot.lane.b32.xlu0 %v3541_v34, %s3365_s1 }
  0xfd   :  { %1753 = vrot.lane.b32.xlu1 %v3541_v34, %s3366_s4  ;;  %1762 = vrot.lane.b32.xlu0 %v3541_v34, %s3367_s5 }
 0x101   :  { %1759 = vrot.lane.b32.xlu1 %v3541_v34, %s3368_s6  ;;  %1768 = vrot.lane.b32.xlu0 %v3541_v34, %s3369_s7 }
 0x105   :  { %1765 = vrot.lane.b32.xlu1 %v3541_v34, %s3370_s8 }
 0x109   :  { %1771 = vrot.lane.b32.xlu1 %v3541_v34, %s3371_s9 }
 0x143   :  { %v127_v38 = vpop.permute.xlu1 %126  ;;  %v124_v39 = vpop.permute.xlu0 %123 }
 0x144   :  { %v166_v48 = vcombine.low %v3495_v14, %v127_v38  ;;  %v167_v53 = vcombine.high %v3495_v14, %v127_v38 }
 0x146   :  { %v174_v57 = vrot.slane %v166_v48, %v3562_v47  ;;  %v181_v61 = vrot.slane %v167_v53, %v3562_v47 }
 0x147   :  { %v133_v44 = vpop.permute.xlu1 %132  ;;  %v130_v45 = vpop.permute.xlu0 %129 }
 0x148   :  { %v182_v46 = vcombine.low %v124_v39, %v130_v45  ;;  %v183_v49 = vcombine.high %v124_v39, %v130_v45 }
 0x14a   :  { %v190_v54 = vrot.slane %v182_v46, %v3562_v47  ;;  %v197_v58 = vrot.slane %v183_v49, %v3562_v47 }
 0x14b   :  { %v139_v55 = vpop.permute.xlu1 %138  ;;  %v136_v56 = vpop.permute.xlu0 %135 }
 0x14c   :  { %v198_v60 = vcombine.low %v133_v44, %v139_v55  ;;  %v199_v62 = vcombine.high %v133_v44, %v139_v55  ;;  %v230_v1 = vcombine.low %v174_v57, %v190_v54  ;;  %v231_v2 = vcombine.high %v174_v57, %v190_v54 }
 0x14d   :  { %v246_v5 = vcombine.low %v181_v61, %v197_v58  ;;  %v247_v16 = vcombine.high %v181_v61, %v197_v58 }
 0x14e   :  { %v206_v6 = vrot.slane %v198_v60, %v3562_v47  ;;  %v213_v19 = vrot.slane %v199_v62, %v3562_v47  ;;  %v238_v22 = vrot.slane %v230_v1, %v3570_v59  ;;  %v245_v23 = vrot.slane %v231_v2, %v3570_v59 }
 0x14f   :  { %v146_v63 = vpop.permute.xlu1 %145  ;;  %v142_v0 = vpop.permute.xlu0 %141  ;;  %v254_v45 = vrot.slane %v246_v5, %v3570_v59  ;;  %v261_v62 = vrot.slane %v247_v16, %v3570_v59 }
 0x150   :  { %v214_v3 = vcombine.low %v136_v56, %v142_v0  ;;  %v215_v4 = vcombine.high %v136_v56, %v142_v0 }
 0x152   :  { %v222_v10 = vrot.slane %v214_v3, %v3562_v47  ;;  %v229_v15 = vrot.slane %v215_v4, %v3562_v47 }
 0x153   :  { %v152_v20 = vpop.permute.xlu1 %151  ;;  %v149_v21 = vpop.permute.xlu0 %148 }
 0x154   :  { %v318_v24 = vcombine.low %v146_v63, %v152_v20  ;;  %v319_v11 = vcombine.high %v146_v63, %v152_v20  ;;  %v302_v13 = vcombine.low %v3509_v27, %v149_v21  ;;  %v303_v25 = vcombine.high %v3509_v27, %v149_v21 }
 0x155   :  { %v262_v28 = vcombine.low %v206_v6, %v222_v10  ;;  %v263_v29 = vcombine.high %v206_v6, %v222_v10  ;;  %v278_v30 = vcombine.low %v213_v19, %v229_v15  ;;  %v279_v32 = vcombine.high %v213_v19, %v229_v15 }
 0x156   :  { %v326_v36 = vrot.slane %v318_v24, %v3562_v47  ;;  %v333_v37 = vrot.slane %v319_v11, %v3562_v47  ;;  %v310_v38 = vrot.slane %v302_v13, %v3562_v47  ;;  %v317_v39 = vrot.slane %v303_v25, %v3562_v47 }
 0x157   :  { %v158_v40 = vpop.permute.xlu1 %157  ;;  %v155_v41 = vpop.permute.xlu0 %154  ;;  %v270_v42 = vrot.slane %v262_v28, %v3570_v59  ;;  %v277_v44 = vrot.slane %v263_v29, %v3570_v59  ;;  %v286_v46 = vrot.slane %v278_v30, %v3570_v59  ;;  %v293_v53 = vrot.slane %v279_v32, %v3570_v59 }
 0x158   :  { %v366_v48 = vcombine.low %v310_v38, %v326_v36  ;;  %v367_v49 = vcombine.high %v310_v38, %v326_v36  ;;  %v382_v51 = vcombine.low %v317_v39, %v333_v37  ;;  %v383_v61 = vcombine.high %v317_v39, %v333_v37 }
 0x159   :  { %v294_v54 = vcombine.low %v238_v22, %v270_v42  ;;  %v295_v55 = vcombine.high %v238_v22, %v270_v42  ;;  %v296_v56 = vcombine.low %v245_v23, %v277_v44  ;;  %v3590_v57 = vcombine.high %v245_v23, %v277_v44 }
 0x15a   :  { %v374_v58 = vrot.slane %v366_v48, %v3570_v59  ;;  %v381_v60 = vrot.slane %v367_v49, %v3570_v59  ;;  %v390_v3 = vrot.slane %v382_v51, %v3570_v59  ;;  %v3598_v4 = vcombine.low %v254_v45, %v286_v46 }
 0x15b   :  { %v164_v63 = vpop.permute.xlu1 %163  ;;  %v439_v0 = vsel %vm438_vm0, %v294_v54, 0.0  ;;  %v161_v1 = vpop.permute.xlu0 %160  ;;  %v448_v2 = vsel %vm438_vm0, %v295_v55, 0.0  ;;  %v3601_v19 = vsel %vm438_vm0, %v296_v56, 0.0  ;;  %v3605_v16 = vsel %vm438_vm0, %v3590_v57, 0.0 }
 0x15c   :  { %v350_v5 = vcombine.low %v158_v40, %v164_v63  ;;  %v351_v6 = vcombine.high %v158_v40, %v164_v63  ;;  %600 = vadd.xlane.f32.xlu0 %v439_v0  ;;  %v334_v10 = vcombine.low %v155_v41, %v161_v1  ;;  %v335_v15 = vcombine.high %v155_v41, %v161_v1 }
 0x15d   :  { %v3607_v20 = vcombine.high %v254_v45, %v286_v46  ;;  %v3609_v21 = vcombine.low %v261_v62, %v293_v53  ;;  %v3617_v26 = vsel %vm438_vm0, %v3598_v4, 0.0  ;;  %v3624_v29 = vrot.slane %v383_v61, %v3570_v59 }
 0x15e   :  { %v358_v22 = vrot.slane %v350_v5, %v3562_v47  ;;  %v365_v23 = vrot.slane %v351_v6, %v3562_v47  ;;  %v342_v24 = vrot.slane %v334_v10, %v3562_v47  ;;  %v349_v11 = vrot.slane %v335_v15, %v3562_v47 }
 0x15f   :  { %v1732_v13 = vpop.permute.xlu1 %1731  ;;  %v1735_v25 = vpop.permute.xlu0 %1734  ;;  %v3621_v28 = vsel %vm438_vm0, %v3607_v20, 0.0  ;;  %v3626_v30 = vcombine.high %v261_v62, %v293_v53  ;;  %v3632_v41 = vsel %vm438_vm0, %v3609_v21, 0.0  ;;  %v3635_v42 = vsel %vm438_vm0, %v294_v54, -inf }
 0x160   :  { %604 = vadd.xlane.f32.xlu0 %v448_v2  ;;  %v1774_v32 = vcombine.low %v3527_v31, %v1735_v25  ;;  %v1775_v36 = vcombine.high %v3527_v31, %v1735_v25  ;;  %v398_v37 = vcombine.low %v342_v24, %v358_v22  ;;  %v399_v38 = vcombine.high %v342_v24, %v358_v22 }
 0x161   :  { %v414_v39 = vcombine.low %v349_v11, %v365_v23  ;;  %v415_v40 = vcombine.high %v349_v11, %v365_v23  ;;  %v3641_v46 = vsel %vm438_vm0, %v3626_v30, 0.0  ;;  %v3644_v48 = vsel %vm438_vm0, %v295_v55, -inf }
 0x162   :  { %v406_v44 = vrot.slane %v398_v37, %v3570_v59  ;;  %v413_v45 = vrot.slane %v399_v38, %v3570_v59  ;;  %v3647_v49 = vrot.slane %v1774_v32, %v3562_v47  ;;  %v3650_v51 = vrot.slane %v1775_v36, %v3562_v47 }
 0x163   :  { %v1738_v53 = vpop.permute.xlu1 %1737  ;;  %v1744_v54 = vpop.permute.xlu0 %1743  ;;  %v422_v61 = vrot.slane %v414_v39, %v3570_v59  ;;  %v3654_v62 = vrot.slane %v415_v40, %v3570_v59  ;;  %v3667_v22 = vsel %vm438_vm0, %v296_v56, -inf  ;;  %v3689_v40 = vsel %vm438_vm0, %v3590_v57, -inf }
 0x164   :  { %v1790_v63 = vcombine.low %v1732_v13, %v1738_v53  ;;  %v1791_v1 = vcombine.high %v1732_v13, %v1738_v53  ;;  %v3656_v5 = vcombine.high %v374_v58, %v406_v44  ;;  %v3658_v6 = vcombine.low %v374_v58, %v406_v44 }
 0x165   :  { %v3660_v55 = vcombine.low %v381_v60, %v413_v45  ;;  %v3662_v10 = vcombine.high %v381_v60, %v413_v45  ;;  %v3664_v15 = vcombine.low %v390_v3, %v422_v61  ;;  %v3685_v39 = vcombine.high %v390_v3, %v422_v61 }
 0x166   :  { %v3670_v23 = vrot.slane %v1790_v63, %v3562_v47  ;;  %v3673_v24 = vrot.slane %v1791_v1, %v3562_v47  ;;  %v449_v11 = vsel %vm438_vm0, %v3656_v5, 0.0  ;;  %v440_v58 = vsel %vm438_vm0, %v3658_v6, 0.0 }
 0x167   :  { %v1741_v13 = vpop.permute.xlu1 %1740  ;;  %606 = vadd.xlane.f32.xlu0 %v449_v11  ;;  %v450_v60 = vadd.f32 %v449_v11, %v448_v2  ;;  %602 = vadd.xlane.f32.xlu1 %v440_v58  ;;  %v441_v25 = vadd.f32 %v440_v58, %v439_v0  ;;  %v1750_v32 = vpop.permute.xlu0 %1749  ;;  %v458_v56 = vsel %vm438_vm0, %v3660_v55, 0.0  ;;  %v467_v36 = vsel %vm438_vm0, %v3662_v10, 0.0 }
 0x168   :  { %v1822_v38 = vcombine.low %v1744_v54, %v1750_v32  ;;  %v459_v45 = vadd.f32 %v458_v56, %v3601_v19  ;;  %v1823_v63 = vcombine.high %v1744_v54, %v1750_v32  ;;  %v468_v3 = vadd.f32 %v467_v36, %v3605_v16 }
 0x169   :  { %v451_v2 = vrot.slane %v450_v60, 4  ;;  %v442_v44 = vrot.slane %v441_v25, 4  ;;  %v476_v0 = vsel %vm438_vm0, %v3664_v15, 0.0 }
 0x16a   :  { %v3697_v1 = vrot.slane %v1822_v38, %v3562_v47  ;;  %v460_v58 = vrot.slane %v459_v45, 4 }
 0x16b   :  { %v452_v61 = vadd.f32 %v451_v2, %v450_v60  ;;  %v443_v11 = vadd.f32 %v442_v44, %v441_v25  ;;  %v1747_v57 = vpop.permute.xlu1 %1746  ;;  %610 = vadd.xlane.f32.xlu0 %v458_v56  ;;  %608 = vadd.xlane.f32.xlu1 %v3601_v19  ;;  %v1757_v7 = vpop.permute.xlu0 %1756  ;;  %v469_v60 = vrot.slane %v468_v3, 4  ;;  %v3706_v25 = vrot.slane %v1823_v63, %v3562_v47 }
 0x16c   :  { %v1806_v37 = vcombine.low %v1741_v13, %v1747_v57  ;;  %v1807_v27 = vcombine.high %v1741_v13, %v1747_v57  ;;  %v1910_v54 = vcombine.low %v3541_v34, %v1757_v7  ;;  %v1911_v32 = vcombine.high %v3541_v34, %v1757_v7 }
 0x16d   :  { %v453_v38 = vrot.slane %v452_v61, 2  ;;  %v444_v53 = vrot.slane %v443_v11, 2  ;;  %v461_v31 = vadd.f32 %v460_v58, %v459_v45  ;;  %v485_v13 = vsel %vm438_vm0, %v3685_v39, 0.0 }
 0x16e   :  { %v3709_v56 = vrot.slane %v1806_v37, %v3562_v47  ;;  %v3712_v19 = vrot.slane %v1807_v27, %v3562_v47  ;;  %v470_v34 = vadd.f32 %v469_v60, %v468_v3  ;;  %v3720_v37 = vrot.slane %v1910_v54, %v3562_v47 }
 0x16f   :  { %v454_v2 = vadd.f32 %v453_v38, %v452_v61  ;;  %v445_v44 = vadd.f32 %v444_v53, %v443_v11  ;;  %v462_v57 = vrot.slane %v461_v31, 2  ;;  %v1754_v7 = vpop.permute.xlu1 %1753  ;;  %614 = vadd.xlane.f32.xlu0 %v467_v36  ;;  %612 = vadd.xlane.f32.xlu1 %v3605_v16  ;;  %v1763_v45 = vpop.permute.xlu0 %1762  ;;  %v3723_v27 = vrot.slane %v1911_v32, %v3562_v47 }
 0x170   :  { %v477_v58 = vadd.f32 %v476_v0, %v3617_v26  ;;  %v471_v38 = vrot.slane %v470_v34, 2  ;;  %v486_v3 = vadd.f32 %v485_v13, %v3621_v28  ;;  %v3731_v60 = vcombine.low %v3624_v29, %v3654_v62 }
 0x171   :  { %v455_v61 = vrot.slane %v454_v2, 1  ;;  %v446_v53 = vrot.slane %v445_v44, 1  ;;  %v463_v11 = vadd.f32 %v462_v57, %v461_v31  ;;  %v3736_v36 = vcombine.high %v3624_v29, %v3654_v62 }
 0x172   :  { %v478_v16 = vrot.slane %v477_v58, 4  ;;  %v472_v14 = vadd.f32 %v471_v38, %v470_v34 }
 0x173   :  { %v456_v54 = vadd.f32 %v455_v61, %v454_v2  ;;  %v447_v63 = vadd.f32 %v446_v53, %v445_v44  ;;  %v464_v32 = vrot.slane %v463_v11, 1  ;;  %v1760_v52 = vpop.permute.xlu1 %1759  ;;  %618 = vadd.xlane.f32.xlu0 %v476_v0  ;;  %616 = vadd.xlane.f32.xlu1 %v3617_v26  ;;  %v1769_v31 = vpop.permute.xlu0 %1768 }
 0x174   :  { %v1926_v57 = vcombine.low %v1754_v7, %v1760_v52  ;;  %v1927_v50 = vcombine.high %v1754_v7, %v1760_v52  ;;  %v479_v43 = vadd.f32 %v478_v16, %v477_v58  ;;  %v473_v2 = vrot.slane %v472_v14, 1 }
 0x175   :  { %v465_v18 = vadd.f32 %v464_v32, %v463_v11  ;;  %v1942_v44 = vcombine.low %v1763_v45, %v1769_v31  ;;  %v3740_v61 = vmul.f32 0.0625, %v456_v54  ;;  %v3742_v34 = vmul.f32 0.0625, %v447_v63 }
 0x176   :  { %v480_v0 = vrot.slane %v479_v43, 2  ;;  %v1943_v26 = vcombine.high %v1763_v45, %v1769_v31  ;;  %v3747_v52 = vrot.slane %v1926_v57, %v3562_v47  ;;  %v3750_v29 = vrot.slane %v1927_v50, %v3562_v47 }
 0x177   :  { %v3744_v53 = vmul.f32 0.0625, %v465_v18  ;;  %v3752_v62 = vpop.permute.xlu1 %1765  ;;  %622 = vadd.xlane.f32.xlu0 %v485_v13  ;;  %v487_v7 = vrot.slane %v486_v3, 4  ;;  %620 = vadd.xlane.f32.xlu1 %v3621_v28  ;;  %v474_v58 = vadd.f32 %v473_v2, %v472_v14  ;;  %v494_v63 = vsel %vm438_vm0, %v3731_v60, 0.0 }
 0x178   :  { %v481_v11 = vadd.f32 %v480_v0, %v479_v43  ;;  %v503_v18 = vsel %vm438_vm0, %v3736_v36, 0.0  ;;  %v3760_v45 = vrot.slane %v1942_v44, %v3562_v47  ;;  %v495_v50 = vadd.f32 %v494_v63, %v3632_v41 }
 0x179   :  { %v488_v38 = vadd.f32 %v487_v7, %v486_v3  ;;  %v504_v16 = vadd.f32 %v503_v18, %v3641_v46  ;;  %v3765_v54 = vrot.slane %v1943_v26, %v3562_v47  ;;  %v521_v43 = vsel %vm438_vm0, %v3658_v6, -inf }
 0x17a   :  { %v482_v13 = vrot.slane %v481_v11, 1  ;;  %v530_v14 = vsel %vm438_vm0, %v3656_v5, -inf  ;;  %v496_v31 = vrot.slane %v495_v50, 4  ;;  %v522_v57 = vmax.f32 %v3635_v42, %v521_v43 }
 0x17b   :  { %v489_v28 = vrot.slane %v488_v38, 2  ;;  %v1772_v32 = vpop.permute.xlu1 %1771  ;;  %626 = vadd.xlane.f32.xlu0 %v494_v63  ;;  %624 = vadd.xlane.f32.xlu1 %v3632_v41  ;;  %v505_v3 = vrot.slane %v504_v16, 4  ;;  %v3773_v2 = vmul.f32 0.0625, %v474_v58  ;;  %v531_v0 = vmax.f32 %v3644_v48, %v530_v14 }
 0x17c   :  { %v483_v44 = vadd.f32 %v482_v13, %v481_v11  ;;  %v3778_v6 = vsel %vm438_vm0, %v3660_v55, -inf  ;;  %v497_v5 = vadd.f32 %v496_v31, %v495_v50  ;;  %v523_v33 = vrot.slane %v522_v57, 4 }
 0x17d   :  { %v490_v26 = vadd.f32 %v489_v28, %v488_v38  ;;  %v506_v7 = vadd.f32 %v505_v3, %v504_v16  ;;  %v1958_v41 = vcombine.low %v3752_v62, %v1772_v32  ;;  %v1959_v17 = vcombine.high %v3752_v62, %v1772_v32 }
 0x17e   :  { %v3780_v63 = vmul.f32 0.0625, %v483_v44  ;;  %v532_v12 = vrot.slane %v531_v0, 4  ;;  %v498_v35 = vrot.slane %v497_v5, 2  ;;  %v524_v13 = vmax.f32 %v522_v57, %v523_v33 }
 0x17f   :  { %v491_v58 = vrot.slane %v490_v26, 1  ;;  %630 = vadd.xlane.f32.xlu0 %v503_v18  ;;  %v507_v11 = vrot.slane %v506_v7, 2  ;;  %628 = vadd.xlane.f32.xlu1 %v3641_v46  ;;  %v540_v38 = vmax.f32 %v3667_v22, %v3778_v6  ;;  %v3789_v50 = vsel %vm438_vm0, %v3662_v10, -inf }
 0x180   :  { %v533_v55 = vmax.f32 %v531_v0, %v532_v12  ;;  %v3793_v16 = vsel %vm438_vm0, %v3664_v15, -inf  ;;  %v499_v28 = vadd.f32 %v498_v35, %v497_v5  ;;  %v525_v18 = vrot.slane %v524_v13, 2 }
 0x181   :  { %v492_v62 = vadd.f32 %v491_v58, %v490_v26  ;;  %v508_v32 = vadd.f32 %v507_v11, %v506_v7  ;;  %v3796_v46 = vrot.slane %v1958_v41, %v3562_v47  ;;  %v541_v33 = vrot.slane %v540_v38, 4 }
 0x182   :  { %v534_v12 = vrot.slane %v533_v55, 2  ;;  %v549_v31 = vmax.f32 %v3689_v40, %v3789_v50  ;;  %v500_v3 = vrot.slane %v499_v28, 1  ;;  %v526_v57 = vmax.f32 %v524_v13, %v525_v18 }
 0x183   :  { %v509_v10 = vrot.slane %v508_v32, 1  ;;  %650 = vmax.xlane.f32.xlu0 %v521_v43  ;;  %648 = vmax.xlane.f32.xlu1 %v3635_v42  ;;  %v3803_v35 = vsel %vm438_vm0, %v3598_v4, -inf  ;;  %v542_v44 = vmax.f32 %v540_v38, %v541_v33  ;;  %v3807_v5 = vmul.f32 0.0625, %v492_v62 }
 0x184   :  { %v535_v15 = vmax.f32 %v533_v55, %v534_v12  ;;  %v550_v0 = vrot.slane %v549_v31, 4  ;;  %v558_v26 = vmax.f32 %v3803_v35, %v3793_v16  ;;  %v3810_v7 = vrot.slane %v1959_v17, %v3562_v47 }
 0x185   :  { %v527_v41 = vrot.slane %v526_v57, 1  ;;  %v3814_v42 = vsel %vm438_vm0, %v3685_v39, -inf  ;;  %v543_v4 = vrot.slane %v542_v44, 2  ;;  %v501_v13 = vadd.f32 %v500_v3, %v499_v28 }
 0x186   :  { %v536_v43 = vrot.slane %v535_v15, 1  ;;  %v551_v58 = vmax.f32 %v549_v31, %v550_v0  ;;  %v559_v11 = vrot.slane %v558_v26, 4  ;;  %v510_v55 = vadd.f32 %v509_v10, %v508_v32 }
 0x187   :  { %v528_v38 = vmax.f32 %v526_v57, %v527_v41  ;;  %654 = vmax.xlane.f32.xlu0 %v530_v14  ;;  %652 = vmax.xlane.f32.xlu1 %v3644_v48  ;;  %v3819_v17 = vsel %vm438_vm0, %v3607_v20, -inf  ;;  %v544_v18 = vmax.f32 %v542_v44, %v543_v4  ;;  %v3826_v14 = vsel %vm438_vm0, %v3731_v60, -inf }
 0x188   :  { %v537_v62 = vmax.f32 %v535_v15, %v536_v43  ;;  %v552_v12 = vrot.slane %v551_v58, 2  ;;  %v560_v39 = vmax.f32 %v558_v26, %v559_v11  ;;  %v567_v28 = vmax.f32 %v3819_v17, %v3814_v42 }
 0x189   :  { %v592_v33 = vadd.f32 %v528_v38, %v3742_v34  ;;  %v3830_v48 = vsel %vm438_vm0, %v3609_v21, -inf  ;;  %v545_v32 = vrot.slane %v544_v18, 1  ;;  %v3839_v60 = vsel %vm438_vm0, %v3626_v30, -inf }
 0x18a   :  { %v593_v20 = vadd.f32 %v537_v62, %v3740_v61  ;;  %v553_v31 = vmax.f32 %v551_v58, %v552_v12  ;;  %v561_v3 = vrot.slane %v560_v39, 2  ;;  %v568_v34 = vrot.slane %v567_v28, 4 }
 0x18b   :  { %658 = vmax.xlane.f32.xlu0 %v3778_v6  ;;  %656 = vmax.xlane.f32.xlu1 %v3667_v22  ;;  %v576_v10 = vmax.f32 %v3830_v48, %v3826_v14  ;;  %v3843_v21 = vsel %vm438_vm0, %v3736_v36, -inf  ;;  %v546_v57 = vmax.f32 %v544_v18, %v545_v32  ;;  %v1838_v26 = vcombine.low %v3647_v49, %v3670_v23 }
 0x18c   :  { %v705_v61 = vsel %vm704_vm1, %v593_v20, %v592_v33  ;;  %v554_v15 = vrot.slane %v553_v31, 1  ;;  %v562_v44 = vmax.f32 %v560_v39, %v561_v3  ;;  %v569_v6 = vmax.f32 %v567_v28, %v568_v34 }
 0x18d   :  { %v577_v0 = vrot.slane %v576_v10, 4  ;;  %v585_v22 = vmax.f32 %v3839_v60, %v3843_v21  ;;  %v594_v30 = vadd.f32 %v546_v57, %v3744_v53  ;;  %v1870_v36 = vcombine.low %v3709_v56, %v3697_v1 }
 0x18e   :  { %v555_v41 = vmax.f32 %v553_v31, %v554_v15  ;;  %v563_v43 = vrot.slane %v562_v44, 1  ;;  %v570_v4 = vrot.slane %v569_v6, 2  ;;  %v1846_v38 = vrot.slane %v1838_v26, %v3570_v59 }
 0x18f   :  { %662 = vmax.xlane.f32.xlu0 %v3789_v50  ;;  %660 = vmax.xlane.f32.xlu1 %v3689_v40  ;;  %v578_v58 = vmax.f32 %v576_v10, %v577_v0  ;;  %v586_v11 = vrot.slane %v585_v22, 4  ;;  %v707_v62 = vsel %vm706_vm2, %v594_v30, %v705_v61  ;;  %v1878_v12 = vrot.slane %v1870_v36, %v3570_v59 }
 0x190   :  { %v595_v18 = vadd.f32 %v555_v41, %v3773_v2  ;;  %v564_v53 = vmax.f32 %v562_v44, %v563_v43  ;;  %v518_v39 = vmul.f32 0.0625, %v501_v13  ;;  %v571_v33 = vmax.f32 %v569_v6, %v570_v4 }
 0x191   :  { %v579_v28 = vrot.slane %v578_v58, 2  ;;  %v587_v20 = vmax.f32 %v585_v22, %v586_v11  ;;  %v519_v50 = vmul.f32 0.0625, %v510_v55  ;;  %v3861_v31 = vcombine.low %v1846_v38, %v1878_v12 }
 0x192   :  { %v709_v40 = vsel %vm708_vm3, %v595_v18, %v707_v62  ;;  %v596_v32 = vadd.f32 %v564_v53, %v3780_v63  ;;  %v572_v2 = vrot.slane %v571_v33, 1  ;;  %v4771_v13 = vcombine.high %v3709_v56, %v3697_v1 }
 0x193   :  { %666 = vmax.xlane.f32.xlu0 %v3793_v16  ;;  %664 = vmax.xlane.f32.xlu1 %v3803_v35  ;;  %v580_v3 = vmax.f32 %v578_v58, %v579_v28  ;;  %v588_v34 = vrot.slane %v587_v20, 2  ;;  %v1903_v61 = vcombine.high %v1846_v38, %v1878_v12  ;;  %v4772_v63 = vcombine.high %v3647_v49, %v3670_v23 }
 0x194   :  { %v3869_v10 = vrot.slane %v4771_v13, %v3570_v59  ;;  %v711_v55 = vsel %vm710_vm4, %v596_v32, %v709_v40  ;;  %v1975_v16 = vcombine.high %v3720_v37, %v3747_v52  ;;  %v573_v35 = vmax.f32 %v571_v33, %v572_v2 }
 0x195   :  { %v3876_v57 = vrot.slane %v4772_v63, %v3570_v59  ;;  %v581_v15 = vrot.slane %v580_v3, 1  ;;  %v589_v44 = vmax.f32 %v587_v20, %v588_v34  ;;  %v2046_v1 = vsel %vm438_vm0, %v3861_v31, 0.0 }
 0x196   :  { %v2007_v6 = vcombine.high %v3760_v45, %v3796_v46  ;;  %v1974_v49 = vcombine.low %v3720_v37, %v3747_v52  ;;  %v2006_v23 = vcombine.low %v3760_v45, %v3796_v46  ;;  %v597_v0 = vadd.f32 %v573_v35, %v3807_v5 }
 0x197   :  { %v3884_v56 = vcombine.high %v3876_v57, %v3869_v10  ;;  %670 = vmax.xlane.f32.xlu0 %v3814_v42  ;;  %668 = vmax.xlane.f32.xlu1 %v3819_v17  ;;  %v582_v22 = vmax.f32 %v580_v3, %v581_v15  ;;  %v590_v26 = vrot.slane %v589_v44, 1  ;;  %v3896_v30 = vrot.slane %v1975_v16, %v3570_v59 }
 0x198   :  { %v3899_v41 = vrot.slane %v2007_v6, %v3570_v59  ;;  %v1982_v43 = vrot.slane %v1974_v49, %v3570_v59  ;;  %v2014_v37 = vrot.slane %v2006_v23, %v3570_v59  ;;  %v4773_v52 = vcombine.high %v3650_v51, %v3673_v24 }
 0x199   :  { %v713_v46 = vsel %vm712_vm5, %v597_v0, %v711_v55  ;;  %v598_v5 = vadd.f32 %v582_v22, %v518_v39  ;;  %v591_v42 = vmax.f32 %v589_v44, %v590_v26  ;;  %v4774_v17 = vcombine.high %v3712_v19, %v3706_v25 }
 0x19a   :  { %v1869_v45 = vrot.slane %v4773_v52, %v3570_v59  ;;  %v3914_v4 = vcombine.high %v3896_v30, %v3899_v41  ;;  %v3916_v58 = vcombine.low %v1982_v43, %v2014_v37  ;;  %v1991_v11 = vcombine.high %v3723_v27, %v3750_v29 }
 0x19b   :  { %v1901_v36 = vrot.slane %v4774_v17, %v3570_v59  ;;  %v2023_v38 = vcombine.high %v3765_v54, %v3810_v7  ;;  %674 = vmax.xlane.f32.xlu0 %v3826_v14  ;;  %672 = vmax.xlane.f32.xlu1 %v3830_v48  ;;  %v715_v62 = vsel %vm714_vm6, %v598_v5, %v713_v46  ;;  %v3927_v53 = vsel %vm438_vm0, %v3884_v56, -inf }
 0x19c   :  { %v599_v18 = vadd.f32 %v591_v42, %v519_v50  ;;  %v2154_v39 = vsel %vm438_vm0, %v3914_v4, -inf  ;;  %v2047_v33 = vsel %vm438_vm0, %v3916_v58, 0.0  ;;  %v2005_v28 = vrot.slane %v1991_v11, %v3570_v59 }
 0x19d   :  { %v3929_v12 = vcombine.low %v1869_v45, %v1901_v36  ;;  %v2037_v14 = vrot.slane %v2023_v38, %v3570_v59  ;;  %v2155_v20 = vmax.f32 %v3927_v53, %v2154_v39  ;;  %v2048_v50 = vadd.f32 %v2047_v33, %v2046_v1 }
 0x19e   :  { %v3938_v48 = vsel %vm716_vm7, %v599_v18, %v715_v62  ;;  %v4775_v2 = vcombine.low %v3650_v51, %v3673_v24  ;;  %v4776_v34 = vcombine.low %v3712_v19, %v3706_v25  ;;  %v1990_v55 = vcombine.low %v3723_v27, %v3750_v29 }
 0x19f   :  { %v3943_v40 = vsel %vm438_vm0, %v3929_v12, 0.0  ;;  %v3945_v32 = vcombine.low %v2005_v28, %v2037_v14  ;;  %676 = vmax.xlane.f32.xlu0 %v3839_v60  ;;  %678 = vmax.xlane.f32.xlu1 %v3843_v21  ;;  %v2156_v63 = vrot.slane %v2155_v20, 4  ;;  %v2049_v16 = vrot.slane %v2048_v50, 4 }
 0x1a0   :  { %v1862_v3 = vrot.slane %v4775_v2, %v3570_v59  ;;  %v1894_v13 = vrot.slane %v4776_v34, %v3570_v59  ;;  %v2022_v35 = vcombine.low %v3765_v54, %v3810_v7  ;;  %v3961_v15 = vcombine.high %v1982_v43, %v2014_v37 }
 0x1a1   :  { %v2101_v51 = vsel %vm438_vm0, %v3945_v32, 0.0  ;;  %v1998_v25 = vrot.slane %v1990_v55, %v3570_v59  ;;  %v3968_v19 = vcombine.high %v1869_v45, %v1901_v36  ;;  %v2157_v27 = vmax.f32 %v2155_v20, %v2156_v63 }
 0x1a2   :  { %v3965_v24 = vcombine.low %v1862_v3, %v1894_v13  ;;  %v2050_v29 = vadd.f32 %v2049_v16, %v2048_v50  ;;  %v2102_v60 = vadd.f32 %v2101_v51, %v3943_v40  ;;  %v2030_v21 = vrot.slane %v2022_v35, %v3570_v59 }
 0x1a3   :  { %v3973_v44 = vsel %vm438_vm0, %v1903_v61, -inf  ;;  %v2055_v54 = vsel %vm438_vm0, %v1903_v61, 0.0  ;;  %v2056_v7 = vsel %vm438_vm0, %v3961_v15, 0.0  ;;  %v2045_v6 = vcombine.high %v2005_v28, %v2037_v14  ;;  %2206 = vadd.xlane.f32.xlu1 %v2046_v1 }
 0x1a4   :  { %2258 = vmax.xlane.f32.xlu0 %v3973_v44  ;;  %v2158_v49 = vrot.slane %v2157_v27, 2  ;;  %v2051_v23 = vrot.slane %v2050_v29, 2  ;;  %v2103_v0 = vrot.slane %v2102_v60, 4  ;;  %v3979_v22 = vcombine.low %v1998_v25, %v2030_v21 }
 0x1a5   :  { %v3983_v26 = vsel %vm438_vm0, %v3965_v24, -inf  ;;  %v2057_v43 = vadd.f32 %v2056_v7, %v2055_v54  ;;  %v3987_v61 = vsel %vm438_vm0, %v3968_v19, 0.0  ;;  %v2110_v37 = vsel %vm438_vm0, %v2045_v6, 0.0 }
 0x1a6   :  { %v2052_v52 = vadd.f32 %v2051_v23, %v2050_v29  ;;  %v2104_v45 = vadd.f32 %v2103_v0, %v2102_v60  ;;  %v2163_v1 = vsel %vm438_vm0, %v3979_v22, -inf  ;;  %v3992_v46 = vcombine.high %v1862_v3, %v1894_v13 }
 0x1a7   :  { %v2164_v5 = vmax.f32 %v3983_v26, %v2163_v1  ;;  %v2058_v42 = vrot.slane %v2057_v43, 4  ;;  %v2111_v17 = vadd.f32 %v2110_v37, %v3987_v61  ;;  %v2159_v36 = vmax.f32 %v2157_v27, %v2158_v49  ;;  %2208 = vadd.xlane.f32.xlu1 %v2047_v33 }
 0x1a8   :  { %2268 = vmax.xlane.f32.xlu0 %v2154_v39  ;;  %v2053_v11 = vrot.slane %v2052_v52, 1  ;;  %v2105_v38 = vrot.slane %v2104_v45, 2  ;;  %v3996_v62 = vcombine.high %v1998_v25, %v2030_v21  ;;  %v4000_v50 = vcombine.low %v3876_v57, %v3869_v10 }
 0x1a9   :  { %v2165_v18 = vrot.slane %v2164_v5, 4  ;;  %v2059_v28 = vadd.f32 %v2058_v42, %v2057_v43  ;;  %v2112_v14 = vrot.slane %v2111_v17, 4  ;;  %v4004_v2 = vsel %vm438_vm0, %v3992_v46, -inf }
 0x1aa   :  { %v2106_v20 = vadd.f32 %v2105_v38, %v2104_v45  ;;  %v2172_v39 = vsel %vm438_vm0, %v3996_v62, -inf  ;;  %v2160_v55 = vrot.slane %v2159_v36, 1  ;;  %v2054_v63 = vadd.f32 %v2053_v11, %v2052_v52 }
 0x1ab   :  { %v2166_v33 = vmax.f32 %v2164_v5, %v2165_v18  ;;  %v2060_v3 = vrot.slane %v2059_v28, 2  ;;  %v2113_v34 = vadd.f32 %v2112_v14, %v2111_v17  ;;  %v2173_v13 = vmax.f32 %v4004_v2, %v2172_v39  ;;  %2210 = vadd.xlane.f32.xlu1 %v2055_v54 }
 0x1ac   :  { %2232 = vadd.xlane.f32.xlu0 %v2101_v51  ;;  %v4011_v10 = vcombine.low %v3896_v30, %v3899_v41  ;;  %v2107_v57 = vrot.slane %v2106_v20, 1  ;;  %v2064_v27 = vsel %vm438_vm0, %v4000_v50, 0.0  ;;  %v2181_v60 = vsel %vm438_vm0, %v3945_v32, -inf }
 0x1ad   :  { %v2167_v16 = vrot.slane %v2166_v33, 2  ;;  %v2061_v35 = vadd.f32 %v2060_v3, %v2059_v28  ;;  %v2114_v25 = vrot.slane %v2113_v34, 2  ;;  %v2174_v54 = vrot.slane %v2173_v13, 4 }
 0x1ae   :  { %v2065_v29 = vsel %vm438_vm0, %v4011_v10, 0.0  ;;  %v4021_v30 = vsel %vm438_vm0, %v3929_v12, -inf  ;;  %v4023_v41 = vmax.f32 %v2159_v36, %v2160_v55  ;;  %v4026_v0 = vmul.f32 0.0625, %v2054_v63 }
 0x1af   :  { %v2062_v21 = vrot.slane %v2061_v35, 1  ;;  %v2115_v51 = vadd.f32 %v2114_v25, %v2113_v34  ;;  %2212 = vadd.xlane.f32.xlu1 %v2056_v7  ;;  %v2066_v49 = vadd.f32 %v2065_v29, %v2064_v27  ;;  %v2182_v23 = vmax.f32 %v4021_v30, %v2181_v60 }
 0x1b0   :  { %2272 = vmax.xlane.f32.xlu0 %v2163_v1  ;;  %v2108_v43 = vadd.f32 %v2107_v57, %v2106_v20  ;;  %v4028_v52 = vmax.f32 %v2166_v33, %v2167_v16  ;;  %v2190_v42 = vsel %vm438_vm0, %v2045_v6, -inf  ;;  %v2074_v12 = vsel %vm438_vm0, %v3914_v4, 0.0 }
 0x1b1   :  { %v2116_v32 = vrot.slane %v2115_v51, 1  ;;  %v2067_v45 = vrot.slane %v2066_v49, 4  ;;  %v2183_v5 = vrot.slane %v2182_v23, 4  ;;  %v2063_v17 = vadd.f32 %v2062_v21, %v2061_v35 }
 0x1b2   :  { %v4033_v1 = vmax.f32 %v2173_v13, %v2174_v54  ;;  %v4037_v7 = vsel %vm438_vm0, %v3968_v19, -inf  ;;  %v2073_v18 = vsel %vm438_vm0, %v3884_v56, 0.0  ;;  %v2124_v28 = vmul.f32 0.0625, %v2108_v43 }
 0x1b3   :  { %v2117_v36 = vadd.f32 %v2116_v32, %v2115_v51  ;;  %2214 = vadd.xlane.f32.xlu1 %v2064_v27  ;;  %v2068_v11 = vadd.f32 %v2067_v45, %v2066_v49  ;;  %v2184_v38 = vmax.f32 %v2182_v23, %v2183_v5  ;;  %v2191_v6 = vmax.f32 %v4037_v7, %v2190_v42 }
 0x1b4   :  { %2236 = vadd.xlane.f32.xlu0 %v2110_v37  ;;  %v2075_v14 = vadd.f32 %v2074_v12, %v2073_v18  ;;  %v4044_v4 = vsel %vm438_vm0, %v3861_v31, -inf  ;;  %v4048_v20 = vsel %vm438_vm0, %v3916_v58, -inf  ;;  %v4052_v34 = vmul.f32 0.0625, %v2063_v17 }
 0x1b5   :  { %v2069_v19 = vrot.slane %v2068_v11, 2  ;;  %v2185_v37 = vrot.slane %v2184_v38, 2  ;;  %v2192_v33 = vrot.slane %v2191_v6, 4  ;;  %v2128_v3 = vmax.f32 %v4044_v4, %v4048_v20 }
 0x1b6   :  { %v2125_v56 = vmul.f32 0.0625, %v2117_v36  ;;  %v2076_v13 = vrot.slane %v2075_v14, 4  ;;  %v4056_v55 = vsel %vm438_vm0, %v3961_v15, -inf  ;;  %v4062_v25 = vsel %vm438_vm0, %v3965_v24, 0.0 }
 0x1b7   :  { %v2070_v31 = vadd.f32 %v2069_v19, %v2068_v11  ;;  %2216 = vadd.xlane.f32.xlu1 %v2065_v29  ;;  %v2186_v63 = vmax.f32 %v2184_v38, %v2185_v37  ;;  %v2193_v58 = vmax.f32 %v2191_v6, %v2192_v33  ;;  %v2129_v57 = vrot.slane %v2128_v3, 4 }
 0x1b8   :  { %2276 = vmax.xlane.f32.xlu0 %v2172_v39  ;;  %v2077_v16 = vadd.f32 %v2076_v13, %v2075_v14  ;;  %v2137_v35 = vmax.f32 %v3973_v44, %v4056_v55  ;;  %v4066_v27 = vsel %vm438_vm0, %v3979_v22, 0.0  ;;  %v4072_v44 = vsel %vm438_vm0, %v4011_v10, -inf }
 0x1b9   :  { %v2071_v15 = vrot.slane %v2070_v31, 1  ;;  %v2187_v21 = vrot.slane %v2186_v63, 1  ;;  %v2194_v39 = vrot.slane %v2193_v58, 2  ;;  %v2130_v51 = vmax.f32 %v2128_v3, %v2129_v57 }
 0x1ba   :  { %v2078_v29 = vrot.slane %v2077_v16, 2  ;;  %v2138_v54 = vrot.slane %v2137_v35, 4  ;;  %v2084_v49 = vadd.f32 %v4066_v27, %v4062_v25  ;;  %v4076_v22 = vsel %vm438_vm0, %v4000_v50, -inf }
 0x1bb   :  { %v2188_v23 = vmax.f32 %v2186_v63, %v2187_v21  ;;  %2218 = vadd.xlane.f32.xlu1 %v2073_v18  ;;  %v2195_v24 = vmax.f32 %v2193_v58, %v2194_v39  ;;  %v2131_v43 = vrot.slane %v2130_v51, 2  ;;  %v2146_v17 = vmax.f32 %v4076_v22, %v4072_v44 }
 0x1bc   :  { %2280 = vmax.xlane.f32.xlu0 %v2181_v60  ;;  %v2079_v32 = vadd.f32 %v2078_v29, %v2077_v16  ;;  %v2139_v45 = vmax.f32 %v2137_v35, %v2138_v54  ;;  %v2085_v5 = vrot.slane %v2084_v49, 4  ;;  %v2072_v36 = vadd.f32 %v2071_v15, %v2070_v31 }
 0x1bd   :  { %v4080_v11 = vadd.f32 %v2188_v23, %v2124_v28  ;;  %v2196_v10 = vrot.slane %v2195_v24, 1  ;;  %v2132_v38 = vmax.f32 %v2130_v51, %v2131_v43  ;;  %v2147_v14 = vrot.slane %v2146_v17, 4 }
 0x1be   :  { %v2080_v6 = vrot.slane %v2079_v32, 1  ;;  %v2140_v60 = vrot.slane %v2139_v45, 2  ;;  %v2086_v18 = vadd.f32 %v2085_v5, %v2084_v49  ;;  %v2091_v37 = vsel %vm438_vm0, %v3992_v46, 0.0 }
 0x1bf   :  { %v2197_v19 = vmax.f32 %v2195_v24, %v2196_v10  ;;  %2220 = vadd.xlane.f32.xlu1 %v2074_v12  ;;  %v2133_v50 = vrot.slane %v2132_v38, 1  ;;  %v4086_v33 = vsel %vm438_vm0, %v3996_v62, 0.0  ;;  %v2148_v31 = vmax.f32 %v2146_v17, %v2147_v14 }
 0x1c0   :  { %2284 = vmax.xlane.f32.xlu0 %v2190_v42  ;;  %v2081_v3 = vadd.f32 %v2080_v6, %v2079_v32  ;;  %v2141_v28 = vmax.f32 %v2139_v45, %v2140_v60  ;;  %v2087_v13 = vrot.slane %v2086_v18, 2  ;;  %v2093_v57 = vadd.f32 %v4086_v33, %v2091_v37 }
 0x1c1   :  { %v2205_v63 = vadd.f32 %v2197_v19, %v2125_v56  ;;  %v2134_v58 = vmax.f32 %v2132_v38, %v2133_v50  ;;  %v2149_v12 = vrot.slane %v2148_v31, 2  ;;  %v3375_v15 = vmov 29  }
 0x1c2   :  { %v2121_v16 = vmul.f32 0.0625, %v2081_v3  ;;  %v2142_v35 = vrot.slane %v2141_v28, 1  ;;  %v2088_v42 = vadd.f32 %v2087_v13, %v2086_v18  ;;  %3226 = vset.pattern.permute.xlu1 %v3375_v15  ;;  %v2169_v46 = vrot.slane %v4028_v52, 1  ;;  %v4108_v3 = vld [vmem:[#allocation5] sm:$0xff] }
 0x1c3   :  { %v2176_v21 = vrot.slane %v4033_v1, 2  ;;  %2254 = vmax.xlane.f32.xlu1 %v4044_v4  ;;  %v2198_v62 = vadd.f32 %v2134_v58, %v4026_v0  ;;  %v2094_v39 = vrot.slane %v2093_v57, 4  ;;  %v2150_v54 = vmax.f32 %v2148_v31, %v2149_v12 }
 0x1c4   :  { %v2201_v56 = vadd.f32 %v4023_v41, %v2121_v16  ;;  %v2143_v51 = vmax.f32 %v2141_v28, %v2142_v35  ;;  %v2089_v29 = vrot.slane %v2088_v42, 1  ;;  %v2120_v23 = vmul.f32 0.0625, %v2072_v36 }
 0x1c5   :  { %v2095_v49 = vadd.f32 %v2094_v39, %v2093_v57  ;;  %v2151_v32 = vrot.slane %v2150_v54, 1  ;;  %v2177_v45 = vmax.f32 %v4033_v1, %v2176_v21  ;;  %v2170_v4 = vmax.f32 %v4028_v52, %v2169_v46 }
 0x1c6   :  { %v2199_v24 = vadd.f32 %v2143_v51, %v4052_v34  ;;  %v2090_v43 = vadd.f32 %v2089_v29, %v2088_v42  ;;  %v3376_v13 = vmov 13  }
 0x1c7   :  { %2256 = vmax.xlane.f32.xlu1 %v4048_v20  ;;  %v2096_v5 = vrot.slane %v2095_v49, 2  ;;  %v2152_v41 = vmax.f32 %v2150_v54, %v2151_v32  ;;  %v2178_v60 = vrot.slane %v2177_v45, 1  ;;  %v3383_v54 = vmov 7  }
 0x1c8   :  { %v2310_v0 = vsel %vm704_vm1, %v2199_v24, %v2198_v62  ;;  %v2122_v17 = vmul.f32 0.0625, %v2090_v43 }
 0x1c9   :  { %v2097_v10 = vadd.f32 %v2096_v5, %v2095_v49  ;;  %v2200_v6 = vadd.f32 %v2152_v41, %v2120_v23  ;;  %v2179_v14 = vmax.f32 %v2177_v45, %v2178_v60 }
 0x1ca   :  { %v2202_v38 = vadd.f32 %v2170_v4, %v2122_v17  ;;  %v3384_v4 = vmov 8  }
 0x1cb   :  { %2260 = vmax.xlane.f32.xlu1 %v4056_v55  ;;  %v2098_v34 = vrot.slane %v2097_v10, 1  ;;  %v2311_v36 = vsel %vm706_vm2, %v2200_v6, %v2310_v0 }
 0x1cc   :  { %v2312_v1 = vsel %vm708_vm3, %v2201_v56, %v2311_v36 }
 0x1cd   :  { %v2099_v18 = vadd.f32 %v2098_v34, %v2097_v10  ;;  %v2313_v20 = vsel %vm710_vm4, %v2202_v38, %v2312_v1 }
 0x1cf   :  { %2222 = vadd.xlane.f32.xlu1 %v4062_v25  ;;  %v2123_v52 = vmul.f32 0.0625, %v2099_v18  ;;  %v3377_v25 = vmov 16  }
 0x1d1   :  { %v2203_v19 = vadd.f32 %v2179_v14, %v2123_v52 }
 0x1d3   :  { %2224 = vadd.xlane.f32.xlu1 %v4066_v27  ;;  %v2314_v50 = vsel %vm712_vm5, %v2203_v19, %v2313_v20  ;;  %v3378_v27 = vmov 19  }
 0x1d4   :  { %v2315_v55 = vsel %vm714_vm6, %v4080_v11, %v2314_v50 }
 0x1d5   :  { %v4112_v28 = vsel %vm716_vm7, %v2205_v63, %v2315_v55 }
 0x1d6   :  { %836 = vperm.xlu0 %3227, %v4108_v3  }
 0x1d7   :  { %2262 = vmax.xlane.f32.xlu1 %v4076_v22  ;;  %v3379_v22 = vmov 21  }
 0x1da   :  { %3236 = vset.pattern.permute.xlu0 %v3376_v13 }
 0x1db   :  { %935 = vperm.xlu0 %3236, %v4108_v3   ;;  %2264 = vmax.xlane.f32.xlu1 %v4072_v44  ;;  %v3380_v44 = vmov 24  }
 0x1df   :  { %3239 = vset.pattern.permute.xlu0 %v3377_v25  ;;  %2226 = vadd.xlane.f32.xlu1 %v2091_v37 }
 0x1e0   :  { %983 = vperm.xlu0 %3239, %v4108_v3  }
 0x1e3   :  { %2228 = vadd.xlane.f32.xlu1 %v4086_v33  ;;  %v3381_v33 = vmov 27  }
 0x1e4   :  { %3242 = vset.pattern.permute.xlu0 %v3378_v27 }
 0x1e5   :  { %1031 = vperm.xlu0 %3242, %v4108_v3  }
 0x1e7   :  { %2266 = vmax.xlane.f32.xlu1 %v3927_v53 }
 0x1e9   :  { %3245 = vset.pattern.permute.xlu0 %v3379_v22  ;;  %v601_v11 = vpop.xlane.xlu0 %600 }
 0x1ea   :  { %945 = vperm.xlu0 %3245, %v4108_v3   ;;  %v632_v0 = vmul.f32 0.0625, %v601_v11  ;;  %v3385_v11 = vmov 9  }
 0x1eb   :  { %2230 = vadd.xlane.f32.xlu1 %v3943_v40 }
 0x1ed   :  { %v605_v37 = vpop.xlane.xlu0 %604 }
 0x1ee   :  { %3248 = vset.pattern.permute.xlu0 %v3380_v44  ;;  %v634_v32 = vmul.f32 0.0625, %v605_v37 }
 0x1ef   :  { %993 = vperm.xlu0 %3248, %v4108_v3   ;;  %2270 = vmax.xlane.f32.xlu1 %v3983_v26 }
 0x1f3   :  { %3251 = vset.pattern.permute.xlu0 %v3381_v33  ;;  %2234 = vadd.xlane.f32.xlu1 %v3987_v61 }
 0x1f4   :  { %1041 = vperm.xlu0 %3251, %v4108_v3   ;;  %v603_v53 = vpop.xlane.xlu1 %602  ;;  %v607_v31 = vpop.xlane.xlu0 %606 }
 0x1f5   :  { %v635_v45 = vmul.f32 0.0625, %v607_v31  ;;  %v633_v17 = vmul.f32 0.0625, %v603_v53 }
 0x1f7   :  { %2274 = vmax.xlane.f32.xlu1 %v4004_v2 }
 0x1f8   :  { %v609_v63 = vpop.xlane.xlu1 %608  ;;  %v611_v58 = vpop.xlane.xlu0 %610 }
 0x1f9   :  { %v636_v10 = vmul.f32 0.0625, %v609_v63  ;;  %v637_v38 = vmul.f32 0.0625, %v611_v58 }
 0x1fb   :  { %2278 = vmax.xlane.f32.xlu1 %v4021_v30  ;;  %v3382_v30 = vmov 6  }
 0x1fc   :  { %v613_v40 = vpop.xlane.xlu1 %612  ;;  %v615_v57 = vpop.xlane.xlu0 %614 }
 0x1fd   :  { %v638_v1 = vmul.f32 0.0625, %v613_v40  ;;  %v639_v18 = vmul.f32 0.0625, %v615_v57 }
 0x1ff   :  { %2282 = vmax.xlane.f32.xlu1 %v4037_v7  ;;  %v4777_v7 = vlaneseq }
 0x200   :  { %v617_v26 = vpop.xlane.xlu1 %616  ;;  %v619_v16 = vpop.xlane.xlu0 %618 }
 0x201   :  { %v736_v56 = vand.u32 127, %v4777_v7  ;;  %v640_v20 = vmul.f32 0.0625, %v617_v26  ;;  %v641_v14 = vmul.f32 0.0625, %v619_v16 }
 0x203   :  { %v737_v49 = vadd.s32 4294967280, %v736_v56  ;;  %v742_v23 = vadd.s32 4294967272, %v736_v56 }
 0x204   :  { %v621_v35 = vpop.xlane.xlu1 %620  ;;  %v623_v42 = vpop.xlane.xlu0 %622 }
 0x205   :  { %v4139_v5 = vsub.s32 %v737_v49, %v3443_v8  ;;  %v4142_v41 = vsub.s32 %v742_v23, %v3443_v8  ;;  %v642_v52 = vmul.f32 0.0625, %v621_v35  ;;  %v643_v19 = vmul.f32 0.0625, %v623_v42 }
 0x208   :  { %v625_v12 = vpop.xlane.xlu1 %624  ;;  %v627_v61 = vpop.xlane.xlu0 %626 }
 0x209   :  { %v644_v57 = vmul.f32 0.0625, %v625_v12  ;;  %v645_v26 = vmul.f32 0.0625, %v627_v61  ;;  %v3386_v61 = vmov 10  }
 0x20c   :  { %v4130_v15 = vpop.xlane.xlu1 %628  ;;  %v4132_v46 = vpop.xlane.xlu0 %630 }
 0x20d   :  { %v646_v23 = vmul.f32 0.0625, %v4130_v15 }
 0x210   :  { %v649_v21 = vpop.xlane.xlu1 %648  ;;  %831 = vperm.xlu1 %3226, %v4108_v3   ;;  %v651_v2 = vpop.xlane.xlu0 %650 }
 0x211   :  { %v680_v13 = vadd.f32 %v649_v21, %v632_v0  ;;  %v681_v25 = vadd.f32 %v651_v2, %v633_v17 }
 0x213   :  { %v741_v42 = vrot.slane %v680_v13, %v4139_v5  ;;  %v746_v21 = vrot.slane %v681_v25, %v4142_v41 }
 0x214   :  { %v653_v62 = vpop.xlane.xlu1 %652  ;;  %3228 = vset.pattern.permute.xlu1 %v3382_v30  ;;  %v655_v39 = vpop.xlane.xlu0 %654 }
 0x215   :  { %846 = vperm.xlu1 %3228, %v4108_v3   ;;  %v682_v6 = vadd.f32 %v653_v62, %v634_v32  ;;  %v683_v60 = vadd.f32 %v655_v39, %v635_v45  ;;  %v748_v32 = vsel %vm747_vm8, %v746_v21, %v741_v42  ;;  %v3395_v21 = vmov 31  }
 0x217   :  { %v752_v44 = vrot.slane %v682_v6, %v4139_v5  ;;  %v756_v37 = vrot.slane %v683_v60, %v4142_v41 }
 0x218   :  { %v657_v51 = vpop.xlane.xlu1 %656  ;;  %v659_v29 = vpop.xlane.xlu0 %658 }
 0x219   :  { %3229 = vset.pattern.permute.xlu1 %v3383_v54  ;;  %v684_v50 = vadd.f32 %v657_v51, %v636_v10  ;;  %v685_v55 = vadd.f32 %v659_v29, %v637_v38  ;;  %v757_v30 = vsel %vm747_vm8, %v756_v37, %v752_v44  ;;  %v3389_v44 = vmov 30  }
 0x21a   :  { %856 = vperm.xlu1 %3229, %v4108_v3   ;;  %v812_v17 = vsel %vm704_vm1, %v757_v30, %v748_v32 }
 0x21b   :  { %v761_v16 = vrot.slane %v684_v50, %v4139_v5  ;;  %v765_v35 = vrot.slane %v685_v55, %v4142_v41 }
 0x21c   :  { %v661_v24 = vpop.xlane.xlu1 %660  ;;  %v663_v43 = vpop.xlane.xlu0 %662 }
 0x21d   :  { %v686_v27 = vadd.f32 %v661_v24, %v638_v1  ;;  %v687_v22 = vadd.f32 %v663_v43, %v639_v18  ;;  %v647_v24 = vmul.f32 0.0625, %v4132_v46  ;;  %v766_v43 = vsel %vm747_vm8, %v765_v35, %v761_v16 }
 0x21e   :  { %3230 = vset.pattern.permute.xlu1 %v3384_v4  ;;  %v813_v15 = vsel %vm706_vm2, %v766_v43, %v812_v17  ;;  %v3394_v16 = vmov 20  }
 0x21f   :  { %866 = vperm.xlu1 %3230, %v4108_v3   ;;  %v770_v2 = vrot.slane %v686_v27, %v4139_v5  ;;  %v774_v62 = vrot.slane %v687_v22, %v4142_v41  ;;  %v3388_v27 = vmov 12  }
 0x220   :  { %v665_v34 = vpop.xlane.xlu1 %664  ;;  %v667_v36 = vpop.xlane.xlu0 %666 }
 0x221   :  { %v688_v33 = vadd.f32 %v665_v34, %v640_v20  ;;  %v689_v53 = vadd.f32 %v667_v36, %v641_v14  ;;  %v775_v45 = vsel %vm747_vm8, %v774_v62, %v770_v2  ;;  %v3387_v36 = vmov 11  }
 0x222   :  { %v814_v1 = vsel %vm708_vm3, %v775_v45, %v813_v15  ;;  %v3396_v62 = vmov 22  }
 0x223   :  { %3231 = vset.pattern.permute.xlu1 %v3385_v11  ;;  %v779_v39 = vrot.slane %v688_v33, %v4139_v5  ;;  %v783_v7 = vrot.slane %v689_v53, %v4142_v41  ;;  %v3390_v33 = vmov 14  }
 0x224   :  { %v669_v31 = vpop.xlane.xlu1 %668  ;;  %876 = vperm.xlu1 %3231, %v4108_v3   ;;  %v671_v63 = vpop.xlane.xlu0 %670 }
 0x225   :  { %v690_v58 = vadd.f32 %v669_v31, %v642_v52  ;;  %v691_v40 = vadd.f32 %v671_v63, %v643_v19  ;;  %v784_v10 = vsel %vm747_vm8, %v783_v7, %v779_v39  ;;  %v3391_v63 = vmov 15  }
 0x226   :  { %v815_v20 = vsel %vm710_vm4, %v784_v10, %v814_v1  ;;  %v3397_v7 = vmov 23  }
 0x227   :  { %v788_v51 = vrot.slane %v690_v58, %v4139_v5  ;;  %v792_v29 = vrot.slane %v691_v40, %v4142_v41  ;;  %v3392_v58 = vmov 17  }
 0x228   :  { %v673_v12 = vpop.xlane.xlu1 %672  ;;  %3232 = vset.pattern.permute.xlu1 %v3386_v61  ;;  %v675_v56 = vpop.xlane.xlu0 %674 }
 0x229   :  { %v692_v54 = vadd.f32 %v673_v12, %v644_v57  ;;  %v693_v49 = vadd.f32 %v675_v56, %v645_v26  ;;  %886 = vperm.xlu1 %3232, %v4108_v3   ;;  %v793_v46 = vsel %vm747_vm8, %v792_v29, %v788_v51  ;;  %v3393_v57 = vmov 18  }
 0x22a   :  { %v816_v19 = vsel %vm712_vm5, %v793_v46, %v815_v20  ;;  %v3398_v56 = vmov 25  }
 0x22b   :  { %v797_v4 = vrot.slane %v692_v54, %v4139_v5  ;;  %v801_v0 = vrot.slane %v693_v49, %v4142_v41  ;;  %v3399_v49 = vmov 26  }
 0x22c   :  { %v679_v38 = vpop.xlane.xlu1 %678  ;;  %v677_v6 = vpop.xlane.xlu0 %676 }
 0x22d   :  { %v695_v60 = vadd.f32 %v679_v38, %v647_v24  ;;  %v694_v34 = vadd.f32 %v677_v6, %v646_v23  ;;  %3233 = vset.pattern.permute.xlu1 %v3387_v36  ;;  %v802_v18 = vsel %vm747_vm8, %v801_v0, %v797_v4 }
 0x22e   :  { %896 = vperm.xlu1 %3233, %v4108_v3   ;;  %v817_v55 = vsel %vm714_vm6, %v802_v18, %v816_v19 }
 0x22f   :  { %v810_v14 = vrot.slane %v695_v60, %v4142_v41  ;;  %v806_v52 = vrot.slane %v694_v34, %v4139_v5 }
 0x230   :  { %v4178_v50 = vpop.xlane.xlu1 %2206 }
 0x231   :  { %v811_v13 = vsel %vm747_vm8, %v810_v14, %v806_v52  ;;  %v2259_v39 = vpop.xlane.xlu0 %2258  ;;  %v2238_v6 = vmul.f32 0.0625, %v4178_v50 }
 0x232   :  { %v818_v25 = vsel %vm716_vm7, %v811_v13, %v817_v55  ;;  %3234 = vset.pattern.permute.xlu1 %v3388_v27 }
 0x233   :  { %v4185_v22 = vsel %vm438_vm0, %v3938_v48, %v818_v25  ;;  %911 = vperm.xlu1 %3234, %v4108_v3  }
 0x234   :  { %v2209_v11 = vpop.xlane.xlu1 %2208 }
 0x235   :  { %v2269_v61 = vpop.xlane.xlu0 %2268  ;;  %v2239_v15 = vmul.f32 0.0625, %v2209_v11 }
 0x237   :  { %3235 = vset.pattern.permute.xlu1 %v3389_v44 }
 0x238   :  { %920 = vperm.xlu1 %3235, %v4108_v3   ;;  %v2211_v37 = vpop.xlane.xlu1 %2210 }
 0x239   :  { %v2233_v54 = vpop.xlane.xlu0 %2232  ;;  %v2240_v17 = vmul.f32 0.0625, %v2211_v37 }
 0x23a   :  { %v2251_v11 = vmul.f32 0.0625, %v2233_v54 }
 0x23b   :  { %v2288_v46 = vadd.f32 %v2259_v39, %v2240_v17 }
 0x23c   :  { %3237 = vset.pattern.permute.xlu1 %v3390_v33  ;;  %v2213_v53 = vpop.xlane.xlu1 %2212 }
 0x23d   :  { %951 = vperm.xlu1 %3237, %v4108_v3   ;;  %v2273_v24 = vpop.xlane.xlu0 %2272  ;;  %v2241_v38 = vmul.f32 0.0625, %v2213_v53 }
 0x240   :  { %v2215_v31 = vpop.xlane.xlu1 %2214 }
 0x241   :  { %3238 = vset.pattern.permute.xlu1 %v3391_v63  ;;  %v2237_v45 = vpop.xlane.xlu0 %2236  ;;  %v2242_v36 = vmul.f32 0.0625, %v2215_v31 }
 0x242   :  { %967 = vperm.xlu1 %3238, %v4108_v3  }
 0x244   :  { %v2217_v48 = vpop.xlane.xlu1 %2216 }
 0x245   :  { %v2277_v0 = vpop.xlane.xlu0 %2276  ;;  %v2243_v60 = vmul.f32 0.0625, %v2217_v48  ;;  %v2346_v48 = vrot.slane %v2288_v46, %v4139_v5 }
 0x246   :  { %3240 = vset.pattern.permute.xlu1 %v3392_v58 }
 0x247   :  { %999 = vperm.xlu1 %3240, %v4108_v3  }
 0x248   :  { %v2219_v40 = vpop.xlane.xlu1 %2218 }
 0x249   :  { %v2244_v1 = vmul.f32 0.0625, %v2219_v40  ;;  %v2281_v18 = vpop.xlane.xlu0 %2280 }
 0x24b   :  { %3241 = vset.pattern.permute.xlu1 %v3393_v57 }
 0x24c   :  { %1015 = vperm.xlu1 %3241, %v4108_v3   ;;  %v2221_v26 = vpop.xlane.xlu1 %2220 }
 0x250   :  { %3243 = vset.pattern.permute.xlu1 %v3394_v16  ;;  %v2255_v35 = vpop.xlane.xlu1 %2254  ;;  %v2285_v16 = vpop.xlane.xlu0 %2284 }
 0x251   :  { %925 = vperm.xlu1 %3243, %v4108_v3   ;;  %v2286_v44 = vadd.f32 %v2255_v35, %v2238_v6 }
 0x254   :  { %v2257_v42 = vpop.xlane.xlu1 %2256 }
 0x255   :  { %3244 = vset.pattern.permute.xlu1 %v3395_v21  ;;  %v2287_v14 = vadd.f32 %v2257_v42, %v2239_v15 }
 0x256   :  { %930 = vperm.xlu1 %3244, %v4108_v3  }
 0x257   :  { %v2341_v58 = vrot.slane %v2287_v14, %v4142_v41 }
 0x258   :  { %v2261_v2 = vpop.xlane.xlu1 %2260 }
 0x259   :  { %v2289_v20 = vadd.f32 %v2261_v2, %v2241_v38  ;;  %v2299_v2 = vadd.f32 %v2281_v18, %v2251_v11 }
 0x25a   :  { %3246 = vset.pattern.permute.xlu1 %v3396_v62  ;;  %v2337_v62 = vrot.slane %v2286_v44, %v4139_v5 }
 0x25b   :  { %961 = vperm.xlu1 %3246, %v4108_v3   ;;  %v2350_v63 = vrot.slane %v2289_v20, %v4142_v41 }
 0x25c   :  { %v2223_v30 = vpop.xlane.xlu1 %2222  ;;  %v2342_v54 = vsel %vm747_vm8, %v2341_v58, %v2337_v62 }
 0x25d   :  { %v2246_v52 = vmul.f32 0.0625, %v2223_v30 }
 0x25f   :  { %3247 = vset.pattern.permute.xlu1 %v3397_v7 }
 0x260   :  { %977 = vperm.xlu1 %3247, %v4108_v3   ;;  %v2225_v12 = vpop.xlane.xlu1 %2224 }
 0x261   :  { %v2247_v19 = vmul.f32 0.0625, %v2225_v12 }
 0x263   :  { %v2295_v40 = vadd.f32 %v2273_v24, %v2247_v19 }
 0x264   :  { %3249 = vset.pattern.permute.xlu1 %v3398_v56  ;;  %v2263_v51 = vpop.xlane.xlu1 %2262 }
 0x265   :  { %1009 = vperm.xlu1 %3249, %v4108_v3   ;;  %v2290_v37 = vadd.f32 %v2263_v51, %v2242_v36 }
 0x267   :  { %v2355_v30 = vrot.slane %v2290_v37, %v4139_v5  ;;  %v828_v37 = vrot.slane %v4185_v22, %v3446_v9 }
 0x268   :  { %v2265_v29 = vpop.xlane.xlu1 %2264 }
 0x269   :  { %3250 = vset.pattern.permute.xlu1 %v3399_v49  ;;  %v2291_v55 = vadd.f32 %v2265_v29, %v2243_v60  ;;  %v2377_v49 = vrot.slane %v2295_v40, %v4142_v41 }
 0x26a   :  { %1025 = vperm.xlu1 %3250, %v4108_v3   ;;  %v2245_v3 = vmul.f32 0.0625, %v2221_v26  ;;  %v2253_v26 = vmul.f32 0.0625, %v2237_v45 }
 0x26b   :  { %v2359_v57 = vrot.slane %v2291_v55, %v4142_v41 }
 0x26c   :  { %v2227_v23 = vpop.xlane.xlu1 %2226  ;;  %v2293_v53 = vadd.f32 %v2269_v61, %v2245_v3  ;;  %v2351_v61 = vsel %vm747_vm8, %v2350_v63, %v2346_v48  ;;  %v2301_v29 = vadd.f32 %v2285_v16, %v2253_v26  ;;  %v4781_v16 = vld [vmem:[#allocation13_spill] sm:$0xff] }
 0x26d   :  { %v2248_v13 = vmul.f32 0.0625, %v2227_v23  ;;  %v2360_v23 = vsel %vm747_vm8, %v2359_v57, %v2355_v30  ;;  %v4782_v30 = vld [vmem:[#allocation14_spill] sm:$0xff] }
 0x26e   :  { %v2368_v12 = vrot.slane %v2293_v53, %v4142_v41  ;;  %v4780_v53 = vld [vmem:[#allocation12_spill] sm:$0xff] }
 0x26f   :  { %v852_v57 = vrot.slane %v4185_v22, %v4780_v53 }
 0x270   :  { %v2229_v43 = vpop.xlane.xlu1 %2228 }
 0x271   :  { %v2249_v25 = vmul.f32 0.0625, %v2229_v43 }
 0x273   :  { %v2297_v42 = vadd.f32 %v2277_v0, %v2249_v25  ;;  %v2406_v0 = vsel %vm704_vm1, %v2351_v61, %v2342_v54 }
 0x274   :  { %v2267_v32 = vpop.xlane.xlu1 %2266  ;;  %v2407_v38 = vsel %vm706_vm2, %v2360_v23, %v2406_v0 }
 0x275   :  { %v2292_v27 = vadd.f32 %v2267_v32, %v2244_v1  ;;  %v2386_v24 = vrot.slane %v2297_v42, %v4142_v41  ;;  %v862_v42 = vrot.slane %v4185_v22, %v4781_v16 }
 0x277   :  { %v2364_v35 = vrot.slane %v2292_v27, %v4139_v5  ;;  %v4779_v27 = vld [vmem:[#allocation11_spill] sm:$0xff] }
 0x278   :  { %v2231_v4 = vpop.xlane.xlu1 %2230  ;;  %v842_v58 = vrot.slane %v4185_v22, %v4779_v27 }
 0x279   :  { %v2250_v21 = vmul.f32 0.0625, %v2231_v4  ;;  %v2369_v43 = vsel %vm747_vm8, %v2368_v12, %v2364_v35  ;;  %v2395_v4 = vrot.slane %v2299_v2, %v4142_v41 }
 0x27a   :  { %v2408_v46 = vsel %vm708_vm3, %v2369_v43, %v2407_v38 }
 0x27c   :  { %v2271_v10 = vpop.xlane.xlu1 %2270 }
 0x27d   :  { %v2294_v33 = vadd.f32 %v2271_v10, %v2246_v52 }
 0x27f   :  { %v2373_v39 = vrot.slane %v2294_v33, %v4139_v5 }
 0x280   :  { %v2235_v34 = vpop.xlane.xlu1 %2234 }
 0x281   :  { %v2252_v32 = vmul.f32 0.0625, %v2235_v34  ;;  %v2378_v17 = vsel %vm747_vm8, %v2377_v49, %v2373_v39  ;;  %v2404_v34 = vrot.slane %v2301_v29, %v4142_v41  ;;  %v4778_v41 = vld [vmem:[#allocation22_spill] sm:$0xff]  ;;  %v872_v39 = vrot.slane %v4185_v22, %v4782_v30  ;;  %v4783_v29 = vld [vmem:[#allocation15_spill] sm:$0xff] }
 0x282   :  { %v2409_v36 = vsel %vm710_vm4, %v2378_v17, %v2408_v46  ;;  %v882_v54 = vrot.slane %v4185_v22, %v4783_v29 }
 0x284   :  { %v2275_v50 = vpop.xlane.xlu1 %2274 }
 0x285   :  { %v2296_v31 = vadd.f32 %v2275_v50, %v2248_v13  ;;  %v837_v50 = vpop.permute.xlu0 %836 }
 0x286   :  { %v843_v35 = vmul.f32 %v842_v58, %v837_v50 }
 0x287   :  { %v2382_v56 = vrot.slane %v2296_v31, %v4139_v5  ;;  %v829_v31 = vmul.f32 %v828_v37, %v4778_v41 }
 0x288   :  { %v2279_v7 = vpop.xlane.xlu1 %2278 }
 0x289   :  { %v2298_v51 = vadd.f32 %v2279_v7, %v2250_v21  ;;  %v2387_v6 = vsel %vm747_vm8, %v2386_v24, %v2382_v56 }
 0x28a   :  { %v2410_v18 = vsel %vm712_vm5, %v2387_v6, %v2409_v36 }
 0x28b   :  { %v2391_v45 = vrot.slane %v2298_v51, %v4139_v5 }
 0x28c   :  { %v2283_v10 = vpop.xlane.xlu1 %2282 }
 0x28d   :  { %v2300_v15 = vadd.f32 %v2283_v10, %v2252_v32  ;;  %v2396_v60 = vsel %vm747_vm8, %v2395_v4, %v2391_v45  ;;  %v4784_v45 = vld [vmem:[#allocation16_spill] sm:$0xff] }
 0x28e   :  { %v2411_v20 = vsel %vm714_vm6, %v2396_v60, %v2410_v18  ;;  %v892_v4 = vrot.slane %v4185_v22, %v4784_v45  ;;  %v4785_v18 = vld [vmem:[#allocation17_spill] sm:$0xff] }
 0x28f   :  { %v2400_v1 = vrot.slane %v2300_v15, %v4139_v5 }
 0x290   :  { %v832_v3 = vpop.permute.xlu1 %831 }
 0x291   :  { %v2405_v14 = vsel %vm747_vm8, %v2404_v34, %v2400_v1  ;;  %v834_v40 = vadd.f32 %v832_v3, %v829_v31 }
 0x292   :  { %v2412_v52 = vsel %vm716_vm7, %v2405_v14, %v2411_v20 }
 0x293   :  { %v2414_v19 = vsel %vm438_vm0, %v4112_v28, %v2412_v52  ;;  %v844_v12 = vadd.f32 %v843_v35, %v834_v40 }
 0x294   :  { %v2418_v55 = vrot.slane %v2414_v19, %v3446_v9  ;;  %v847_v13 = vpop.permute.xlu1 %846  ;;  %v2424_v44 = vrot.slane %v2414_v19, %v4779_v27  ;;  %v2430_v63 = vrot.slane %v2414_v19, %v4780_v53  ;;  %v2436_v62 = vrot.slane %v2414_v19, %v4781_v16 }
 0x295   :  { %v853_v21 = vmul.f32 %v852_v57, %v847_v13  ;;  %v2442_v51 = vrot.slane %v2414_v19, %v4782_v30  ;;  %v2448_v49 = vrot.slane %v2414_v19, %v4783_v29  ;;  %v2454_v6 = vrot.slane %v2414_v19, %v4784_v45 }
 0x296   :  { %v2419_v25 = vmul.f32 %v2418_v55, %v4778_v41  ;;  %v2425_v11 = vmul.f32 %v2424_v44, %v837_v50  ;;  %v2431_v26 = vmul.f32 %v2430_v63, %v847_v13  ;;  %v2460_v20 = vrot.slane %v2414_v19, %v4785_v18 }
 0x297   :  { %v854_v23 = vadd.f32 %v853_v21, %v844_v12 }
 0x298   :  { %v2420_v33 = vadd.f32 %v2419_v25, %v832_v3  ;;  %v902_v3 = vrot.slane %v4185_v22, %v4785_v18 }
 0x299   :  { %v857_v5 = vpop.permute.xlu1 %856 }
 0x29a   :  { %v2426_v48 = vadd.f32 %v2425_v11, %v2420_v33  ;;  %v863_v61 = vmul.f32 %v862_v42, %v857_v5  ;;  %v2437_v56 = vmul.f32 %v2436_v62, %v857_v5 }
 0x29c   :  { %v2432_v2 = vadd.f32 %v2431_v26, %v2426_v48  ;;  %v864_v0 = vadd.f32 %v863_v61, %v854_v23  ;;  %v936_v26 = vpop.permute.xlu0 %935 }
 0x29e   :  { %v867_v28 = vpop.permute.xlu1 %866  ;;  %v2438_v24 = vadd.f32 %v2437_v56, %v2432_v2 }
 0x29f   :  { %v873_v43 = vmul.f32 %v872_v39, %v867_v28  ;;  %v2443_v32 = vmul.f32 %v2442_v51, %v867_v28 }
 0x2a1   :  { %v874_v15 = vadd.f32 %v873_v43, %v864_v0  ;;  %v2444_v46 = vadd.f32 %v2443_v32, %v2438_v24 }
 0x2a3   :  { %v877_v7 = vpop.permute.xlu1 %876 }
 0x2a4   :  { %v883_v17 = vmul.f32 %v882_v54, %v877_v7  ;;  %v2449_v10 = vmul.f32 %v2448_v49, %v877_v7  ;;  %v984_v49 = vpop.permute.xlu0 %983 }
 0x2a6   :  { %v884_v36 = vadd.f32 %v883_v17, %v874_v15  ;;  %v2450_v1 = vadd.f32 %v2449_v10, %v2444_v46 }
 0x2a8   :  { %v887_v38 = vpop.permute.xlu1 %886 }
 0x2a9   :  { %v893_v60 = vmul.f32 %v892_v4, %v887_v38  ;;  %v2455_v34 = vmul.f32 %v2454_v6, %v887_v38 }
 0x2ab   :  { %v894_v52 = vadd.f32 %v893_v60, %v884_v36  ;;  %v2456_v55 = vadd.f32 %v2455_v34, %v2450_v1  ;;  %v4285_v34 = vpop.permute.xlu0 %1031 }
 0x2ad   :  { %v897_v14 = vpop.permute.xlu1 %896 }
 0x2ae   :  { %v903_v13 = vmul.f32 %v902_v3, %v897_v14  ;;  %v2461_v41 = vmul.f32 %v2460_v20, %v897_v14 }
 0x2b0   :  { %v904_v25 = vadd.f32 %v903_v13, %v894_v52  ;;  %v2462_v44 = vadd.f32 %v2461_v41, %v2456_v55 }
 0x2b2   :  { %v905_v5 = vadd.f32 3.0, %v904_v25  ;;  %v912_v37 = vpop.permute.xlu1 %911  ;;  %v2463_v50 = vadd.f32 3.0, %v2462_v44 }
 0x2b4   :  { %v906_v33 = vmax.f32 %v905_v5, 0.0  ;;  %v2464_v48 = vmax.f32 %v2463_v50, 0.0 }
 0x2b6   :  { %v907_v11 = vmin.f32 %v906_v33, 6.0  ;;  %v2465_v58 = vmin.f32 %v2464_v48, 6.0 }
 0x2b7   :  { %v921_v63 = vpop.permute.xlu1 %920 }
 0x2b8   :  { %v908_v31 = vmul.f32 %v907_v11, %v904_v25  ;;  %v2466_v42 = vmul.f32 %v2465_v58, %v2462_v44  ;;  %v946_v44 = vpop.permute.xlu0 %945 }
 0x2ba   :  { %v909_v28 = vmul.f32 0.16666667, %v908_v31  ;;  %v4268_v56 = vmul.f32 0.16666667, %v2466_v42 }
 0x2bc   :  { %v952_v22 = vpop.permute.xlu1 %951  ;;  %v917_v19 = vrot.slane %v909_v28, %v3446_v9  ;;  %v941_v40 = vrot.slane %v909_v28, %v4779_v27  ;;  %v957_v2 = vrot.slane %v909_v28, %v4780_v53  ;;  %v4263_v39 = vrot.slane %v909_v28, %v4782_v30 }
 0x2bd   :  { %v4266_v61 = vrot.slane %v909_v28, %v4781_v16  ;;  %v4272_v24 = vrot.slane %v909_v28, %v4783_v29  ;;  %v2471_v4 = vrot.slane %v4268_v56, %v3446_v9  ;;  %v4279_v10 = vrot.slane %v909_v28, %v4785_v18 }
 0x2be   :  { %v918_v57 = vmul.f32 %v917_v19, %v912_v37  ;;  %v942_v35 = vmul.f32 %v941_v40, %v936_v26  ;;  %v958_v12 = vmul.f32 %v957_v2, %v952_v22  ;;  %v990_v43 = vmul.f32 %v4263_v39, %v984_v49 }
 0x2bf   :  { %v4282_v38 = vrot.slane %v909_v28, %v4784_v45  ;;  %v2472_v15 = vmul.f32 %v2471_v4, %v912_v37  ;;  %v1038_v36 = vmul.f32 %v4279_v10, %v4285_v34  ;;  %v2479_v1 = vrot.slane %v4268_v56, %v4779_v27 }
 0x2c0   :  { %v923_v21 = vadd.f32 %v921_v63, %v918_v57  ;;  %v2487_v13 = vrot.slane %v4268_v56, %v4780_v53  ;;  %v948_v50 = vmul.f32 %v946_v44, %v941_v40  ;;  %v2495_v57 = vrot.slane %v4268_v56, %v4781_v16 }
 0x2c1   :  { %v968_v62 = vpop.permute.xlu1 %967  ;;  %v2473_v20 = vadd.f32 %v2472_v15, %v921_v63  ;;  %v2480_v55 = vmul.f32 %v2479_v1, %v936_v26  ;;  %v2482_v11 = vmul.f32 %v2479_v1, %v946_v44 }
 0x2c2   :  { %v943_v7 = vadd.f32 %v942_v35, %v923_v21  ;;  %v974_v54 = vmul.f32 %v4266_v61, %v968_v62  ;;  %v2488_v31 = vmul.f32 %v2487_v13, %v952_v22  ;;  %v2496_v40 = vmul.f32 %v2495_v57, %v968_v62 }
 0x2c3   :  { %v2481_v5 = vadd.f32 %v2480_v55, %v2473_v20  ;;  %v2519_v62 = vrot.slane %v4268_v56, %v4784_v45  ;;  %v2527_v55 = vrot.slane %v4268_v56, %v4785_v18 }
 0x2c4   :  { %v959_v51 = vadd.f32 %v958_v12, %v943_v7 }
 0x2c5   :  { %v2489_v26 = vadd.f32 %v2488_v31, %v2481_v5 }
 0x2c6   :  { %v1000_v23 = vpop.permute.xlu1 %999  ;;  %v975_v32 = vadd.f32 %v974_v54, %v959_v51  ;;  %v2511_v54 = vrot.slane %v4268_v56, %v4783_v29 }
 0x2c7   :  { %v1006_v0 = vmul.f32 %v4272_v24, %v1000_v23  ;;  %v2497_v51 = vadd.f32 %v2496_v40, %v2489_v26 }
 0x2c8   :  { %v991_v17 = vadd.f32 %v990_v43, %v975_v32 }
 0x2ca   :  { %v1007_v46 = vadd.f32 %v1006_v0, %v991_v17  ;;  %v2512_v17 = vmul.f32 %v2511_v54, %v1000_v23 }
 0x2cb   :  { %v1016_v6 = vpop.permute.xlu1 %1015 }
 0x2cc   :  { %v1022_v60 = vmul.f32 %v4282_v38, %v1016_v6  ;;  %v2520_v20 = vmul.f32 %v2519_v62, %v1016_v6 }
 0x2ce   :  { %v1023_v3 = vadd.f32 %v1022_v60, %v1007_v46  ;;  %v994_v46 = vpop.permute.xlu0 %993 }
 0x2cf   :  { %v996_v1 = vmul.f32 %v994_v46, %v4263_v39 }
 0x2d0   :  { %v4291_v14 = vadd.f32 %v1038_v36, %v1023_v3  ;;  %v926_v52 = vpop.permute.xlu1 %925 }
 0x2d1   :  { %v928_v37 = vmul.f32 %v926_v52, %v917_v19  ;;  %v2474_v33 = vmul.f32 %v2471_v4, %v926_v52  ;;  %v2503_v19 = vrot.slane %v4268_v56, %v4782_v30 }
 0x2d2   :  { %v1060_v41 = vrot.slane %v4291_v14, %v4779_v27  ;;  %v1049_v25 = vrot.slane %v4291_v14, %v3446_v9  ;;  %v1071_v58 = vrot.slane %v4291_v14, %v4780_v53  ;;  %v1082_v22 = vrot.slane %v4291_v14, %v4781_v16 }
 0x2d3   :  { %v2504_v4 = vmul.f32 %v2503_v19, %v984_v49  ;;  %v1093_v0 = vrot.slane %v4291_v14, %v4782_v30  ;;  %v2506_v3 = vmul.f32 %v2503_v19, %v994_v46  ;;  %v1104_v23 = vrot.slane %v4291_v14, %v4783_v29 }
 0x2d4   :  { %1062 = vbcast.lane.b32.xlu0 %v1060_v41, 256  ;;  %1051 = vbcast.lane.b32.xlu1 %v1049_v25, 256  ;;  %v1115_v6 = vrot.slane %v4291_v14, %v4784_v45 }
 0x2d5   :  { %v931_v63 = vpop.permute.xlu1 %930 }
 0x2d6   :  { %v933_v48 = vadd.f32 %v931_v63, %v928_v37  ;;  %v2475_v28 = vadd.f32 %v2474_v33, %v931_v63 }
 0x2d8   :  { %v949_v42 = vadd.f32 %v948_v50, %v933_v48  ;;  %v2483_v35 = vadd.f32 %v2482_v11, %v2475_v28  ;;  %1073 = vbcast.lane.b32.xlu0 %v1071_v58, 256  ;;  %1055 = vbcast.lane.b32.xlu1 %v1049_v25, 264  ;;  %v2528_v50 = vmul.f32 %v2527_v55, %v4285_v34  ;;  %v1042_v11 = vpop.permute.xlu0 %1041 }
 0x2d9   :  { %v1044_v28 = vmul.f32 %v1042_v11, %v4279_v10 }
 0x2da   :  { %v962_v21 = vpop.permute.xlu1 %961 }
 0x2db   :  { %v964_v7 = vmul.f32 %v962_v21, %v957_v2  ;;  %v2490_v12 = vmul.f32 %v2487_v13, %v962_v21  ;;  %v2505_v2 = vadd.f32 %v2504_v4, %v2497_v51 }
 0x2dc   :  { %1084 = vbcast.lane.b32.xlu0 %v1082_v22, 256  ;;  %1066 = vbcast.lane.b32.xlu1 %v1060_v41, 264 }
 0x2dd   :  { %v965_v43 = vadd.f32 %v964_v7, %v949_v42  ;;  %v2491_v32 = vadd.f32 %v2490_v12, %v2483_v35  ;;  %v2513_v13 = vadd.f32 %v2512_v17, %v2505_v2 }
 0x2df   :  { %v978_v15 = vpop.permute.xlu1 %977  ;;  %v2521_v39 = vadd.f32 %v2520_v20, %v2513_v13 }
 0x2e0   :  { %v980_v60 = vmul.f32 %v978_v15, %v4266_v61  ;;  %v2498_v36 = vmul.f32 %v2495_v57, %v978_v15  ;;  %1095 = vbcast.lane.b32.xlu0 %v1093_v0, 256  ;;  %1077 = vbcast.lane.b32.xlu1 %v1071_v58, 264  ;;  %v2530_v58 = vmul.f32 %v2527_v55, %v1042_v11 }
 0x2e1   :  { %v2529_v63 = vadd.f32 %v2528_v50, %v2521_v39 }
 0x2e2   :  { %v981_v49 = vadd.f32 %v980_v60, %v965_v43  ;;  %v2499_v52 = vadd.f32 %v2498_v36, %v2491_v32 }
 0x2e3   :  { %v2535_v35 = vrot.slane %v2529_v63, %v3446_v9  ;;  %v2568_v10 = vrot.slane %v2529_v63, %v4781_v16  ;;  %v2579_v19 = vrot.slane %v2529_v63, %v4782_v30  ;;  %v2590_v40 = vrot.slane %v2529_v63, %v4783_v29 }
 0x2e4   :  { %v1010_v41 = vpop.permute.xlu1 %1009  ;;  %v997_v25 = vadd.f32 %v996_v1, %v981_v49  ;;  %v2507_v44 = vadd.f32 %v2506_v3, %v2499_v52  ;;  %1106 = vbcast.lane.b32.xlu0 %v1104_v23, 256  ;;  %1088 = vbcast.lane.b32.xlu1 %v1082_v22, 264  ;;  %v3400_v16 = vmov 1966171168  }
 0x2e5   :  { %v1012_v61 = vmul.f32 %v1010_v41, %v4272_v24  ;;  %v2514_v5 = vmul.f32 %v2511_v54, %v1010_v41  ;;  %v1126_v24 = vrot.slane %v4291_v14, %v4785_v18  ;;  %v2557_v14 = vrot.slane %v2529_v63, %v4780_v53 }
 0x2e6   :  { %v2612_v53 = vrot.slane %v2529_v63, %v4785_v18  ;;  %v1137_v21 = vunpack.c.l.s4 %v3400_v16 }
 0x2e7   :  { %v1013_v37 = vadd.f32 %v1012_v61, %v997_v25  ;;  %v2515_v33 = vadd.f32 %v2514_v5, %v2507_v44 }
 0x2e8   :  { %1117 = vbcast.lane.b32.xlu0 %v1115_v6, 256  ;;  %1099 = vbcast.lane.b32.xlu1 %v1093_v0, 264  ;;  %v1138_v22 = vunpack.c.0.s8 %v1137_v21 }
 0x2e9   :  { %v1026_v56 = vpop.permute.xlu1 %1025 }
 0x2ea   :  { %v1028_v31 = vmul.f32 %v1026_v56, %v4282_v38  ;;  %v2522_v48 = vmul.f32 %v2519_v62, %v1026_v56  ;;  %v2546_v38 = vrot.slane %v2529_v63, %v4779_v27  ;;  %v2601_v27 = vrot.slane %v2529_v63, %v4784_v45 }
 0x2eb   :  { %v4338_v30 = vsub.s32 %v1138_v22, %v3443_v8 }
 0x2ec   :  { %v1029_v57 = vadd.f32 %v1028_v31, %v1013_v37  ;;  %v2523_v26 = vadd.f32 %v2522_v48, %v2515_v33  ;;  %1128 = vbcast.lane.b32.xlu0 %v1126_v24, 256  ;;  %1110 = vbcast.lane.b32.xlu1 %v1104_v23, 264 }
 0x2ee   :  { %v1045_v42 = vadd.f32 %v1044_v28, %v1029_v57  ;;  %v4327_v34 = vadd.f32 %v2530_v58, %v2523_v26 }
 0x2f0   :  { %2537 = vbcast.lane.b32.xlu0 %v2535_v35, 256  ;;  %1121 = vbcast.lane.b32.xlu1 %v1115_v6, 264  ;;  %v1142_v29 = vrot.slane %v1045_v42, %v4338_v30  ;;  %v1135_v32 = vcombine.high %v1045_v42, %v1045_v42  ;;  %v2628_v28 = vrot.slane %v4327_v34, %v4338_v30 }
 0x2f2   :  { %v1158_v7 = vrot.slane %v1142_v29, %v4338_v30  ;;  %v1150_v12 = vcombine.high %v1142_v29, %v1142_v29  ;;  %v1149_v60 = vrot.slane %v1135_v32, %v4338_v30 }
 0x2f4   :  { %2548 = vbcast.lane.b32.xlu0 %v2546_v38, 256  ;;  %1132 = vbcast.lane.b32.xlu1 %v1126_v24, 264  ;;  %v1187_v45 = vrot.slane %v1158_v7, %v3446_v9  ;;  %v1172_v51 = vrot.slane %v1150_v12, %v4338_v30  ;;  %v1180_v0 = vcombine.high %v1158_v7, %v1158_v7 }
 0x2f5   :  { %v1165_v52 = vrot.slane %v1149_v60, %v4338_v30  ;;  %v1151_v23 = vcombine.high %v1149_v60, %v1149_v60  ;;  %v2621_v12 = vcombine.high %v4327_v34, %v4327_v34 }
 0x2f6   :  { %v1191_v4 = vrot.slane %v1172_v51, %v3446_v9  ;;  %v1195_v46 = vrot.slane %v1180_v0, %v3446_v9  ;;  %v1182_v2 = vcombine.high %v1172_v51, %v1172_v51 }
 0x2f7   :  { %v1203_v44 = vrot.slane %v1165_v52, %v3446_v9  ;;  %v1179_v61 = vrot.slane %v1151_v23, %v4338_v30  ;;  %v1181_v50 = vcombine.high %v1165_v52, %v1165_v52  ;;  %v2635_v34 = vrot.slane %v2621_v12, %v4338_v30 }
 0x2f8   :  { %2559 = vbcast.lane.b32.xlu0 %v2557_v14, 256  ;;  %2541 = vbcast.lane.b32.xlu1 %v2535_v35, 264  ;;  %v1199_v49 = vrot.slane %v1182_v2, %v3446_v9 }
 0x2f9   :  { %v1207_v33 = vrot.slane %v1179_v61, %v3446_v9  ;;  %v1211_v48 = vrot.slane %v1181_v50, %v3446_v9  ;;  %v1183_v24 = vcombine.high %v1179_v61, %v1179_v61  ;;  %v2651_v2 = vrot.slane %v2635_v34, %v4338_v30 }
 0x2fa   :  { %v2637_v60 = vcombine.high %v2635_v34, %v2635_v34 }
 0x2fb   :  { %v1215_v35 = vrot.slane %v1183_v24, %v3446_v9 }
 0x2fc   :  { %2570 = vbcast.lane.b32.xlu0 %v2568_v10, 256  ;;  %2552 = vbcast.lane.b32.xlu1 %v2546_v38, 264  ;;  %v2644_v38 = vrot.slane %v2628_v28, %v4338_v30  ;;  %v2665_v52 = vrot.slane %v2637_v60, %v4338_v30 }
 0x2fe   :  { %v2666_v51 = vcombine.high %v2644_v38, %v2644_v38 }
 0x300   :  { %2581 = vbcast.lane.b32.xlu0 %v2579_v19, 256  ;;  %2563 = vbcast.lane.b32.xlu1 %v2557_v14, 264  ;;  %v2636_v14 = vcombine.high %v2628_v28, %v2628_v28 }
 0x302   :  { %v2658_v16 = vrot.slane %v2636_v14, %v4338_v30  ;;  %v2669_v30 = vcombine.high %v2665_v52, %v2665_v52 }
 0x304   :  { %2592 = vbcast.lane.b32.xlu0 %v2590_v40, 256  ;;  %2574 = vbcast.lane.b32.xlu1 %v2568_v10, 264  ;;  %v2668_v0 = vcombine.high %v2658_v16, %v2658_v16 }
 0x308   :  { %2603 = vbcast.lane.b32.xlu0 %v2601_v27, 256  ;;  %2585 = vbcast.lane.b32.xlu1 %v2579_v19, 264 }
 0x30c   :  { %2614 = vbcast.lane.b32.xlu0 %v2612_v53, 256  ;;  %2596 = vbcast.lane.b32.xlu1 %v2590_v40, 264 }
 0x310   :  { %2607 = vbcast.lane.b32.xlu1 %v2601_v27, 264 }
 0x314   :  { %2618 = vbcast.lane.b32.xlu1 %v2612_v53, 264  ;;  %v2673_v53 = vrot.slane %v2644_v38, %v3446_v9 }
 0x346   :  { %v1052_v18 = vpop.permute.xlu1 %1051  ;;  %v1063_v54 = vpop.permute.xlu0 %1062 }
 0x347   :  { %v1224_v43 = vmul.f32 %v1187_v45, %v1052_v18  ;;  %v1226_v62 = vmul.f32 %v1191_v4, %v1063_v54 }
 0x349   :  { %1256 = vrot.lane.b32.xlu0 %v1224_v43, %s3366_s4 }
 0x34a   :  { %v1056_v8 = vpop.permute.xlu1 %1055  ;;  %v1074_v17 = vpop.permute.xlu0 %1073 }
 0x34b   :  { %v1225_v15 = vmul.f32 %v1187_v45, %v1056_v8  ;;  %v1228_v3 = vmul.f32 %v1195_v46, %v1074_v17  ;;  %v2677_v45 = vrot.slane %v2658_v16, %v3446_v9 }
 0x34d   :  { %1258 = vrot.lane.b32.xlu1 %v1225_v15, %s3366_s4  ;;  %1260 = vrot.lane.b32.xlu0 %v1226_v62, %s3366_s4 }
 0x34e   :  { %v1067_v36 = vpop.permute.xlu1 %1066  ;;  %v1085_v1 = vpop.permute.xlu0 %1084 }
 0x34f   :  { %v1227_v20 = vmul.f32 %v1191_v4, %v1067_v36  ;;  %v1230_v41 = vmul.f32 %v1199_v49, %v1085_v1  ;;  %v2681_v4 = vrot.slane %v2666_v51, %v3446_v9 }
 0x351   :  { %1262 = vrot.lane.b32.xlu1 %v1227_v20, %s3366_s4  ;;  %1264 = vrot.lane.b32.xlu0 %v1228_v3, %s3366_s4 }
 0x352   :  { %v1078_v55 = vpop.permute.xlu1 %1077  ;;  %v1096_v13 = vpop.permute.xlu0 %1095 }
 0x353   :  { %v1229_v25 = vmul.f32 %v1195_v46, %v1078_v55  ;;  %v1232_v6 = vmul.f32 %v1203_v44, %v1096_v13  ;;  %v2685_v46 = vrot.slane %v2668_v0, %v3446_v9 }
 0x355   :  { %1266 = vrot.lane.b32.xlu1 %v1229_v25, %s3366_s4  ;;  %1268 = vrot.lane.b32.xlu0 %v1230_v41, %s3366_s4  ;;  %v2693_v25 = vrot.slane %v2665_v52, %v3446_v9 }
 0x356   :  { %v1089_v5 = vpop.permute.xlu1 %1088  ;;  %v1107_v39 = vpop.permute.xlu0 %1106 }
 0x357   :  { %v1231_v37 = vmul.f32 %v1199_v49, %v1089_v5  ;;  %v1234_v63 = vmul.f32 %v1207_v33, %v1107_v39  ;;  %v2689_v49 = vrot.slane %v2651_v2, %v3446_v9 }
 0x359   :  { %1270 = vrot.lane.b32.xlu1 %v1231_v37, %s3366_s4  ;;  %1272 = vrot.lane.b32.xlu0 %v1232_v6, %s3366_s4 }
 0x35a   :  { %v1100_v11 = vpop.permute.xlu1 %1099  ;;  %v1118_v56 = vpop.permute.xlu0 %1117 }
 0x35b   :  { %v1233_v31 = vmul.f32 %v1203_v44, %v1100_v11  ;;  %v1236_v26 = vmul.f32 %v1211_v48, %v1118_v56  ;;  %v2667_v44 = vcombine.high %v2651_v2, %v2651_v2 }
 0x35d   :  { %1274 = vrot.lane.b32.xlu1 %v1233_v31, %s3366_s4  ;;  %1276 = vrot.lane.b32.xlu0 %v1234_v63, %s3366_s4  ;;  %v2697_v37 = vrot.slane %v2667_v44, %v3446_v9  ;;  %v2701_v63 = vrot.slane %v2669_v30, %v3446_v9 }
 0x35e   :  { %v1111_v58 = vpop.permute.xlu1 %1110  ;;  %v1129_v57 = vpop.permute.xlu0 %1128 }
 0x35f   :  { %v1235_v42 = vmul.f32 %v1207_v33, %v1111_v58  ;;  %v1238_v40 = vmul.f32 %v1215_v35, %v1129_v57 }
 0x361   :  { %1278 = vrot.lane.b32.xlu1 %v1235_v42, %s3366_s4  ;;  %1280 = vrot.lane.b32.xlu0 %v1236_v26, %s3366_s4 }
 0x362   :  { %v1122_v10 = vpop.permute.xlu1 %1121  ;;  %v2538_v19 = vpop.permute.xlu0 %2537 }
 0x363   :  { %v1237_v27 = vmul.f32 %v1211_v48, %v1122_v10  ;;  %v2710_v29 = vmul.f32 %v2673_v53, %v2538_v19 }
 0x365   :  { %1282 = vrot.lane.b32.xlu1 %v1237_v27, %s3366_s4  ;;  %1284 = vrot.lane.b32.xlu0 %v1238_v40, %s3366_s4 }
 0x366   :  { %v1133_v21 = vpop.permute.xlu1 %1132  ;;  %v2549_v22 = vpop.permute.xlu0 %2548 }
 0x367   :  { %v1239_v7 = vmul.f32 %v1215_v35, %v1133_v21  ;;  %v2712_v43 = vmul.f32 %v2677_v45, %v2549_v22 }
 0x369   :  { %1286 = vrot.lane.b32.xlu1 %v1239_v7, %s3366_s4  ;;  %2742 = vrot.lane.b32.xlu0 %v2710_v29, %s3366_s4 }
 0x36a   :  { %v2542_v18 = vpop.permute.xlu1 %2541  ;;  %v2560_v54 = vpop.permute.xlu0 %2559 }
 0x36b   :  { %v2711_v32 = vmul.f32 %v2673_v53, %v2542_v18  ;;  %v2714_v62 = vmul.f32 %v2681_v4, %v2560_v54 }
 0x36d   :  { %2744 = vrot.lane.b32.xlu1 %v2711_v32, %s3366_s4  ;;  %2746 = vrot.lane.b32.xlu0 %v2712_v43, %s3366_s4 }
 0x36e   :  { %v2553_v8 = vpop.permute.xlu1 %2552  ;;  %v2571_v17 = vpop.permute.xlu0 %2570 }
 0x36f   :  { %v2713_v15 = vmul.f32 %v2677_v45, %v2553_v8  ;;  %v2716_v3 = vmul.f32 %v2685_v46, %v2571_v17 }
 0x371   :  { %2748 = vrot.lane.b32.xlu1 %v2713_v15, %s3366_s4  ;;  %2750 = vrot.lane.b32.xlu0 %v2714_v62, %s3366_s4 }
 0x372   :  { %v2564_v36 = vpop.permute.xlu1 %2563  ;;  %v2582_v1 = vpop.permute.xlu0 %2581 }
 0x373   :  { %v2715_v20 = vmul.f32 %v2681_v4, %v2564_v36  ;;  %v2718_v13 = vmul.f32 %v2689_v49, %v2582_v1 }
 0x375   :  { %2752 = vrot.lane.b32.xlu1 %v2715_v20, %s3366_s4  ;;  %2754 = vrot.lane.b32.xlu0 %v2716_v3, %s3366_s4 }
 0x376   :  { %v2575_v23 = vpop.permute.xlu1 %2574  ;;  %v2593_v55 = vpop.permute.xlu0 %2592 }
 0x377   :  { %v2717_v41 = vmul.f32 %v2685_v46, %v2575_v23  ;;  %v2720_v39 = vmul.f32 %v2693_v25, %v2593_v55 }
 0x379   :  { %2756 = vrot.lane.b32.xlu1 %v2717_v41, %s3366_s4  ;;  %2758 = vrot.lane.b32.xlu0 %v2718_v13, %s3366_s4 }
 0x37a   :  { %v2586_v61 = vpop.permute.xlu1 %2585  ;;  %v2604_v5 = vpop.permute.xlu0 %2603 }
 0x37b   :  { %v2719_v6 = vmul.f32 %v2689_v49, %v2586_v61  ;;  %v2722_v50 = vmul.f32 %v2697_v37, %v2604_v5 }
 0x37d   :  { %2760 = vrot.lane.b32.xlu1 %v2719_v6, %s3366_s4  ;;  %2762 = vrot.lane.b32.xlu0 %v2720_v39, %s3366_s4 }
 0x37e   :  { %v2597_v33 = vpop.permute.xlu1 %2596  ;;  %v2615_v56 = vpop.permute.xlu0 %2614 }
 0x37f   :  { %v2721_v11 = vmul.f32 %v2693_v25, %v2597_v33  ;;  %v2724_v48 = vmul.f32 %v2701_v63, %v2615_v56 }
 0x381   :  { %2764 = vrot.lane.b32.xlu1 %v2721_v11, %s3366_s4  ;;  %2766 = vrot.lane.b32.xlu0 %v2722_v50, %s3366_s4 }
 0x382   :  { %v2608_v31 = vpop.permute.xlu1 %2607 }
 0x383   :  { %v2723_v24 = vmul.f32 %v2697_v37, %v2608_v31 }
 0x385   :  { %2768 = vrot.lane.b32.xlu1 %v2723_v24, %s3366_s4  ;;  %2770 = vrot.lane.b32.xlu0 %v2724_v48, %s3366_s4 }
 0x386   :  { %v2619_v28 = vpop.permute.xlu1 %2618 }
 0x387   :  { %v2725_v58 = vmul.f32 %v2701_v63, %v2619_v28 }
 0x389   :  { %2772 = vrot.lane.b32.xlu1 %v2725_v58, %s3366_s4 }
 0x3bb   :  { %v1257_v57 = vpop.permute.xlu0 %1256 }
 0x3bf   :  { %v1259_v26 = vpop.permute.xlu1 %1258  ;;  %v1261_v42 = vpop.permute.xlu0 %1260 }
 0x3c3   :  { %v1263_v35 = vpop.permute.xlu1 %1262  ;;  %v1265_v9 = vpop.permute.xlu0 %1264 }
 0x3c4   :  { %v1305_v38 = vcombine.high %v1257_v57, %v1265_v9  ;;  %v1304_v4 = vcombine.low %v1257_v57, %v1265_v9 }
 0x3c6   :  { %v1319_v27 = vrot.slane %v1305_v38, %v3562_v47  ;;  %v4419_v46 = vrot.slane %v1304_v4, %v3562_v47 }
 0x3c7   :  { %v1267_v14 = vpop.permute.xlu1 %1266  ;;  %v1269_v10 = vpop.permute.xlu0 %1268 }
 0x3c8   :  { %v1441_v19 = vcombine.high %v1259_v26, %v1267_v14  ;;  %v1321_v40 = vcombine.high %v1261_v42, %v1269_v10  ;;  %v1320_v54 = vcombine.low %v1261_v42, %v1269_v10  ;;  %v1440_v2 = vcombine.low %v1259_v26, %v1267_v14 }
 0x3ca   :  { %v1335_v53 = vrot.slane %v1321_v40, %v3562_v47  ;;  %v4406_v12 = vrot.slane %v1441_v19, %v3562_v47  ;;  %v4416_v8 = vrot.slane %v1320_v54, %v3562_v47  ;;  %v4435_v41 = vrot.slane %v1440_v2, %v3562_v47 }
 0x3cb   :  { %v1271_v16 = vpop.permute.xlu1 %1270  ;;  %v1273_v21 = vpop.permute.xlu0 %1272 }
 0x3cc   :  { %v1384_v22 = vcombine.low %v1319_v27, %v1335_v53  ;;  %v1385_v29 = vcombine.high %v1319_v27, %v1335_v53  ;;  %v1457_v7 = vcombine.high %v1263_v35, %v1271_v16  ;;  %v1456_v17 = vcombine.low %v1263_v35, %v1271_v16 }
 0x3cd   :  { %v1368_v20 = vcombine.low %v4419_v46, %v4416_v8 }
 0x3ce   :  { %v4409_v45 = vrot.slane %v1457_v7, %v3562_v47  ;;  %v4424_v49 = vrot.slane %v1456_v17, %v3562_v47  ;;  %v4447_v56 = vrot.slane %v1384_v22, %v3570_v59  ;;  %v4471_v35 = vrot.slane %v1385_v29, %v3570_v59 }
 0x3cf   :  { %v1275_v51 = vpop.permute.xlu1 %1274  ;;  %v1277_v18 = vpop.permute.xlu0 %1276  ;;  %v4442_v30 = vrot.slane %v1368_v20, %v3570_v59 }
 0x3d0   :  { %v1520_v43 = vcombine.low %v4406_v12, %v4409_v45  ;;  %v1521_v32 = vcombine.high %v4406_v12, %v4409_v45  ;;  %v1504_v33 = vcombine.low %v4435_v41, %v4424_v49 }
 0x3d2   :  { %v4478_v14 = vrot.slane %v1504_v33, %v3570_v59  ;;  %v4492_v22 = vrot.slane %v1520_v43, %v3570_v59 }
 0x3d3   :  { %v1279_v0 = vpop.permute.xlu1 %1278  ;;  %v1281_v34 = vpop.permute.xlu0 %1280 }
 0x3d4   :  { %v1336_v62 = vcombine.low %v1273_v21, %v1281_v34  ;;  %v1337_v15 = vcombine.high %v1273_v21, %v1281_v34 }
 0x3d6   :  { %v4427_v52 = vrot.slane %v1336_v62, %v3562_v47  ;;  %v1351_v23 = vrot.slane %v1337_v15, %v3562_v47 }
 0x3d7   :  { %v1283_v60 = vpop.permute.xlu1 %1282  ;;  %v1285_v36 = vpop.permute.xlu0 %1284 }
 0x3d8   :  { %v1352_v1 = vcombine.low %v1277_v18, %v1285_v36  ;;  %v1353_v3 = vcombine.high %v1277_v18, %v1285_v36  ;;  %v1472_v25 = vcombine.low %v1275_v51, %v1283_v60  ;;  %v1473_v44 = vcombine.high %v1275_v51, %v1283_v60 }
 0x3d9   :  { %v4508_v18 = vrot.slane %v1521_v32, %v3570_v59 }
 0x3da   :  { %v4431_v55 = vrot.slane %v1352_v1, %v3562_v47  ;;  %v1367_v13 = vrot.slane %v1353_v3, %v3562_v47  ;;  %v4459_v24 = vrot.slane %v1472_v25, %v3562_v47  ;;  %v1487_v28 = vrot.slane %v1473_v44, %v3562_v47 }
 0x3db   :  { %v1287_v61 = vpop.permute.xlu1 %1286  ;;  %v4437_v5 = vpop.permute.xlu0 %2742 }
 0x3dc   :  { %v1400_v39 = vcombine.low %v4427_v52, %v4431_v55  ;;  %v1416_v6 = vcombine.low %v1351_v23, %v1367_v13  ;;  %v1417_v37 = vcombine.high %v1351_v23, %v1367_v13  ;;  %v1488_v50 = vcombine.low %v1279_v0, %v1287_v61 }
 0x3dd   :  { %v1489_v11 = vcombine.high %v1279_v0, %v1287_v61 }
 0x3de   :  { %v4450_v63 = vrot.slane %v1400_v39, %v3570_v59  ;;  %v4453_v31 = vrot.slane %v1416_v6, %v3570_v59  ;;  %v4456_v48 = vrot.slane %v1417_v37, %v3570_v59  ;;  %v4463_v58 = vrot.slane %v1488_v50, %v3562_v47 }
 0x3df   :  { %v1503_v57 = vrot.slane %v1489_v11, %v3562_v47  ;;  %v4466_v26 = vpop.permute.xlu1 %2744  ;;  %v4468_v42 = vpop.permute.xlu0 %2746 }
 0x3e0   :  { %v1433_v9 = vcombine.high %v4442_v30, %v4450_v63  ;;  %v1436_v38 = vcombine.low %v4447_v56, %v4453_v31  ;;  %v1536_v10 = vcombine.low %v4459_v24, %v4463_v58  ;;  %v1437_v27 = vcombine.high %v4447_v56, %v4453_v31 }
 0x3e1   :  { %v1552_v19 = vcombine.low %v1487_v28, %v1503_v57  ;;  %v1553_v40 = vcombine.high %v1487_v28, %v1503_v57  ;;  %v1438_v53 = vcombine.low %v4471_v35, %v4456_v48  ;;  %v1439_v16 = vcombine.high %v4471_v35, %v4456_v48 }
 0x3e2   :  { %1577 = vrot.lane.b32.xlu0 %v1433_v9, %s3371_s9  ;;  %v4495_v29 = vrot.slane %v1536_v10, %v3570_v59 }
 0x3e3   :  { %v4498_v7 = vrot.slane %v1552_v19, %v3570_v59  ;;  %v4501_v12 = vrot.slane %v1553_v40, %v3570_v59  ;;  %v4503_v45 = vpop.permute.xlu1 %2748  ;;  %v4505_v51 = vpop.permute.xlu0 %2750  ;;  %v1401_v19 = vcombine.high %v4427_v52, %v4431_v55 }
 0x3e4   :  { %v1569_v54 = vcombine.high %v4478_v14, %v4495_v29  ;;  %v2790_v23 = vcombine.low %v4437_v5, %v4505_v51 }
 0x3e5   :  { %v1572_v43 = vcombine.low %v4492_v22, %v4498_v7  ;;  %v1573_v4 = vcombine.high %v4492_v22, %v4498_v7  ;;  %v1574_v0 = vcombine.low %v4508_v18, %v4501_v12  ;;  %v1415_v52 = vrot.slane %v1401_v19, %v3570_v59 }
 0x3e6   :  { %1605 = vrot.lane.b32.xlu1 %v1569_v54, %s3371_s9  ;;  %v2798_v6 = vrot.slane %v2790_v23, %v3562_v47  ;;  %v1369_v23 = vcombine.high %v4419_v46, %v4416_v8  ;;  %v1537_v8 = vcombine.high %v4459_v24, %v4463_v58 }
 0x3e7   :  { %v4519_v34 = vpop.permute.xlu1 %2752  ;;  %v4521_v17 = vpop.permute.xlu0 %2754 }
 0x3e8   :  { %v2806_v1 = vcombine.low %v4468_v42, %v4521_v17  ;;  %v2926_v33 = vcombine.low %v4466_v26, %v4519_v34  ;;  %v1551_v19 = vrot.slane %v1537_v8, %v3570_v59 }
 0x3ea   :  { %v2814_v13 = vrot.slane %v2806_v1, %v3562_v47  ;;  %v2934_v54 = vrot.slane %v2926_v33, %v3562_v47 }
 0x3eb   :  { %v4527_v15 = vpop.permute.xlu1 %2756  ;;  %v4529_v2 = vpop.permute.xlu0 %2758 }
 0x3ec   :  { %v2942_v44 = vcombine.low %v4503_v45, %v4527_v15  ;;  %v2854_v50 = vcombine.low %v2798_v6, %v2814_v13  ;;  %v2855_v32 = vcombine.high %v2798_v6, %v2814_v13 }
 0x3ee   :  { %v2950_v57 = vrot.slane %v2942_v44, %v3562_v47 }
 0x3ef   :  { %v4531_v60 = vpop.permute.xlu1 %2760  ;;  %v4533_v36 = vpop.permute.xlu0 %2762 }
 0x3f3   :  { %v4537_v3 = vpop.permute.xlu1 %2764  ;;  %v4539_v20 = vpop.permute.xlu0 %2766 }
 0x3f4   :  { %v2822_v25 = vcombine.low %v4529_v2, %v4539_v20 }
 0x3f6   :  { %v2830_v11 = vrot.slane %v2822_v25, %v3562_v47  ;;  %v4566_v25 = vrot.slane %v2854_v50, %v3570_v59  ;;  %v1383_v50 = vrot.slane %v1369_v23, %v3570_v59  ;;  %v2991_v23 = vcombine.high %v2934_v54, %v2950_v57 }
 0x3f7   :  { %v4548_v61 = vpop.permute.xlu1 %2768  ;;  %v2771_v39 = vpop.permute.xlu0 %2770 }
 0x3f8   :  { %v2838_v37 = vcombine.low %v4533_v36, %v2771_v39  ;;  %v2958_v9 = vcombine.low %v4531_v60, %v4548_v61  ;;  %v1434_v58 = vcombine.low %v1383_v50, %v1415_v52  ;;  %v3005_v8 = vrot.slane %v2991_v23, %v3570_v59 }
 0x3fa   :  { %v2846_v28 = vrot.slane %v2838_v37, %v3562_v47  ;;  %v2990_v37 = vcombine.low %v2934_v54, %v2950_v57  ;;  %v2966_v62 = vrot.slane %v2958_v9, %v3562_v47  ;;  %v2791_v57 = vcombine.high %v4437_v5, %v4505_v51 }
 0x3fb   :  { %v2773_v10 = vpop.permute.xlu1 %2772 }
 0x3fc   :  { %v2886_v40 = vcombine.low %v2830_v11, %v2846_v28  ;;  %v2974_v1 = vcombine.low %v4537_v3, %v2773_v10  ;;  %v2887_v55 = vcombine.high %v2830_v11, %v2846_v28  ;;  %v4585_v11 = vrot.slane %v2990_v37, %v3570_v59 }
 0x3fd   :  { %v2839_v37 = vcombine.high %v4533_v36, %v2771_v39  ;;  %v1435_v39 = vcombine.high %v1383_v50, %v1415_v52  ;;  %v2975_v54 = vcombine.high %v4537_v3, %v2773_v10  ;;  %v2805_v5 = vrot.slane %v2791_v57, %v3562_v47 }
 0x3fe   :  { %v4569_v44 = vrot.slane %v2886_v40, %v3570_v59  ;;  %v2982_v21 = vrot.slane %v2974_v1, %v3562_v47  ;;  %v1505_v40 = vcombine.high %v4435_v41, %v4424_v49  ;;  %v2901_v24 = vrot.slane %v2887_v55, %v3570_v59 }
 0x3ff   :  { %v2869_v1 = vrot.slane %v2855_v32, %v3570_v59  ;;  %v2823_v32 = vcombine.high %v4529_v2, %v4539_v20  ;;  %v2853_v36 = vrot.slane %v2839_v37, %v3562_v47  ;;  %v2943_v2 = vcombine.high %v4503_v45, %v4527_v15 }
 0x400   :  { %v2919_v33 = vcombine.high %v4566_v25, %v4569_v44  ;;  %v3022_v46 = vcombine.low %v2966_v62, %v2982_v21  ;;  %v2918_v9 = vcombine.low %v4566_v25, %v4569_v44  ;;  %v3023_v13 = vcombine.high %v2966_v62, %v2982_v21 }
 0x401   :  { %v1519_v41 = vrot.slane %v1505_v40, %v3570_v59  ;;  %v2920_v55 = vcombine.low %v2869_v1, %v2901_v24  ;;  %v2959_v20 = vcombine.high %v4531_v60, %v4548_v61  ;;  %v2921_v52 = vcombine.high %v2869_v1, %v2901_v24 }
 0x402   :  { %3063 = vrot.lane.b32.xlu0 %v2919_v33, %s3371_s9  ;;  %v4588_v28 = vrot.slane %v3022_v46, %v3570_v59  ;;  %v3037_v21 = vrot.slane %v3023_v13, %v3570_v59  ;;  %v2807_v33 = vcombine.high %v4468_v42, %v4521_v17  ;;  %v2837_v17 = vrot.slane %v2823_v32, %v3562_v47 }
 0x403   :  { %v1570_v62 = vcombine.low %v1519_v41, %v1551_v19  ;;  %v2927_v3 = vcombine.high %v4466_v26, %v4519_v34  ;;  %v2989_v10 = vrot.slane %v2975_v54, %v3562_v47  ;;  %v1571_v50 = vcombine.high %v1519_v41, %v1551_v19 }
 0x404   :  { %v3055_v6 = vcombine.high %v4585_v11, %v4588_v28  ;;  %v3054_v49 = vcombine.low %v4585_v11, %v4588_v28  ;;  %v3056_v46 = vcombine.low %v3005_v8, %v3037_v21  ;;  %v2821_v42 = vrot.slane %v2807_v33, %v3562_v47 }
 0x405   :  { %v2902_v51 = vcombine.low %v2837_v17, %v2853_v36  ;;  %v2957_v45 = vrot.slane %v2943_v2, %v3562_v47  ;;  %v2973_v15 = vrot.slane %v2959_v20, %v3562_v47  ;;  %v2941_v61 = vrot.slane %v2927_v3, %v3562_v47 }
 0x406   :  { %1581 = vrot.lane.b32.xlu0 %v1434_v58, %s3369_s7  ;;  %3091 = vrot.lane.b32.xlu1 %v3055_v6, %s3371_s9  ;;  %v2870_v40 = vcombine.low %v2805_v5, %v2821_v42  ;;  %v3057_v58 = vcombine.high %v3005_v8, %v3037_v21  ;;  %v2871_v41 = vcombine.high %v2805_v5, %v2821_v42 }
 0x407   :  { %v2910_v60 = vrot.slane %v2902_v51, %v3570_v59  ;;  %v3038_v24 = vcombine.low %v2973_v15, %v2989_v10  ;;  %v3006_v34 = vcombine.low %v2941_v61, %v2957_v45  ;;  %v3039_v23 = vcombine.high %v2973_v15, %v2989_v10 }
 0x408   :  { %v2878_v26 = vrot.slane %v2870_v40, %v3570_v59  ;;  %v3007_v56 = vcombine.high %v2941_v61, %v2957_v45  ;;  %v4787_v51 = vcombine.low %v4442_v30, %v4450_v63  ;;  %v4788_v63 = vcombine.low %v4478_v14, %v4495_v29 }
 0x409   :  { %v3046_v13 = vrot.slane %v3038_v24, %v3570_v59  ;;  %v3014_v6 = vrot.slane %v3006_v34, %v3570_v59 }
 0x40a   :  { %3067 = vrot.lane.b32.xlu0 %v2920_v55, %s3369_s7  ;;  %1609 = vrot.lane.b32.xlu1 %v1570_v62, %s3369_s7  ;;  %v2922_v19 = vcombine.low %v2878_v26, %v2910_v60  ;;  %v2923_v1 = vcombine.high %v2878_v26, %v2910_v60  ;;  %v2885_v55 = vrot.slane %v2871_v41, %v3570_v59 }
 0x40b   :  { %v3058_v47 = vcombine.low %v3014_v6, %v3046_v13  ;;  %v3059_v37 = vcombine.high %v3014_v6, %v3046_v13  ;;  %v3021_v22 = vrot.slane %v3007_v56, %v3570_v59 }
 0x40e   :  { %1585 = vrot.lane.b32.xlu0 %v1435_v39, %s3370_s8  ;;  %3095 = vrot.lane.b32.xlu1 %v3056_v46, %s3369_s7 }
 0x412   :  { %3071 = vrot.lane.b32.xlu0 %v2921_v52, %s3370_s8  ;;  %1613 = vrot.lane.b32.xlu1 %v1571_v50, %s3370_s8 }
 0x416   :  { %1589 = vrot.lane.b32.xlu0 %v1436_v38, %s3367_s5  ;;  %3099 = vrot.lane.b32.xlu1 %v3057_v58, %s3370_s8  ;;  %v2903_v38 = vcombine.high %v2837_v17, %v2853_v36 }
 0x41a   :  { %3075 = vrot.lane.b32.xlu0 %v2922_v19, %s3367_s5  ;;  %1617 = vrot.lane.b32.xlu1 %v1572_v43, %s3367_s5  ;;  %v2917_v43 = vrot.slane %v2903_v38, %v3570_v59 }
 0x41c   :  { %v2924_v31 = vcombine.low %v2885_v55, %v2917_v43 }
 0x41e   :  { %1593 = vrot.lane.b32.xlu0 %v1437_v27, %s3368_s6  ;;  %3103 = vrot.lane.b32.xlu1 %v3058_v47, %s3367_s5  ;;  %v3053_v27 = vrot.slane %v3039_v23, %v3570_v59  ;;  %v4786_v59 = vcombine.high %v4508_v18, %v4501_v12 }
 0x420   :  { %v3060_v7 = vcombine.low %v3021_v22, %v3053_v27 }
 0x422   :  { %3079 = vrot.lane.b32.xlu0 %v2923_v1, %s3368_s6  ;;  %1621 = vrot.lane.b32.xlu1 %v1573_v4, %s3368_s6  ;;  %v3061_v4 = vcombine.high %v3021_v22, %v3053_v27 }
 0x426   :  { %1597 = vrot.lane.b32.xlu0 %v1438_v53, %s3365_s1  ;;  %3107 = vrot.lane.b32.xlu1 %v3059_v37, %s3368_s6  ;;  %v2925_v53 = vcombine.high %v2885_v55, %v2917_v43 }
 0x42a   :  { %3083 = vrot.lane.b32.xlu0 %v2924_v31, %s3365_s1  ;;  %1625 = vrot.lane.b32.xlu1 %v1574_v0, %s3365_s1 }
 0x42e   :  { %1601 = vrot.lane.b32.xlu0 %v1439_v16, %s3366_s4  ;;  %3111 = vrot.lane.b32.xlu1 %v3060_v7, %s3365_s1 }
 0x432   :  { %3087 = vrot.lane.b32.xlu0 %v2925_v53, %s3366_s4  ;;  %1629 = vrot.lane.b32.xlu1 %v4786_v59, %s3366_s4 }
 0x436   :  { %3115 = vrot.lane.b32.xlu1 %v3061_v4, %s3366_s4 }
 0x454   :  { %v1578_v0 = vpop.permute.xlu0 %1577 }
 0x455   :  { %v1632_v52 = vsel %vm438_vm0, %v4787_v51, %v1578_v0 }
 0x458   :  { %v1606_v62 = vpop.permute.xlu1 %1605 }
 0x459   :  { %v1645_v60 = vsel %vm438_vm0, %v4788_v63, %v1606_v62 }
 0x474   :  { %v3064_v21 = vpop.permute.xlu0 %3063 }
 0x475   :  { %v3118_v15 = vsel %vm438_vm0, %v2918_v9, %v3064_v21 }
 0x478   :  { %v1582_v33 = vpop.permute.xlu0 %1581  ;;  %v3092_v32 = vpop.permute.xlu1 %3091 }
 0x479   :  { %v1634_v3 = vsel %vm1633_vm9, %v1632_v52, %v1582_v33  ;;  %v3125_v6 = vsel %vm438_vm0, %v3054_v49, %v3092_v32 }
 0x47c   :  { %v3068_v48 = vpop.permute.xlu0 %3067  ;;  %v1610_v35 = vpop.permute.xlu1 %1609 }
 0x47d   :  { %v3119_v61 = vsel %vm1633_vm9, %v3118_v15, %v3068_v48  ;;  %v1646_v26 = vsel %vm1633_vm9, %v1645_v60, %v1610_v35 }
 0x480   :  { %v1586_v16 = vpop.permute.xlu0 %1585  ;;  %v3096_v8 = vpop.permute.xlu1 %3095 }
 0x481   :  { %v1636_v50 = vsel %vm1635_vm10, %v1634_v3, %v1586_v16  ;;  %v3126_v41 = vsel %vm1633_vm9, %v3125_v6, %v3096_v8  ;;  %v4789_v16 = vld [vmem:[#allocation18_spill] sm:$0xff] }
 0x484   :  { %v3072_v57 = vpop.permute.xlu0 %3071  ;;  %v1614_v36 = vpop.permute.xlu1 %1613 }
 0x485   :  { %v3120_v34 = vsel %vm1635_vm10, %v3119_v61, %v3072_v57  ;;  %v1647_v44 = vsel %vm1635_vm10, %v1646_v26, %v1614_v36 }
 0x488   :  { %v1590_v39 = vpop.permute.xlu0 %1589  ;;  %v3100_v54 = vpop.permute.xlu1 %3099 }
 0x489   :  { %v1638_v45 = vsel %vm1637_vm11, %v1636_v50, %v1590_v39  ;;  %v3127_v55 = vsel %vm1635_vm10, %v3126_v41, %v3100_v54  ;;  %v4790_v39 = vld [vmem:[#allocation20_spill] sm:$0xff] }
 0x48c   :  { %v3076_v46 = vpop.permute.xlu0 %3075  ;;  %v1618_v42 = vpop.permute.xlu1 %1617 }
 0x48d   :  { %v3121_v9 = vsel %vm1637_vm11, %v3120_v34, %v3076_v46  ;;  %v1648_v14 = vsel %vm1637_vm11, %v1647_v44, %v1618_v42  ;;  %v4791_v46 = vld [vmem:[#allocation19_spill] sm:$0xff] }
 0x490   :  { %v1594_v12 = vpop.permute.xlu0 %1593  ;;  %v3104_v18 = vpop.permute.xlu1 %3103 }
 0x491   :  { %v1640_v30 = vsel %vm1639_vm12, %v1638_v45, %v1594_v12  ;;  %v3128_v28 = vsel %vm1637_vm11, %v3127_v55, %v3104_v18  ;;  %v4792_v18 = vld [vmem:[#allocation21_spill] sm:$0xff] }
 0x494   :  { %v3080_v17 = vpop.permute.xlu0 %3079  ;;  %v1622_v2 = vpop.permute.xlu1 %1621 }
 0x495   :  { %v3122_v29 = vsel %vm1639_vm12, %v3121_v9, %v3080_v17  ;;  %v1649_v47 = vsel %vm1639_vm12, %v1648_v14, %v1622_v2 }
 0x498   :  { %v1598_v20 = vpop.permute.xlu0 %1597  ;;  %v3108_v5 = vpop.permute.xlu1 %3107 }
 0x499   :  { %v1642_v24 = vsel %vm1641_vm13, %v1640_v30, %v1598_v20  ;;  %v3129_v31 = vsel %vm1639_vm12, %v3128_v28, %v3108_v5 }
 0x49c   :  { %v3084_v10 = vpop.permute.xlu0 %3083  ;;  %v1626_v40 = vpop.permute.xlu1 %1625 }
 0x49d   :  { %v3123_v38 = vsel %vm1641_vm13, %v3122_v29, %v3084_v10  ;;  %v1650_v43 = vsel %vm1641_vm13, %v1649_v47, %v1626_v40 }
 0x4a0   :  { %v1602_v58 = vpop.permute.xlu0 %1601  ;;  %v3112_v19 = vpop.permute.xlu1 %3111 }
 0x4a1   :  { %v1644_v25 = vsel %vm1643_vm14, %v1642_v24, %v1602_v58  ;;  %v3130_v27 = vsel %vm1641_vm13, %v3129_v31, %v3112_v19 }
 0x4a2   :  { %v3168_v13 = vmul.f32 -1.442695, %v1644_v25 }
 0x4a4   :  { %3268 = vpow2.f32 %v3168_v13  ;;  %v3088_v1 = vpop.permute.xlu0 %3087  ;;  %v1630_v23 = vpop.permute.xlu1 %1629 }
 0x4a5   :  { %v3124_v37 = vsel %vm1643_vm14, %v3123_v38, %v3088_v1  ;;  %v1651_v56 = vsel %vm1643_vm14, %v1650_v43, %v1630_v23 }
 0x4a6   :  { %v3172_v11 = vmul.f32 -1.442695, %v3124_v37  ;;  %v3169_v49 = vmul.f32 -1.442695, %v1651_v56 }
 0x4a8   :  { %3270 = vpow2.f32 %v3172_v11  ;;  %v3116_v22 = vpop.permute.xlu1 %3115 }
 0x4a9   :  { %3272 = vpow2.f32 %v3169_v49  ;;  %v3131_v7 = vsel %vm1643_vm14, %v3130_v27, %v3116_v22 }
 0x4aa   :  { %v3173_v53 = vmul.f32 -1.442695, %v3131_v7 }
 0x4ac   :  { %3274 = vpow2.f32 %v3173_v53 }
 0x4ae   :  { %v3269_v59 = vpop.eup %3268 }
 0x4af   :  { %v1658_v4 = vadd.f32 1.0, %v3269_v59 }
 0x4b1   :  { %3276 = vrcp.f32 %v1658_v4 }
 0x4b2   :  { %v3271_v0 = vpop.eup %3270 }
 0x4b3   :  { %v3273_v21 = vpop.eup %3272  ;;  %v3138_v62 = vadd.f32 1.0, %v3271_v0 }
 0x4b4   :  { %v1659_v33 = vadd.f32 1.0, %v3273_v21 }
 0x4b5   :  { %3278 = vrcp.f32 %v3138_v62 }
 0x4b6   :  { %3280 = vrcp.f32 %v1659_v33  ;;  %v3275_v32 = vpop.eup %3274 }
 0x4b7   :  { %v3139_v48 = vadd.f32 1.0, %v3275_v32 }
 0x4b9   :  { %3282 = vrcp.f32 %v3139_v48 }
 0x4bb   :  { %v3277_v35 = vpop.eup %3276 }
 0x4bc   :  { %v1664_v8 = vmul.f32 %v3277_v35, %v4789_v16 }
 0x4be   :  { %1666 = vst [vmem:[#allocation7] sm:$0xff] %v1664_v8 }
 0x4bf   :  { %v3279_v57 = vpop.eup %3278 }
 0x4c0   :  { %v3281_v36 = vpop.eup %3280  ;;  %v3144_v54 = vmul.f32 %v3279_v57, %v4790_v39 }
 0x4c1   :  { %v1665_v42 = vmul.f32 %v3281_v36, %v4791_v46 }
 0x4c2   :  { %3146 = vst [vmem:[#allocation7 + $0x10] sm:$0xff] %v3144_v54 }
 0x4c3   :  { %1667 = vst [vmem:[#allocation7 + $0x8] sm:$0xff] %v1665_v42  ;;  %v3283_v12 = vpop.eup %3282 }
 0x4c4   :  { %v3145_v17 = vmul.f32 %v3283_v12, %v4792_v18 }
 0x4c6   :  { %3147 = vst [vmem:[#allocation7 + $0x18] sm:$0xff] %v3145_v17 }
 0x4c7   :  { %3340 = shalt.err (!%p3337_p6)
}
 0x4c8   :  { %s3341_s15 = scalar_lea.hbm %s4738_s2, 512 }
 0x4c9   :  { %p3342_p7 = scmp.ne.s32.totalorder %s4738_s2, %s3341_s15  ;;  %p3345_p8 = scmp.lt.u32.totalorder %s3341_s15, %s4738_s2 }
 0x4cb   :  { %p3347_p9 = pnand %p3345_p8, %p3342_p7 }
 0x4cd   :  { %3350 = shalt.err (!%p3347_p9)
}
 0x4ce   :  { %s3402_s20 = smov 256  }
 0x4cf   :  { %3159 = dma.vmem_to_hbm [thread:$0]  %s3154_s11, 512, %s4738_s2, [#allocation4], %s3402_s20, %s3402_s20, %s3371_s9  }
 0x4d0   :  { %3355 = dma.done.wait [#allocation4], 512  }
 0x4d1   :  { %3356 = vsyncadd [#allocation4], 4294966784 }
 0x4d2   :  { %3163 = vsyncpa [#allocation3], 1 }
 0x4d3   :  { %3164 = vsyncpa [#allocation6], 1 }
 0x4d4   :  { %3165 = vsyncpa [#allocation4], 1 }

</bundles_post_ra>
